<compile_context>
chip_gen: v7x
topology: tpu7x:2x2x1
jax: 0.10.0
libtpu: 0.0.40
codegen_flags: <defaults>
</compile_context>

<pallas_src>
import functools

import numpy as np
import jax
import jax.numpy as jnp
from jax.experimental import pallas as pl
from jax.experimental.pallas import tpu as pltpu

# ---------------- problem sizes ----------------
B, C, H, W = 2, 4, 16, 16          # per-view batch, channels, spatial (NCHW like PyTorch)
KH = KW = 3                         # synthetic encoder 3x3 conv
HP, WP = H + 2, W + 2               # zero-padded spatial extents
F_ENC = 128                         # synthetic backbone feature dim == projection_size
HIDDEN = 512                        # g: Linear(projection_size, 512, bias=False)
OUT = 128                           # g: Linear(512, 128, bias=True)
BN_EPS = 1e-5                       # nn.BatchNorm1d default
NORM_EPS = 1e-12                    # F.normalize default eps
WF = W * F_ENC                      # conv-map column width (w, f) -> 2048 lanes, dense

_HI = jax.lax.Precision.HIGHEST
_VMEM = pl.BlockSpec(memory_space=pltpu.MemorySpace.VMEM)


def _bf16_dot(a, b):
    """Explicitly pinned MXU path: bf16 operands, f32 accumulation."""
    return jnp.dot(a.astype(jnp.bfloat16), b.astype(jnp.bfloat16),
                   preferred_element_type=jnp.float32)


# --------------------------------------------------------------------------
# Fused kernel: synthetic encoder (single-matmul 3x3 conv + ReLU + GAP),
# projection head g (Linear -> BatchNorm1d(per-view batch stats) -> ReLU -> Linear),
# and F.normalize of both feat and projection.
# --------------------------------------------------------------------------
def _simclr_fused_kernel(x3_ref, wband_ref, p_ref, w1_ref, gamma_ref, beta_ref,
                         w2_ref, b2_ref, featn_ref, outn_ref, *, n_views):
    """Refs:
      x3_ref    : (NR, KH*WP*C) bf16  padded NHWC rows with the dy shifts folded into K
                                      (row r = (sample*HP + h) holds padded rows h, h+1, h+2)
      wband_ref : (KH*WP*C, W*F) bf16 banded conv weights (dy, dx, c folded into the band)
      p_ref     : (NB, NR)       bf16 row pooling: mean over valid h rows, per sample
      w1/w2     : bf16 linear weights (transposed); gamma/beta/b2: f32
    """
    eps2 = NORM_EPS * NORM_EPS

    # ---- encoder: 3x3 "same" conv as ONE MXU matmul (K = KH*WP*C = 216), then ReLU ----
    hmap = jnp.maximum(_bf16_dot(x3_ref[...], wband_ref[...]), 0.0)        # (NR, W*F) f32

    # ---- global average pool: row-pool FIRST (mean over valid h rows, per sample) ----
    pooled = _bf16_dot(p_ref[...], hmap)                                   # (NB, W*F) f32
    # ... then sum the W lane-aligned 128-wide blocks (no (W*F, F) identity constant)
    feat = pooled[:, 0:F_ENC]
    for w in range(1, W):                                                  # static unroll
        feat = feat + pooled[:, w * F_ENC:(w + 1) * F_ENC]                 # (NB, F) f32

    # ---- F.normalize(feat, dim=-1): x * rsqrt(max(sum(x^2), eps^2)) (EUP, no divide) ----
    featn_ref[...] = feat * jax.lax.rsqrt(
        jnp.maximum(jnp.sum(feat * feat, axis=-1, keepdims=True), eps2))

    # ---- projection head g, applied PER VIEW (matches separate g(feat_x)/g(feat_y):
    #      BatchNorm1d training-mode batch statistics are computed per view) ----
    h = _bf16_dot(feat, w1_ref[...])                                       # (NB, HIDDEN) f32
    nb = h.shape[0]
    rows = nb // n_views
    gamma, beta, b2 = gamma_ref[...], beta_ref[...], b2_ref[...]
    for v in range(n_views):                                               # static unroll
        hv = h[v * rows:(v + 1) * rows, :]
        mu = jnp.mean(hv, axis=0, keepdims=True)                           # per-view mean
        d = hv - mu
        var = jnp.mean(d * d, axis=0, keepdims=True)                       # biased (training BN)
        hn = d * jax.lax.rsqrt(var + BN_EPS) * gamma + beta
        out_v = _bf16_dot(jnp.maximum(hn, 0.0), w2_ref[...]) + b2          # (rows, OUT) f32
        outn_ref[v * rows:(v + 1) * rows, :] = out_v * jax.lax.rsqrt(
            jnp.maximum(jnp.sum(out_v * out_v, axis=-1, keepdims=True), eps2))


# --------------------------------------------------------------------------
# Host-side constant builder (pure numpy -> baked as jit constant, exact values)
# --------------------------------------------------------------------------
def _row_pool_matrix(nb, nr):
    """P[b, b'*HP + h] = 1/(H*W) iff b' == b and h < H (global average pool, valid rows only).
    1/(H*W) = 1/256 is exactly representable in bf16."""
    r = np.arange(nr)
    p = (r[None, :] // HP == np.arange(nb)[:, None]) & (r[None, :] % HP < H)
    return jnp.asarray(p.astype(np.float32) / float(H * W)).astype(jnp.bfloat16)


# --------------------------------------------------------------------------
# Parameters (PyTorch layout) and one-time weight preprocessing
# --------------------------------------------------------------------------
def init_params(key):
    k1, k2, k3, k4 = jax.random.split(key, 4)
    conv_w = 0.1 * jax.random.normal(k1, (F_ENC, C, KH, KW), jnp.float32)
    # nn.Linear(projection_size, 512, bias=False): weight (512, P) stored transposed (P, 512)
    w1 = 0.05 * jax.random.normal(k2, (F_ENC, HIDDEN), jnp.float32)
    gamma = jnp.ones((1, HIDDEN), jnp.float32)      # BatchNorm1d weight init
    beta = jnp.zeros((1, HIDDEN), jnp.float32)      # BatchNorm1d bias init
    # nn.Linear(512, 128, bias=True): weight (128, 512) stored transposed (512, 128)
    w2 = 0.05 * jax.random.normal(k3, (HIDDEN, OUT), jnp.float32)
    b2 = 0.01 * jax.random.normal(k4, (1, OUT), jnp.float32)
    return dict(conv_w=conv_w, w1=w1, gamma=gamma, beta=beta, w2=w2, b2=b2)


def prepare_params(params):
    """One-time preprocessing: fold the 3x3 conv kernel into a single banded matmul weight.

    wband[(dy, w'*C + c), w*F + f] = sum_dx [w' == w + dx] * conv_w[f, c, dy, dx]
    (dy is folded into the contraction dim to match the x3 layout); stored bf16 for the MXU.
    """
    wk = jnp.transpose(params["conv_w"], (2, 3, 1, 0))                  # (KH, KW, C, F)
    wprime, wcol = np.arange(WP), np.arange(W)
    e = (wprime[None, :, None] == wcol[None, None, :] + np.arange(KW)[:, None, None])
    e = jnp.asarray(e.astype(np.float32))                               # (KW, WP, W)
    wband = jnp.einsum("xvw,yxcf->yvcwf", e, wk, precision=_HI)         # exact placement
    wband = wband.reshape(KH * WP * C, W * F_ENC)                       # (216, 2048)
    return dict(wband=wband.astype(jnp.bfloat16),
                w1=params["w1"].astype(jnp.bfloat16),
                gamma=params["gamma"], beta=params["beta"],
                w2=params["w2"].astype(jnp.bfloat16), b2=params["b2"])


# --------------------------------------------------------------------------
# Forward wrappers
# --------------------------------------------------------------------------
def _fused_call(kparams, x_nchw, n_views):
    nb = x_nchw.shape[0]                      # total samples across views
    nr = nb * HP
    # Host prologue (cheap at this size): NCHW -> padded NHWC -> compact (NR, WP*C) rows,
    # then fold the KH row-shifts into the contraction dim (rows past the end are zero;
    # conv rows with h >= H never reach the pooled output, the row-pool masks them).
    # TODO(synk): at scaled batch, fold this pad/concat into the producer or the kernel.
    xp = jnp.pad(jnp.transpose(x_nchw, (0, 2, 3, 1)),
                 ((0, 0), (1, 1), (1, 1), (0, 0)))                      # (nb, HP, WP, C)
    xflat = xp.reshape(nr, WP * C).astype(jnp.float32)
    xtail = jnp.pad(xflat, ((0, KH - 1), (0, 0)))                       # 2 zero rows at end
    x3 = jnp.concatenate([xtail[dy:dy + nr] for dy in range(KH)], axis=1)
    x3 = x3.astype(jnp.bfloat16)                                        # (NR, KH*WP*C)

    p_pool = _row_pool_matrix(nb, nr)

    kernel = functools.partial(_simclr_fused_kernel, n_views=n_views)

    # Gridless: whole problem is < 2 MiB of VMEM.  At scaled batch, add a leading sample
    # grid axis with dimension_semantics=("parallel", ...) (2x on v7x's two TensorCores),
    # keep wband/w1/w2 as resident non-blocked operands, and size the block for 64 MiB VMEM.
    featn, outn = pl.pallas_call(
        kernel,
        out_shape=(jax.ShapeDtypeStruct((nb, F_ENC), jnp.float32),
                   jax.ShapeDtypeStruct((nb, OUT), jnp.float32)),
        in_specs=[_VMEM] * 8,
        out_specs=(_VMEM, _VMEM),
    )(x3, kparams["wband"], p_pool, kparams["w1"], kparams["gamma"],
      kparams["beta"], kparams["w2"], kparams["b2"])
    return featn, outn


def simclr_forward(kparams, x, y=None):
    """Matches SimCLR.forward: normalized features and projections (per-view BN stats)."""
    if y is None:
        featn, outn = _fused_call(kparams, x, n_views=1)
        return featn, outn
    xin = jnp.concatenate([x, y], axis=0)           # both views in ONE kernel launch
    featn, outn = _fused_call(kparams, xin, n_views=2)
    b = x.shape[0]
    return featn[:b], featn[b:], outn[:b], outn[b:]


# --------------------------------------------------------------------------
# Pure-JAX reference (for validation only)
# --------------------------------------------------------------------------
def _reference_encoder(params, x_nchw):
    xp = jnp.pad(x_nchw, ((0, 0), (0, 0), (1, 1), (1, 1)))
    cols = [xp[:, :, dy:dy + H, dx:dx + W] for dy in range(KH) for dx in range(KW)]
    pat = jnp.stack(cols, axis=2)                                       # (NB, C, 9, H, W)
    conv = jnp.einsum("bckhw,fck->bfhw", pat,
                      params["conv_w"].reshape(F_ENC, C, KH * KW), precision=_HI)
    return jnp.mean(jax.nn.relu(conv), axis=(2, 3))                     # (NB, F_ENC)


def _reference_head(params, feat):
    h = jnp.dot(feat, params["w1"], precision=_HI)
    mu = jnp.mean(h, axis=0, keepdims=True)
    var = jnp.mean((h - mu) ** 2, axis=0, keepdims=True)                # biased (training BN)
    hn = (h - mu) * jax.lax.rsqrt(var + BN_EPS) * params["gamma"] + params["beta"]
    return jnp.dot(jax.nn.relu(hn), params["w2"], precision=_HI) + params["b2"]


def _normalize(v):
    return v / jnp.maximum(jnp.linalg.norm(v, axis=-1, keepdims=True), NORM_EPS)


def _reference_forward(params, x, y=None):
    feat_x = _reference_encoder(params, x)
    out_x = _reference_head(params, feat_x)
    if y is None:
        return _normalize(feat_x), _normalize(out_x)
    feat_y = _reference_encoder(params, y)
    out_y = _reference_head(params, feat_y)
    return _normalize(feat_x), _normalize(feat_y), _normalize(out_x), _normalize(out_y)


if __name__ == "__main__":
    key = jax.random.PRNGKey(0)
    kp, kx, ky = jax.random.split(key, 3)
    params = init_params(kp)
    kparams = prepare_params(params)     # one-time weight preprocessing (bf16, banded conv)
    x = jax.random.normal(kx, (B, C, H, W), jnp.float32)
    y = jax.random.normal(ky, (B, C, H, W), jnp.float32)

    fwd2 = jax.jit(lambda p, a, b_: simclr_forward(p, a, b_))
    fwd1 = jax.jit(lambda p, a: simclr_forward(p, a))

    featn_x, featn_y, outn_x, outn_y = jax.block_until_ready(fwd2(kparams, x, y))
    featn_x1, outn_x1 = jax.block_until_ready(fwd1(kparams, x))

    # shape / unit-norm sanity
    assert featn_x.shape == (B, F_ENC) and outn_x.shape == (B, OUT)
    assert featn_y.shape == (B, F_ENC) and outn_y.shape == (B, OUT)
    assert bool(jnp.allclose(jnp.linalg.norm(featn_x, axis=-1), 1.0, atol=1e-4))
    assert bool(jnp.allclose(jnp.linalg.norm(outn_y, axis=-1), 1.0, atol=1e-4))
    assert bool(jnp.all(jnp.isfinite(outn_x)) and jnp.all(jnp.isfinite(outn_y)))
    # two-view batched call must agree with the single-view call (g / BN applied per view)
    assert bool(jnp.allclose(featn_x, featn_x1, atol=1e-4))
    assert bool(jnp.allclose(outn_x, outn_x1, atol=1e-4))

    # validate the fused bf16-MXU kernel against a pure-JAX f32 reference of the same forward
    ref = _reference_forward(params, x, y)
    for got, want in zip((featn_x, featn_y, outn_x, outn_y), ref):
        err = float(jnp.max(jnp.abs(got - want)))
        assert err < 2e-2, err

    print("KERNEL_OK")
</pallas_src>

<mosaic_0001>
module attributes {stable_mosaic.version = 11 : i64} {
  func.func @_simclr_fused_kernel(%arg0: memref<72x216xbf16, #tpu.memory_space<vmem>>, %arg1: memref<216x2048xbf16, #tpu.memory_space<vmem>>, %arg2: memref<4x72xbf16, #tpu.memory_space<vmem>>, %arg3: memref<128x512xbf16, #tpu.memory_space<vmem>>, %arg4: memref<1x512xf32, #tpu.memory_space<vmem>>, %arg5: memref<1x512xf32, #tpu.memory_space<vmem>>, %arg6: memref<512x128xbf16, #tpu.memory_space<vmem>>, %arg7: memref<1x128xf32, #tpu.memory_space<vmem>>, %arg8: memref<4x128xf32, #tpu.memory_space<vmem>>, %arg9: memref<4x128xf32, #tpu.memory_space<vmem>>) attributes {dimension_semantics = [], scalar_prefetch = 0 : i64, scratch_operands = 0 : i64, tpu.core_type = #tpu.core_type<tc>} {
    %c0 = arith.constant 0 : index
    %c0_0 = arith.constant 0 : index
    %0 = vector.load %arg0[%c0, %c0_0] : memref<72x216xbf16, #tpu.memory_space<vmem>>, vector<72x216xbf16>
    %c0_1 = arith.constant 0 : index
    %c0_2 = arith.constant 0 : index
    %1 = vector.load %arg1[%c0_1, %c0_2] : memref<216x2048xbf16, #tpu.memory_space<vmem>>, vector<216x2048xbf16>
    %cst = arith.constant dense<0.000000e+00> : vector<72x2048xf32>
    %2 = tpu.matmul %0, %1, %cst {dimension_numbers = #tpu.dot_dimension_numbers<[1], [0], [0], [1], [0, 0, 1, 1], [], []>} : vector<72x216xbf16>, vector<216x2048xbf16>, vector<72x2048xf32> -> vector<72x2048xf32>
    %cst_3 = arith.constant 0.000000e+00 : f32
    %3 = vector.broadcast %cst_3 : f32 to vector<72x2048xf32>
    %4 = arith.maximumf %2, %3 : vector<72x2048xf32>
    %c0_4 = arith.constant 0 : index
    %c0_5 = arith.constant 0 : index
    %5 = vector.load %arg2[%c0_4, %c0_5] : memref<4x72xbf16, #tpu.memory_space<vmem>>, vector<4x72xbf16>
    %6 = arith.truncf %4 : vector<72x2048xf32> to vector<72x2048xbf16>
    %cst_6 = arith.constant dense<0.000000e+00> : vector<4x2048xf32>
    %7 = tpu.matmul %5, %6, %cst_6 {dimension_numbers = #tpu.dot_dimension_numbers<[1], [0], [0], [1], [0, 0, 1, 1], [], []>} : vector<4x72xbf16>, vector<72x2048xbf16>, vector<4x2048xf32> -> vector<4x2048xf32>
    %8 = vector.extract_strided_slice %7 {offsets = [0, 0], sizes = [4, 128], strides = [1, 1]} : vector<4x2048xf32> to vector<4x128xf32>
    %9 = vector.extract_strided_slice %7 {offsets = [0, 128], sizes = [4, 128], strides = [1, 1]} : vector<4x2048xf32> to vector<4x128xf32>
    %10 = arith.addf %8, %9 : vector<4x128xf32>
    %11 = vector.extract_strided_slice %7 {offsets = [0, 256], sizes = [4, 128], strides = [1, 1]} : vector<4x2048xf32> to vector<4x128xf32>
    %12 = arith.addf %10, %11 : vector<4x128xf32>
    %13 = vector.extract_strided_slice %7 {offsets = [0, 384], sizes = [4, 128], strides = [1, 1]} : vector<4x2048xf32> to vector<4x128xf32>
    %14 = arith.addf %12, %13 : vector<4x128xf32>
    %15 = vector.extract_strided_slice %7 {offsets = [0, 512], sizes = [4, 128], strides = [1, 1]} : vector<4x2048xf32> to vector<4x128xf32>
    %16 = arith.addf %14, %15 : vector<4x128xf32>
    %17 = vector.extract_strided_slice %7 {offsets = [0, 640], sizes = [4, 128], strides = [1, 1]} : vector<4x2048xf32> to vector<4x128xf32>
    %18 = arith.addf %16, %17 : vector<4x128xf32>
    %19 = vector.extract_strided_slice %7 {offsets = [0, 768], sizes = [4, 128], strides = [1, 1]} : vector<4x2048xf32> to vector<4x128xf32>
    %20 = arith.addf %18, %19 : vector<4x128xf32>
    %21 = vector.extract_strided_slice %7 {offsets = [0, 896], sizes = [4, 128], strides = [1, 1]} : vector<4x2048xf32> to vector<4x128xf32>
    %22 = arith.addf %20, %21 : vector<4x128xf32>
    %23 = vector.extract_strided_slice %7 {offsets = [0, 1024], sizes = [4, 128], strides = [1, 1]} : vector<4x2048xf32> to vector<4x128xf32>
    %24 = arith.addf %22, %23 : vector<4x128xf32>
    %25 = vector.extract_strided_slice %7 {offsets = [0, 1152], sizes = [4, 128], strides = [1, 1]} : vector<4x2048xf32> to vector<4x128xf32>
    %26 = arith.addf %24, %25 : vector<4x128xf32>
    %27 = vector.extract_strided_slice %7 {offsets = [0, 1280], sizes = [4, 128], strides = [1, 1]} : vector<4x2048xf32> to vector<4x128xf32>
    %28 = arith.addf %26, %27 : vector<4x128xf32>
    %29 = vector.extract_strided_slice %7 {offsets = [0, 1408], sizes = [4, 128], strides = [1, 1]} : vector<4x2048xf32> to vector<4x128xf32>
    %30 = arith.addf %28, %29 : vector<4x128xf32>
    %31 = vector.extract_strided_slice %7 {offsets = [0, 1536], sizes = [4, 128], strides = [1, 1]} : vector<4x2048xf32> to vector<4x128xf32>
    %32 = arith.addf %30, %31 : vector<4x128xf32>
    %33 = vector.extract_strided_slice %7 {offsets = [0, 1664], sizes = [4, 128], strides = [1, 1]} : vector<4x2048xf32> to vector<4x128xf32>
    %34 = arith.addf %32, %33 : vector<4x128xf32>
    %35 = vector.extract_strided_slice %7 {offsets = [0, 1792], sizes = [4, 128], strides = [1, 1]} : vector<4x2048xf32> to vector<4x128xf32>
    %36 = arith.addf %34, %35 : vector<4x128xf32>
    %37 = vector.extract_strided_slice %7 {offsets = [0, 1920], sizes = [4, 128], strides = [1, 1]} : vector<4x2048xf32> to vector<4x128xf32>
    %38 = arith.addf %36, %37 : vector<4x128xf32>
    %39 = arith.mulf %38, %38 : vector<4x128xf32>
    %cst_7 = arith.constant dense<0.000000e+00> : vector<4xf32>
    %40 = vector.multi_reduction <add>, %39, %cst_7 [1] : vector<4x128xf32> to vector<4xf32>
    %41 = vector.shape_cast %40 : vector<4xf32> to vector<4x1xf32>
    %cst_8 = arith.constant 1.000000e-24 : f32
    %42 = vector.broadcast %cst_8 : f32 to vector<4x1xf32>
    %43 = arith.maximumf %41, %42 : vector<4x1xf32>
    %44 = math.rsqrt %43 : vector<4x1xf32>
    %45 = vector.broadcast %44 : vector<4x1xf32> to vector<4x128xf32>
    %46 = arith.mulf %38, %45 : vector<4x128xf32>
    %c0_9 = arith.constant 0 : index
    %c0_10 = arith.constant 0 : index
    %47 = vector.load %arg8[%c0_9, %c0_10] : memref<4x128xf32, #tpu.memory_space<vmem>>, vector<4x128xf32>
    tpu.vector_store %arg8[%c0_9, %c0_10], %46 {strides = array<i32>} : memref<4x128xf32, #tpu.memory_space<vmem>>, vector<4x128xf32>,
    %c0_11 = arith.constant 0 : index
    %c0_12 = arith.constant 0 : index
    %48 = vector.load %arg3[%c0_11, %c0_12] : memref<128x512xbf16, #tpu.memory_space<vmem>>, vector<128x512xbf16>
    %49 = arith.truncf %38 : vector<4x128xf32> to vector<4x128xbf16>
    %cst_13 = arith.constant dense<0.000000e+00> : vector<4x512xf32>
    %50 = tpu.matmul %49, %48, %cst_13 {dimension_numbers = #tpu.dot_dimension_numbers<[1], [0], [0], [1], [0, 0, 1, 1], [], []>} : vector<4x128xbf16>, vector<128x512xbf16>, vector<4x512xf32> -> vector<4x512xf32>
    %c0_14 = arith.constant 0 : index
    %c0_15 = arith.constant 0 : index
    %51 = vector.load %arg4[%c0_14, %c0_15] : memref<1x512xf32, #tpu.memory_space<vmem>>, vector<1x512xf32>
    %c0_16 = arith.constant 0 : index
    %c0_17 = arith.constant 0 : index
    %52 = vector.load %arg5[%c0_16, %c0_17] : memref<1x512xf32, #tpu.memory_space<vmem>>, vector<1x512xf32>
    %c0_18 = arith.constant 0 : index
    %c0_19 = arith.constant 0 : index
    %53 = vector.load %arg7[%c0_18, %c0_19] : memref<1x128xf32, #tpu.memory_space<vmem>>, vector<1x128xf32>
    %54 = vector.extract_strided_slice %50 {offsets = [0, 0], sizes = [2, 512], strides = [1, 1]} : vector<4x512xf32> to vector<2x512xf32>
    %cst_20 = arith.constant dense<0.000000e+00> : vector<512xf32>
    %55 = vector.multi_reduction <add>, %54, %cst_20 [0] : vector<2x512xf32> to vector<512xf32>
    %56 = vector.shape_cast %55 : vector<512xf32> to vector<1x512xf32>
    %cst_21 = arith.constant 2.000000e+00 : f32
    %57 = vector.broadcast %cst_21 : f32 to vector<1x512xf32>
    %58 = arith.divf %56, %57 : vector<1x512xf32>
    %59 = vector.broadcast %58 : vector<1x512xf32> to vector<2x512xf32>
    %60 = arith.subf %54, %59 : vector<2x512xf32>
    %61 = arith.mulf %60, %60 : vector<2x512xf32>
    %cst_22 = arith.constant dense<0.000000e+00> : vector<512xf32>
    %62 = vector.multi_reduction <add>, %61, %cst_22 [0] : vector<2x512xf32> to vector<512xf32>
    %63 = vector.shape_cast %62 : vector<512xf32> to vector<1x512xf32>
    %cst_23 = arith.constant 2.000000e+00 : f32
    %64 = vector.broadcast %cst_23 : f32 to vector<1x512xf32>
    %65 = arith.divf %63, %64 : vector<1x512xf32>
    %cst_24 = arith.constant 9.99999974E-6 : f32
    %66 = vector.broadcast %cst_24 : f32 to vector<1x512xf32>
    %67 = arith.addf %65, %66 : vector<1x512xf32>
    %68 = math.rsqrt %67 : vector<1x512xf32>
    %69 = vector.broadcast %68 : vector<1x512xf32> to vector<2x512xf32>
    %70 = arith.mulf %60, %69 : vector<2x512xf32>
    %71 = vector.broadcast %51 : vector<1x512xf32> to vector<2x512xf32>
    %72 = arith.mulf %70, %71 : vector<2x512xf32>
    %73 = vector.broadcast %52 : vector<1x512xf32> to vector<2x512xf32>
    %74 = arith.addf %72, %73 : vector<2x512xf32>
    %cst_25 = arith.constant 0.000000e+00 : f32
    %75 = vector.broadcast %cst_25 : f32 to vector<2x512xf32>
    %76 = arith.maximumf %74, %75 : vector<2x512xf32>
    %c0_26 = arith.constant 0 : index
    %c0_27 = arith.constant 0 : index
    %77 = vector.load %arg6[%c0_26, %c0_27] : memref<512x128xbf16, #tpu.memory_space<vmem>>, vector<512x128xbf16>
    %78 = arith.truncf %76 : vector<2x512xf32> to vector<2x512xbf16>
    %cst_28 = arith.constant dense<0.000000e+00> : vector<2x128xf32>
    %79 = tpu.matmul %78, %77, %cst_28 {dimension_numbers = #tpu.dot_dimension_numbers<[1], [0], [0], [1], [0, 0, 1, 1], [], []>} : vector<2x512xbf16>, vector<512x128xbf16>, vector<2x128xf32> -> vector<2x128xf32>
    %80 = vector.broadcast %53 : vector<1x128xf32> to vector<2x128xf32>
    %81 = arith.addf %79, %80 : vector<2x128xf32>
    %82 = arith.mulf %81, %81 : vector<2x128xf32>
    %cst_29 = arith.constant dense<0.000000e+00> : vector<2xf32>
    %83 = vector.multi_reduction <add>, %82, %cst_29 [1] : vector<2x128xf32> to vector<2xf32>
    %84 = vector.shape_cast %83 : vector<2xf32> to vector<2x1xf32>
    %cst_30 = arith.constant 1.000000e-24 : f32
    %85 = vector.broadcast %cst_30 : f32 to vector<2x1xf32>
    %86 = arith.maximumf %84, %85 : vector<2x1xf32>
    %87 = math.rsqrt %86 : vector<2x1xf32>
    %88 = vector.broadcast %87 : vector<2x1xf32> to vector<2x128xf32>
    %89 = arith.mulf %81, %88 : vector<2x128xf32>
    %c0_31 = arith.constant 0 : index
    %c0_32 = arith.constant 0 : index
    %90 = vector.load %arg9[%c0_31, %c0_32] : memref<4x128xf32, #tpu.memory_space<vmem>>, vector<2x128xf32>
    tpu.vector_store %arg9[%c0_31, %c0_32], %89 {strides = array<i32>} : memref<4x128xf32, #tpu.memory_space<vmem>>, vector<2x128xf32>,
    %91 = vector.extract_strided_slice %50 {offsets = [2, 0], sizes = [2, 512], strides = [1, 1]} : vector<4x512xf32> to vector<2x512xf32>
    %cst_33 = arith.constant dense<0.000000e+00> : vector<512xf32>
    %92 = vector.multi_reduction <add>, %91, %cst_33 [0] : vector<2x512xf32> to vector<512xf32>
    %93 = vector.shape_cast %92 : vector<512xf32> to vector<1x512xf32>
    %cst_34 = arith.constant 2.000000e+00 : f32
    %94 = vector.broadcast %cst_34 : f32 to vector<1x512xf32>
    %95 = arith.divf %93, %94 : vector<1x512xf32>
    %96 = vector.broadcast %95 : vector<1x512xf32> to vector<2x512xf32>
    %97 = arith.subf %91, %96 : vector<2x512xf32>
    %98 = arith.mulf %97, %97 : vector<2x512xf32>
    %cst_35 = arith.constant dense<0.000000e+00> : vector<512xf32>
    %99 = vector.multi_reduction <add>, %98, %cst_35 [0] : vector<2x512xf32> to vector<512xf32>
    %100 = vector.shape_cast %99 : vector<512xf32> to vector<1x512xf32>
    %cst_36 = arith.constant 2.000000e+00 : f32
    %101 = vector.broadcast %cst_36 : f32 to vector<1x512xf32>
    %102 = arith.divf %100, %101 : vector<1x512xf32>
    %cst_37 = arith.constant 9.99999974E-6 : f32
    %103 = vector.broadcast %cst_37 : f32 to vector<1x512xf32>
    %104 = arith.addf %102, %103 : vector<1x512xf32>
    %105 = math.rsqrt %104 : vector<1x512xf32>
    %106 = vector.broadcast %105 : vector<1x512xf32> to vector<2x512xf32>
    %107 = arith.mulf %97, %106 : vector<2x512xf32>
    %108 = vector.broadcast %51 : vector<1x512xf32> to vector<2x512xf32>
    %109 = arith.mulf %107, %108 : vector<2x512xf32>
    %110 = vector.broadcast %52 : vector<1x512xf32> to vector<2x512xf32>
    %111 = arith.addf %109, %110 : vector<2x512xf32>
    %cst_38 = arith.constant 0.000000e+00 : f32
    %112 = vector.broadcast %cst_38 : f32 to vector<2x512xf32>
    %113 = arith.maximumf %111, %112 : vector<2x512xf32>
    %c0_39 = arith.constant 0 : index
    %c0_40 = arith.constant 0 : index
    %114 = vector.load %arg6[%c0_39, %c0_40] : memref<512x128xbf16, #tpu.memory_space<vmem>>, vector<512x128xbf16>
    %115 = arith.truncf %113 : vector<2x512xf32> to vector<2x512xbf16>
    %cst_41 = arith.constant dense<0.000000e+00> : vector<2x128xf32>
    %116 = tpu.matmul %115, %114, %cst_41 {dimension_numbers = #tpu.dot_dimension_numbers<[1], [0], [0], [1], [0, 0, 1, 1], [], []>} : vector<2x512xbf16>, vector<512x128xbf16>, vector<2x128xf32> -> vector<2x128xf32>
    %117 = vector.broadcast %53 : vector<1x128xf32> to vector<2x128xf32>
    %118 = arith.addf %116, %117 : vector<2x128xf32>
    %119 = arith.mulf %118, %118 : vector<2x128xf32>
    %cst_42 = arith.constant dense<0.000000e+00> : vector<2xf32>
    %120 = vector.multi_reduction <add>, %119, %cst_42 [1] : vector<2x128xf32> to vector<2xf32>
    %121 = vector.shape_cast %120 : vector<2xf32> to vector<2x1xf32>
    %cst_43 = arith.constant 1.000000e-24 : f32
    %122 = vector.broadcast %cst_43 : f32 to vector<2x1xf32>
    %123 = arith.maximumf %121, %122 : vector<2x1xf32>
    %124 = math.rsqrt %123 : vector<2x1xf32>
    %125 = vector.broadcast %124 : vector<2x1xf32> to vector<2x128xf32>
    %126 = arith.mulf %118, %125 : vector<2x128xf32>
    %c2 = arith.constant 2 : index
    %c0_44 = arith.constant 0 : index
    %127 = vector.load %arg9[%c2, %c0_44] : memref<4x128xf32, #tpu.memory_space<vmem>>, vector<2x128xf32>
    tpu.vector_store %arg9[%c2, %c0_44], %126 {strides = array<i32>} : memref<4x128xf32, #tpu.memory_space<vmem>>, vector<2x128xf32>,
    return
  }
}

</mosaic_0001>

<bundles_post_ra>
// kernel: _lambda_.1
= control target key start
LH: loop header
LB: loop body
LE: loop exit
PB: predicated region body
PF: predicated region fallthrough
CT: control target
= control target key end

     0   :  { %15 = vsyncpa [#allocation3], 0  ;;  %s4678_s30 = smov [#allocation2]   ;;  %s5426_s0 = inlined_call_operand.vmem [shape: bf16[72,216], index: 0, kind: input, shape index: {}]   ;;  %s5427_s1 = inlined_call_operand.hbm [shape: bf16[216,2048], index: 1, kind: input, shape index: {}]   ;;  %s5428_s2 = inlined_call_operand.vmem [shape: bf16[4,72], index: 2, kind: input, shape index: {}]   ;;  %s5429_s3 = inlined_call_operand.vmem [shape: bf16[128,512], index: 3, kind: input, shape index: {}]   ;;  %s5430_s4 = inlined_call_operand.vmem [shape: f32[1,512], index: 4, kind: input, shape index: {}]   ;;  %s5431_s5 = inlined_call_operand.vmem [shape: f32[1,512], index: 5, kind: input, shape index: {}]   ;;  %s5432_s6 = inlined_call_operand.vmem [shape: bf16[512,128], index: 6, kind: input, shape index: {}]   ;;  %s5433_s7 = inlined_call_operand.vmem [shape: f32[1,128], index: 7, kind: input, shape index: {}]   ;;  %s5434_s8 = inlined_call_operand.vmem [shape: f32[4,128], index: 8, kind: output, shape index: {0}]   ;;  %s5435_s9 = inlined_call_operand.vmem [shape: f32[4,128], index: 9, kind: output, shape index: {1}]  }
   0x1   :  { %s23_s10 = sshll.u32 %s4678_s30, 4  ;;  %s4654_s13 = scalar_lea.hbm %s5427_s1, 27648  ;;  %s24_s10 = int_to_ptr.vmem [resolvable:$true] %s23_s10 }
   0x2   :  { %p4655_p0 = scmp.ne.s32.totalorder %s5427_s1, %s4654_s13  ;;  %p4658_p1 = scmp.lt.u32.totalorder %s4654_s13, %s5427_s1 }
   0x4   :  { %p4660_p2 = pnand %p4658_p1, %p4655_p0 }
   0x6   :  { %4663 = shalt.err (!%p4660_p2)
}
   0x7   :  { %s4664_s18 = scalar_lea.vmem %s24_s10, 27648  ;;  %p4669_p4 = scmp.lt.s32.totalorder %s24_s10, %s24_s10 }
   0x8   :  { %p4665_p3 = scmp.ne.s32.totalorder %s24_s10, %s4664_s18  ;;  %p4670_p5 = scmp.lt.s32.totalorder %s4664_s18, %s4664_s18 }
   0xa   :  { %p4671_p6 = por %p4670_p5, %p4669_p4 }
   0xc   :  { %p4672_p7 = pnand %p4671_p6, %p4665_p3 }
   0xe   :  { %4675 = shalt.err (!%p4672_p7)
}
   0xf   :  { %s4679_s19 = smov 1024   ;;  %s4680_s20 = smov 64  }
  0x10   :  { %29 = dma.hbm_to_vmem [thread:$0]  %s5427_s1, 27648, %s24_s10, [#allocation3], %s4679_s19, %s4679_s19, %s4680_s20  }
  0x11   :  { %4676 = dma.done.wait [#allocation3], 27648  }
  0x12   :  { %4677 = vsyncadd [#allocation3], 4294939648  ;;  %v55_v0 = vld [vmem:[#allocation2] sm:$0xff]  ;;  %v56_v2 = vld [vmem:[#allocation2 + $0x8] sm:$0xff]  ;;  %vm1393_vm0 = vcmask 719872   ;;  %vm1409_vm1 = vcmask 1043456  }
  0x13   :  { %v63_v1 = vld [vmem:[#allocation2 + $0x40] sm:$0xff]  ;;  %v64_v4 = vld [vmem:[#allocation2 + $0x48] sm:$0xff]  ;;  %vm2331_vm2 = vcmask 588800   ;;  %vm3012_vm3 = vcmask 1041408  }
  0x14   :  { %v4006_v3 = vcombine.high %v55_v0, %v63_v1  ;;  %v4005_v5 = vcombine.low %v55_v0, %v63_v1  ;;  %v71_v6 = vld [vmem:[#allocation2 + $0x80] sm:$0xff]  ;;  %v4008_v8 = vcombine.high %v56_v2, %v64_v4  ;;  %v4007_v9 = vcombine.low %v56_v2, %v64_v4  ;;  %v72_v11 = vld [vmem:[#allocation2 + $0x88] sm:$0xff] }
  0x15   :  { %v79_v7 = vld [vmem:[#allocation2 + $0xc0] sm:$0xff]  ;;  %v80_v12 = vld [vmem:[#allocation2 + $0xc8] sm:$0xff] }
  0x16   :  { %v4022_v10 = vcombine.high %v71_v6, %v79_v7  ;;  %v87_v13 = vld [vmem:[#allocation2 + $0x100] sm:$0xff]  ;;  %1458 = vmatprep.subr.bf16.mxu0 %v4006_v3  ;;  %v4024_v14 = vcombine.high %v72_v11, %v80_v12  ;;  %v88_v16 = vld [vmem:[#allocation2 + $0x108] sm:$0xff]  ;;  %1539 = vmatprep.subr.bf16.mxu1 %v4008_v8  ;;  %v4021_v18 = vcombine.low %v71_v6, %v79_v7 }
  0x17   :  { %v95_v15 = vld [vmem:[#allocation2 + $0x140] sm:$0xff]  ;;  %v96_v17 = vld [vmem:[#allocation2 + $0x148] sm:$0xff]  ;;  %1459 = vmatpush1.bf16.msra.mxu0 %v4005_v5  ;;  %1540 = vmatpush1.bf16.msra.mxu1 %v4007_v9  ;;  %v4023_v19 = vcombine.low %v72_v11, %v80_v12 }
  0x18   :  { %1460 = vmatprep.subr.bf16.mxu0 %v4022_v10  ;;  %v4038_v20 = vcombine.high %v87_v13, %v95_v15  ;;  %1541 = vmatprep.subr.bf16.mxu1 %v4024_v14  ;;  %v4040_v21 = vcombine.high %v88_v16, %v96_v17  ;;  %v103_v22 = vld [vmem:[#allocation2 + $0x180] sm:$0xff]  ;;  %v104_v24 = vld [vmem:[#allocation2 + $0x188] sm:$0xff]  ;;  %v4037_v26 = vcombine.low %v87_v13, %v95_v15 }
  0x19   :  { %v111_v23 = vld [vmem:[#allocation2 + $0x1c0] sm:$0xff]  ;;  %v112_v25 = vld [vmem:[#allocation2 + $0x1c8] sm:$0xff]  ;;  %v4039_v27 = vcombine.low %v88_v16, %v96_v17 }
  0x1a   :  { %v4054_v28 = vcombine.high %v103_v22, %v111_v23  ;;  %v4056_v29 = vcombine.high %v104_v24, %v112_v25  ;;  %v119_v30 = vld [vmem:[#allocation2 + $0x200] sm:$0xff]  ;;  %v120_v32 = vld [vmem:[#allocation2 + $0x208] sm:$0xff]  ;;  %v4053_v34 = vcombine.low %v103_v22, %v111_v23  ;;  %v4055_v35 = vcombine.low %v104_v24, %v112_v25 }
  0x1b   :  { %1461 = vmatpush1.bf16.msra.mxu0 %v4021_v18  ;;  %1542 = vmatpush1.bf16.msra.mxu1 %v4023_v19  ;;  %v127_v31 = vld [vmem:[#allocation2 + $0x240] sm:$0xff]  ;;  %v128_v33 = vld [vmem:[#allocation2 + $0x248] sm:$0xff] }
  0x1c   :  { %1462 = vmatprep.subr.bf16.mxu0 %v4038_v20  ;;  %1543 = vmatprep.subr.bf16.mxu1 %v4040_v21  ;;  %v4070_v36 = vcombine.high %v119_v30, %v127_v31  ;;  %v4072_v37 = vcombine.high %v120_v32, %v128_v33  ;;  %v135_v38 = vld [vmem:[#allocation2 + $0x280] sm:$0xff]  ;;  %v136_v40 = vld [vmem:[#allocation2 + $0x288] sm:$0xff]  ;;  %v4069_v42 = vcombine.low %v119_v30, %v127_v31 }
  0x1d   :  { %v143_v39 = vld [vmem:[#allocation2 + $0x2c0] sm:$0xff]  ;;  %v144_v41 = vld [vmem:[#allocation2 + $0x2c8] sm:$0xff]  ;;  %v4071_v43 = vcombine.low %v120_v32, %v128_v33 }
  0x1e   :  { %v4086_v44 = vcombine.high %v135_v38, %v143_v39  ;;  %v151_v45 = vld [vmem:[#allocation2 + $0x300] sm:$0xff]  ;;  %v4088_v47 = vcombine.high %v136_v40, %v144_v41  ;;  %v152_v49 = vld [vmem:[#allocation2 + $0x308] sm:$0xff]  ;;  %v4085_v51 = vcombine.low %v135_v38, %v143_v39  ;;  %v4087_v52 = vcombine.low %v136_v40, %v144_v41 }
  0x1f   :  { %1463 = vmatpush1.bf16.msra.mxu0 %v4037_v26  ;;  %1544 = vmatpush1.bf16.msra.mxu1 %v4039_v27  ;;  %v159_v46 = vld [vmem:[#allocation2 + $0x340] sm:$0xff]  ;;  %v160_v50 = vld [vmem:[#allocation2 + $0x348] sm:$0xff] }
  0x20   :  { %1464 = vmatprep.subr.bf16.mxu0 %v4054_v28  ;;  %1545 = vmatprep.subr.bf16.mxu1 %v4056_v29  ;;  %v4747_v48 = vld [vmem:[%s5426_s0 + $0x4] ss:$8 sps:$4 sm:$0xff]   ;;  %v4102_v53 = vcombine.high %v151_v45, %v159_v46  ;;  %v4104_v54 = vcombine.high %v152_v49, %v160_v50  ;;  %v4101_v59 = vcombine.low %v151_v45, %v159_v46 }
  0x21   :  { %4230 = vmatprep.mubr.msk.bf16.mxu0 %vm1393_vm0, %v4747_v48  ;;  %v167_v55 = vld [vmem:[#allocation2 + $0x380] sm:$0xff]  ;;  %4236 = vmatprep.mubr.msk.bf16.mxu1 %vm1393_vm0, %v4747_v48  ;;  %v168_v57 = vld [vmem:[#allocation2 + $0x388] sm:$0xff]  ;;  %v4103_v60 = vcombine.low %v152_v49, %v160_v50  ;;  %v65_v49 = vld [vmem:[#allocation2 + $0x50] sm:$0xff] }
  0x22   :  { %v175_v56 = vld [vmem:[#allocation2 + $0x3c0] sm:$0xff]  ;;  %v176_v58 = vld [vmem:[#allocation2 + $0x3c8] sm:$0xff]  ;;  %v58_v50 = vld [vmem:[#allocation2 + $0x18] sm:$0xff] }
  0x23   :  { %1465 = vmatpush1.bf16.msra.mxu0 %v4053_v34  ;;  %1546 = vmatpush1.bf16.msra.mxu1 %v4055_v35  ;;  %v4118_v61 = vcombine.high %v167_v55, %v175_v56  ;;  %v183_v62 = vld [vmem:[#allocation2 + $0x400] sm:$0xff]  ;;  %v4120_v63 = vcombine.high %v168_v57, %v176_v58  ;;  %v184_v1 = vld [vmem:[#allocation2 + $0x408] sm:$0xff]  ;;  %v4117_v3 = vcombine.low %v167_v55, %v175_v56  ;;  %v73_v56 = vld [vmem:[#allocation2 + $0x90] sm:$0xff] }
  0x24   :  { %1466 = vmatprep.subr.bf16.mxu0 %v4070_v36  ;;  %1547 = vmatprep.subr.bf16.mxu1 %v4072_v37  ;;  %v191_v0 = vld [vmem:[#allocation2 + $0x440] sm:$0xff]  ;;  %v192_v2 = vld [vmem:[#allocation2 + $0x448] sm:$0xff]  ;;  %v4119_v4 = vcombine.low %v168_v57, %v176_v58  ;;  %v81_v57 = vld [vmem:[#allocation2 + $0xd0] sm:$0xff] }
  0x25   :  { %v4134_v5 = vcombine.high %v183_v62, %v191_v0  ;;  %v199_v6 = vld [vmem:[#allocation2 + $0x480] sm:$0xff]  ;;  %v4136_v7 = vcombine.high %v184_v1, %v192_v2  ;;  %v200_v9 = vld [vmem:[#allocation2 + $0x488] sm:$0xff]  ;;  %v4133_v11 = vcombine.low %v183_v62, %v191_v0  ;;  %v4135_v12 = vcombine.low %v184_v1, %v192_v2  ;;  %v89_v1 = vld [vmem:[#allocation2 + $0x110] sm:$0xff] }
  0x26   :  { %v207_v8 = vld [vmem:[#allocation2 + $0x4c0] sm:$0xff]  ;;  %v208_v10 = vld [vmem:[#allocation2 + $0x4c8] sm:$0xff]  ;;  %v97_v2 = vld [vmem:[#allocation2 + $0x150] sm:$0xff] }
  0x27   :  { %1467 = vmatpush1.bf16.msra.mxu0 %v4069_v42  ;;  %1548 = vmatpush1.bf16.msra.mxu1 %v4071_v43  ;;  %v4150_v13 = vcombine.high %v199_v6, %v207_v8  ;;  %v215_v14 = vld [vmem:[#allocation2 + $0x500] sm:$0xff]  ;;  %v4152_v15 = vcombine.high %v200_v9, %v208_v10  ;;  %v216_v17 = vld [vmem:[#allocation2 + $0x508] sm:$0xff]  ;;  %v4149_v19 = vcombine.low %v199_v6, %v207_v8 }
  0x28   :  { %1468 = vmatprep.subr.bf16.mxu0 %v4086_v44  ;;  %1549 = vmatprep.subr.bf16.mxu1 %v4088_v47  ;;  %v223_v16 = vld [vmem:[#allocation2 + $0x540] sm:$0xff]  ;;  %v224_v18 = vld [vmem:[#allocation2 + $0x548] sm:$0xff]  ;;  %v4151_v20 = vcombine.low %v200_v9, %v208_v10  ;;  %v57_v47 = vld [vmem:[#allocation2 + $0x10] sm:$0xff]  ;;  %v4025_v6 = vcombine.low %v73_v56, %v81_v57  ;;  %v4042_v8 = vcombine.high %v89_v1, %v97_v2 }
  0x29   :  { %v4166_v21 = vcombine.high %v215_v14, %v223_v16  ;;  %v4168_v22 = vcombine.high %v216_v17, %v224_v18  ;;  %v231_v23 = vld [vmem:[#allocation2 + $0x580] sm:$0xff]  ;;  %v232_v25 = vld [vmem:[#allocation2 + $0x588] sm:$0xff]  ;;  %v4165_v27 = vcombine.low %v215_v14, %v223_v16  ;;  %v4167_v28 = vcombine.low %v216_v17, %v224_v18  ;;  %v105_v10 = vld [vmem:[#allocation2 + $0x190] sm:$0xff] }
  0x2a   :  { %v239_v24 = vld [vmem:[#allocation2 + $0x5c0] sm:$0xff]  ;;  %v240_v26 = vld [vmem:[#allocation2 + $0x5c8] sm:$0xff]  ;;  %v4774_v14 = vld [vmem:[%s5426_s0 + $0x10] ss:$8 sps:$4 sm:$0xff]  }
  0x2b   :  { %1469 = vmatpush1.bf16.msra.mxu0 %v4085_v51  ;;  %1550 = vmatpush1.bf16.msra.mxu1 %v4087_v52  ;;  %v4182_v29 = vcombine.high %v231_v23, %v239_v24  ;;  %v4184_v30 = vcombine.high %v232_v25, %v240_v26  ;;  %v247_v31 = vld [vmem:[#allocation2 + $0x600] sm:$0xff]  ;;  %v248_v33 = vld [vmem:[#allocation2 + $0x608] sm:$0xff]  ;;  %v4181_v35 = vcombine.low %v231_v23, %v239_v24  ;;  %v66_v51 = vld [vmem:[#allocation2 + $0x58] sm:$0xff] }
  0x2c   :  { %1470 = vmatprep.subr.bf16.mxu0 %v4102_v53  ;;  %1551 = vmatprep.subr.bf16.mxu1 %v4104_v54  ;;  %v255_v32 = vld [vmem:[#allocation2 + $0x640] sm:$0xff]  ;;  %v256_v34 = vld [vmem:[#allocation2 + $0x648] sm:$0xff]  ;;  %v4183_v36 = vcombine.low %v232_v25, %v240_v26  ;;  %v4010_v53 = vcombine.high %v57_v47, %v65_v49  ;;  %v4012_v55 = vcombine.high %v58_v50, %v66_v51  ;;  %v130_v23 = vld [vmem:[#allocation2 + $0x258] sm:$0xff] }
  0x2d   :  { %v4198_v37 = vcombine.high %v247_v31, %v255_v32  ;;  %v4200_v38 = vcombine.high %v248_v33, %v256_v34  ;;  %v263_v39 = vld [vmem:[#allocation2 + $0x680] sm:$0xff]  ;;  %v264_v40 = vld [vmem:[#allocation2 + $0x688] sm:$0xff]  ;;  %v4197_v41 = vcombine.low %v247_v31, %v255_v32  ;;  %v4199_v42 = vcombine.low %v248_v33, %v256_v34  ;;  %v137_v25 = vld [vmem:[#allocation2 + $0x290] sm:$0xff] }
  0x2e   :  { %v4214_v43 = vcombine.high %v263_v39, %v263_v39  ;;  %v4213_v44 = vcombine.low %v263_v39, %v263_v39  ;;  %v4216_v45 = vcombine.high %v264_v40, %v264_v40  ;;  %v4215_v46 = vcombine.low %v264_v40, %v264_v40  ;;  %v4760_v58 = vld [vmem:[%s5426_s0] ss:$8 sps:$4 sm:$0xff]   ;;  %v153_v34 = vld [vmem:[#allocation2 + $0x310] sm:$0xff]  ;;  %v162_v39 = vld [vmem:[#allocation2 + $0x358] sm:$0xff] }
  0x2f   :  { %1471 = vmatpush1.bf16.msra.mxu0 %v4101_v59  ;;  %1552 = vmatpush1.bf16.msra.mxu1 %v4103_v60  ;;  %v74_v59 = vld [vmem:[#allocation2 + $0x98] sm:$0xff]  ;;  %v4011_v62 = vcombine.low %v58_v50, %v66_v51  ;;  %v4790_v32 = vld [vmem:[%s5426_s0 + $0x20] ss:$8 sps:$4 sm:$0xff]  }
  0x30   :  { %1472 = vmatprep.subr.bf16.mxu0 %v4118_v61  ;;  %1553 = vmatprep.subr.bf16.mxu1 %v4120_v63  ;;  %v1411_v52 = vsel %vm1409_vm1, %v4213_v44, 0  ;;  %v1417_v54 = vsel %vm1409_vm1, %v4215_v46, 0  ;;  %v82_v60 = vld [vmem:[#allocation2 + $0xd8] sm:$0xff]  ;;  %v4009_v61 = vcombine.low %v57_v47, %v65_v49  ;;  %v4026_v63 = vcombine.high %v73_v56, %v81_v57  ;;  %v177_v44 = vld [vmem:[#allocation2 + $0x3d0] sm:$0xff] }
  0x31   :  { %v4028_v0 = vcombine.high %v74_v59, %v82_v60  ;;  %v170_v47 = vld [vmem:[#allocation2 + $0x398] sm:$0xff]  ;;  %v185_v56 = vld [vmem:[#allocation2 + $0x410] sm:$0xff] }
  0x32   :  { %v178_v49 = vld [vmem:[#allocation2 + $0x3d8] sm:$0xff]  ;;  %v193_v57 = vld [vmem:[#allocation2 + $0x450] sm:$0xff] }
  0x33   :  { %1473 = vmatpush1.bf16.msra.mxu0 %v4117_v3  ;;  %1554 = vmatpush1.bf16.msra.mxu1 %v4119_v4  ;;  %v4765_v3 = vld [vmem:[%s5426_s0 + $0x14] ss:$8 sps:$4 sm:$0xff]   ;;  %v4804_v50 = vld [vmem:[%s5426_s0 + $0x30] ss:$8 sps:$4 sm:$0xff]  }
  0x34   :  { %1474 = vmatprep.subr.bf16.mxu0 %v4134_v5  ;;  %1555 = vmatprep.subr.bf16.mxu1 %v4136_v7  ;;  %v90_v4 = vld [vmem:[#allocation2 + $0x118] sm:$0xff]  ;;  %v4027_v7 = vcombine.low %v74_v59, %v82_v60  ;;  %v4124_v60 = vcombine.high %v170_v47, %v178_v49 }
  0x35   :  { %v98_v5 = vld [vmem:[#allocation2 + $0x158] sm:$0xff] }
  0x36   :  { %v4044_v9 = vcombine.high %v90_v4, %v98_v5  ;;  %v4043_v16 = vcombine.low %v90_v4, %v98_v5  ;;  %v186_v59 = vld [vmem:[#allocation2 + $0x418] sm:$0xff]  ;;  %v209_v4 = vld [vmem:[#allocation2 + $0x4d0] sm:$0xff] }
  0x37   :  { %1475 = vmatpush1.bf16.msra.mxu0 %v4133_v11  ;;  %1556 = vmatpush1.bf16.msra.mxu1 %v4135_v12  ;;  %v113_v11 = vld [vmem:[#allocation2 + $0x1d0] sm:$0xff]  ;;  %v106_v12 = vld [vmem:[#allocation2 + $0x198] sm:$0xff] }
  0x38   :  { %1476 = vmatprep.subr.bf16.mxu0 %v4150_v13  ;;  %1557 = vmatprep.subr.bf16.mxu1 %v4152_v15  ;;  %v114_v13 = vld [vmem:[#allocation2 + $0x1d8] sm:$0xff]  ;;  %v4041_v15 = vcombine.low %v89_v1, %v97_v2  ;;  %v4058_v17 = vcombine.high %v105_v10, %v113_v11  ;;  %v4057_v24 = vcombine.low %v105_v10, %v113_v11  ;;  %v201_v2 = vld [vmem:[#allocation2 + $0x490] sm:$0xff] }
  0x39   :  { %v4060_v18 = vcombine.high %v106_v12, %v114_v13  ;;  %v4059_v26 = vcombine.low %v106_v12, %v114_v13  ;;  %v4138_v1 = vcombine.high %v185_v56, %v193_v57  ;;  %v202_v5 = vld [vmem:[#allocation2 + $0x498] sm:$0xff]  ;;  %v217_v10 = vld [vmem:[#allocation2 + $0x510] sm:$0xff]  ;;  %v4154_v13 = vcombine.high %v201_v2, %v209_v4 }
  0x3a   :  { %v225_v11 = vld [vmem:[#allocation2 + $0x550] sm:$0xff] }
  0x3b   :  { %1477 = vmatpush1.bf16.msra.mxu0 %v4149_v19  ;;  %1558 = vmatpush1.bf16.msra.mxu1 %v4151_v20  ;;  %v121_v19 = vld [vmem:[#allocation2 + $0x210] sm:$0xff] }
  0x3c   :  { %1478 = vmatprep.subr.bf16.mxu0 %v4166_v21  ;;  %1559 = vmatprep.subr.bf16.mxu1 %v4168_v22  ;;  %v129_v20 = vld [vmem:[#allocation2 + $0x250] sm:$0xff]  ;;  %v4781_v21 = vld [vmem:[%s5426_s0 + $0x24] ss:$8 sps:$4 sm:$0xff]   ;;  %v122_v22 = vld [vmem:[#allocation2 + $0x218] sm:$0xff] }
  0x3d   :  { %v4076_v31 = vcombine.high %v122_v22, %v130_v23  ;;  %v4073_v33 = vcombine.low %v121_v19, %v129_v20 }
  0x3f   :  { %1479 = vmatpush1.bf16.msra.mxu0 %v4165_v27  ;;  %1560 = vmatpush1.bf16.msra.mxu1 %v4167_v28  ;;  %v4074_v27 = vcombine.high %v121_v19, %v129_v20  ;;  %v145_v28 = vld [vmem:[#allocation2 + $0x2d0] sm:$0xff]  ;;  %v266_v19 = vld [vmem:[#allocation2 + $0x698] sm:$0xff]  ;;  %v4153_v20 = vcombine.low %v201_v2, %v209_v4  ;;  %v99_v2 = vld [vmem:[#allocation2 + $0x160] sm:$0xff] }
  0x40   :  { %1480 = vmatprep.subr.bf16.mxu0 %v4182_v29  ;;  %1561 = vmatprep.subr.bf16.mxu1 %v4184_v30  ;;  %v138_v29 = vld [vmem:[#allocation2 + $0x298] sm:$0xff] }
  0x41   :  { %v146_v30 = vld [vmem:[#allocation2 + $0x2d8] sm:$0xff] }
  0x42   :  { %v4092_v40 = vcombine.high %v138_v29, %v146_v30 }
  0x43   :  { %1481 = vmatpush1.bf16.msra.mxu0 %v4181_v35  ;;  %1562 = vmatpush1.bf16.msra.mxu1 %v4183_v36  ;;  %v4075_v35 = vcombine.low %v122_v22, %v130_v23  ;;  %v4090_v36 = vcombine.high %v137_v25, %v145_v28  ;;  %v233_v23 = vld [vmem:[#allocation2 + $0x590] sm:$0xff] }
  0x44   :  { %1482 = vmatprep.subr.bf16.mxu0 %v4198_v37  ;;  %1563 = vmatprep.subr.bf16.mxu1 %v4200_v38  ;;  %v161_v37 = vld [vmem:[#allocation2 + $0x350] sm:$0xff]  ;;  %v154_v38 = vld [vmem:[#allocation2 + $0x318] sm:$0xff] }
  0x45   :  { %v4106_v46 = vcombine.high %v153_v34, %v161_v37  ;;  %v4108_v51 = vcombine.high %v154_v38, %v162_v39 }
  0x47   :  { %1483 = vmatpush1.bf16.msra.mxu0 %v4197_v41  ;;  %1564 = vmatpush1.bf16.msra.mxu1 %v4199_v42  ;;  %v4797_v41 = vld [vmem:[%s5426_s0 + $0x34] ss:$8 sps:$4 sm:$0xff]   ;;  %v4089_v42 = vcombine.low %v137_v25, %v145_v28  ;;  %v4170_v25 = vcombine.high %v217_v10, %v225_v11 }
  0x48   :  { %4229 = vmatprep.subr.msk.bf16.mxu0 %vm1409_vm1, %v4214_v43  ;;  %4235 = vmatprep.subr.msk.bf16.mxu1 %vm1409_vm1, %v4216_v45  ;;  %v169_v43 = vld [vmem:[#allocation2 + $0x390] sm:$0xff]  ;;  %v4091_v45 = vcombine.low %v138_v29, %v146_v30  ;;  %v4219_v29 = vcombine.low %v266_v19, %v266_v19 }
  0x4b   :  { %1485 = vmatpush1.bf16.msra.mxu0 %v1411_v52  ;;  %1566 = vmatpush1.bf16.msra.mxu1 %v1417_v54  ;;  %v54_v52 = vld [vmem:[%s5426_s0 + $0x40] sm:$0xff]  ;;  %v4107_v54 = vcombine.low %v154_v38, %v162_v39  ;;  %v258_v38 = vld [vmem:[#allocation2 + $0x658] sm:$0xff] }
  0x4c   :  { %1620 = vmatprep.subr.bf16.mxu0 %v4010_v53  ;;  %1701 = vmatprep.subr.bf16.mxu1 %v4012_v55  ;;  %v4105_v53 = vcombine.low %v153_v34, %v161_v37  ;;  %v4122_v55 = vcombine.high %v169_v43, %v177_v44  ;;  %v257_v34 = vld [vmem:[#allocation2 + $0x650] sm:$0xff]  ;;  %v250_v37 = vld [vmem:[#allocation2 + $0x618] sm:$0xff] }
  0x4e   :  { %1491 = vmatmul.mubr.bf16.vlgmr.msra.gmra.mrb[0].mxu0 %v4760_v58  ;;  %1572 = vmatmul.mubr.bf16.vlgmr.msra.gmra.mrb[0].mxu1 %v4760_v58 }
  0x4f   :  { %1621 = vmatpush1.bf16.msra.mxu0 %v4009_v61  ;;  %1702 = vmatpush1.bf16.msra.mxu1 %v4011_v62  ;;  %v194_v61 = vld [vmem:[#allocation2 + $0x458] sm:$0xff]  ;;  %v4813_v62 = vcombine.high %v54_v52, %v54_v52 }
  0x50   :  { %1622 = vmatprep.subr.bf16.mxu0 %v4026_v63  ;;  %1703 = vmatprep.subr.bf16.mxu1 %v4028_v0  ;;  %v4121_v63 = vcombine.low %v169_v43, %v177_v44  ;;  %v4123_v0 = vcombine.low %v170_v47, %v178_v49  ;;  %v4139_v12 = vcombine.low %v186_v59, %v194_v61  ;;  %v59_v47 = vld [vmem:[#allocation2 + $0x20] sm:$0xff] }
  0x51   :  { %4231 = vmatprep.mubr.msk.bf16.mxu0 %vm1393_vm0, %v4765_v3  ;;  %4237 = vmatprep.mubr.msk.bf16.mxu1 %vm1393_vm0, %v4765_v3  ;;  %v67_v49 = vld [vmem:[#allocation2 + $0x60] sm:$0xff] }
  0x53   :  { %1623 = vmatpush1.bf16.msra.mxu0 %v4025_v6  ;;  %1704 = vmatpush1.bf16.msra.mxu1 %v4027_v7  ;;  %v4140_v6 = vcombine.high %v186_v59, %v194_v61  ;;  %v210_v7 = vld [vmem:[#allocation2 + $0x4d8] sm:$0xff]  ;;  %v4014_v59 = vcombine.high %v59_v47, %v67_v49  ;;  %v84_v61 = vld [vmem:[#allocation2 + $0xe8] sm:$0xff] }
  0x54   :  { %1624 = vmatprep.subr.bf16.mxu0 %v4042_v8  ;;  %1705 = vmatprep.subr.bf16.mxu1 %v4044_v9  ;;  %v4819_v8 = vcombine.low %v54_v52, %v54_v52  ;;  %v4137_v9 = vcombine.low %v185_v56, %v193_v57  ;;  %v4155_v22 = vcombine.low %v202_v5, %v210_v7  ;;  %v75_v56 = vld [vmem:[#allocation2 + $0xa0] sm:$0xff] }
  0x55   :  { %v83_v57 = vld [vmem:[#allocation2 + $0xe0] sm:$0xff] }
  0x56   :  { %1501 = vmatmul.mubr.bf16.gmra.mrb[4].mxu0 %v4774_v14  ;;  %1582 = vmatmul.mubr.bf16.gmra.mrb[4].mxu1 %v4774_v14 }
  0x57   :  { %1625 = vmatpush1.bf16.msra.mxu0 %v4041_v15  ;;  %1706 = vmatpush1.bf16.msra.mxu1 %v4043_v16  ;;  %v218_v15 = vld [vmem:[#allocation2 + $0x518] sm:$0xff] }
  0x58   :  { %1626 = vmatprep.subr.bf16.mxu0 %v4058_v17  ;;  %1707 = vmatprep.subr.bf16.mxu1 %v4060_v18  ;;  %v226_v16 = vld [vmem:[#allocation2 + $0x558] sm:$0xff]  ;;  %v265_v17 = vld [vmem:[#allocation2 + $0x690] sm:$0xff]  ;;  %v4156_v18 = vcombine.high %v202_v5, %v210_v7  ;;  %v4030_v5 = vcombine.high %v75_v56, %v83_v57  ;;  %v100_v7 = vld [vmem:[#allocation2 + $0x168] sm:$0xff] }
  0x59   :  { %4232 = vmatprep.mubr.msk.bf16.mxu0 %vm1393_vm0, %v4781_v21  ;;  %4238 = vmatprep.mubr.msk.bf16.mxu1 %vm1393_vm0, %v4781_v21  ;;  %v4217_v28 = vcombine.low %v265_v17, %v265_v17  ;;  %v4172_v30 = vcombine.high %v218_v15, %v226_v16  ;;  %v4218_v52 = vcombine.high %v265_v17, %v265_v17  ;;  %v116_v17 = vld [vmem:[#allocation2 + $0x1e8] sm:$0xff] }
  0x5b   :  { %1627 = vmatpush1.bf16.msra.mxu0 %v4057_v24  ;;  %1708 = vmatpush1.bf16.msra.mxu1 %v4059_v26  ;;  %v241_v24 = vld [vmem:[#allocation2 + $0x5d0] sm:$0xff]  ;;  %v234_v26 = vld [vmem:[#allocation2 + $0x598] sm:$0xff]  ;;  %v1423_v39 = vsel %vm1409_vm1, %v4217_v28, 0  ;;  %v139_v28 = vld [vmem:[#allocation2 + $0x2a0] sm:$0xff] }
  0x5c   :  { %1628 = vmatprep.subr.bf16.mxu0 %v4074_v27  ;;  %1709 = vmatprep.subr.bf16.mxu1 %v4076_v31  ;;  %v242_v27 = vld [vmem:[#allocation2 + $0x5d8] sm:$0xff]  ;;  %v4169_v31 = vcombine.low %v217_v10, %v225_v11  ;;  %v4185_v43 = vcombine.low %v233_v23, %v241_v24  ;;  %v4029_v10 = vcombine.low %v75_v56, %v83_v57  ;;  %v107_v11 = vld [vmem:[#allocation2 + $0x1a0] sm:$0xff]  ;;  %v188_v56 = vld [vmem:[#allocation2 + $0x428] sm:$0xff] }
  0x5d   :  { %v196_v57 = vld [vmem:[#allocation2 + $0x468] sm:$0xff] }
  0x5e   :  { %1511 = vmatmul.mubr.bf16.gmra.mrb[8].mxu0 %v4790_v32  ;;  %1592 = vmatmul.mubr.bf16.gmra.mrb[8].mxu1 %v4790_v32 }
  0x5f   :  { %1629 = vmatpush1.bf16.msra.mxu0 %v4073_v33  ;;  %1710 = vmatpush1.bf16.msra.mxu1 %v4075_v35  ;;  %v249_v33 = vld [vmem:[#allocation2 + $0x610] sm:$0xff]  ;;  %v4171_v35 = vcombine.low %v218_v15, %v226_v16  ;;  %v108_v16 = vld [vmem:[#allocation2 + $0x1a8] sm:$0xff] }
  0x60   :  { %1630 = vmatprep.subr.bf16.mxu0 %v4090_v36  ;;  %1711 = vmatprep.subr.bf16.mxu1 %v4092_v40  ;;  %v4186_v36 = vcombine.high %v233_v23, %v241_v24  ;;  %v1429_v40 = vsel %vm1409_vm1, %v4219_v29, 0  ;;  %v4202_v44 = vcombine.high %v249_v33, %v257_v34  ;;  %v124_v24 = vld [vmem:[#allocation2 + $0x228] sm:$0xff]  ;;  %v147_v29 = vld [vmem:[#allocation2 + $0x2e0] sm:$0xff] }
  0x61   :  { %4233 = vmatprep.mubr.msk.bf16.mxu0 %vm1393_vm0, %v4797_v41  ;;  %4239 = vmatprep.mubr.msk.bf16.mxu1 %vm1393_vm0, %v4797_v41 }
  0x63   :  { %1631 = vmatpush1.bf16.msra.mxu0 %v4089_v42  ;;  %1712 = vmatpush1.bf16.msra.mxu1 %v4091_v45  ;;  %v4188_v42 = vcombine.high %v234_v26, %v242_v27  ;;  %v4204_v45 = vcombine.high %v250_v37, %v258_v38 }
  0x64   :  { %1632 = vmatprep.subr.bf16.mxu0 %v4106_v46  ;;  %1713 = vmatprep.subr.bf16.mxu1 %v4108_v51  ;;  %v4201_v46 = vcombine.low %v249_v33, %v257_v34  ;;  %v4203_v51 = vcombine.low %v250_v37, %v258_v38  ;;  %v148_v33 = vld [vmem:[#allocation2 + $0x2e8] sm:$0xff]  ;;  %v163_v37 = vld [vmem:[#allocation2 + $0x360] sm:$0xff]  ;;  %v4094_v38 = vcombine.high %v139_v28, %v147_v29 }
  0x66   :  { %1521 = vmatmul.mubr.bf16.gmra.mrb[12].mxu0 %v4804_v50  ;;  %1602 = vmatmul.mubr.bf16.gmra.mrb[12].mxu1 %v4804_v50 }
  0x67   :  { %1633 = vmatpush1.bf16.msra.mxu0 %v4105_v53  ;;  %1714 = vmatpush1.bf16.msra.mxu1 %v4107_v54  ;;  %v60_v53 = vld [vmem:[#allocation2 + $0x28] sm:$0xff] }
  0x68   :  { %1634 = vmatprep.subr.bf16.mxu0 %v4122_v55  ;;  %1715 = vmatprep.subr.bf16.mxu1 %v4124_v60  ;;  %v68_v54 = vld [vmem:[#allocation2 + $0x68] sm:$0xff]  ;;  %v4220_v55 = vcombine.high %v266_v19, %v266_v19  ;;  %v123_v19 = vld [vmem:[#allocation2 + $0x220] sm:$0xff] }
  0x69   :  { %4234 = vmatprep.mubr.msk.bf16.mxu0 %vm1393_vm0, %v4813_v62  ;;  %4240 = vmatprep.mubr.msk.bf16.mxu1 %vm1393_vm0, %v4813_v62  ;;  %v76_v60 = vld [vmem:[#allocation2 + $0xa8] sm:$0xff]  ;;  %v4015_v4 = vcombine.low %v60_v53, %v68_v54 }
  0x6b   :  { %1635 = vmatpush1.bf16.msra.mxu0 %v4121_v63  ;;  %1716 = vmatpush1.bf16.msra.mxu1 %v4123_v0  ;;  %v4016_v63 = vcombine.high %v60_v53, %v68_v54  ;;  %v4013_v0 = vcombine.low %v59_v47, %v67_v49  ;;  %v172_v47 = vld [vmem:[#allocation2 + $0x3a8] sm:$0xff]  ;;  %v187_v54 = vld [vmem:[#allocation2 + $0x420] sm:$0xff] }
  0x6c   :  { %1636 = vmatprep.subr.bf16.mxu0 %v4138_v1  ;;  %1717 = vmatprep.subr.bf16.mxu1 %v4140_v6  ;;  %v91_v1 = vld [vmem:[#allocation2 + $0x120] sm:$0xff]  ;;  %v92_v6 = vld [vmem:[#allocation2 + $0x128] sm:$0xff] }
  0x6d   :  { %v4046_v15 = vcombine.high %v91_v1, %v99_v2  ;;  %v180_v49 = vld [vmem:[#allocation2 + $0x3e8] sm:$0xff] }
  0x6e   :  { %1531 = vmatmul.mubr.bf16.gmra.mrb[16].mxu0 %v4819_v8  ;;  %1612 = vmatmul.mubr.bf16.gmra.mrb[16].mxu1 %v4819_v8  ;;  %v4128_v53 = vcombine.high %v172_v47, %v180_v49 }
  0x6f   :  { %1637 = vmatpush1.bf16.msra.mxu0 %v4137_v9  ;;  %1718 = vmatpush1.bf16.msra.mxu1 %v4139_v12  ;;  %v4032_v9 = vcombine.high %v76_v60, %v84_v61  ;;  %v115_v12 = vld [vmem:[#allocation2 + $0x1e0] sm:$0xff] }
  0x70   :  { %1638 = vmatprep.subr.bf16.mxu0 %v4154_v13  ;;  %1719 = vmatprep.subr.bf16.mxu1 %v4156_v18  ;;  %v4031_v13 = vcombine.low %v76_v60, %v84_v61  ;;  %v4048_v18 = vcombine.high %v92_v6, %v100_v7  ;;  %v4062_v23 = vcombine.high %v107_v11, %v115_v12 }
  0x71   :  { %4242 = vmatprep.mubr.msk.bf16.mxu0 %vm1393_vm0, %v4747_v48  ;;  %4248 = vmatprep.mubr.msk.bf16.mxu1 %vm1393_vm0, %v4747_v48  ;;  %v4187_v48 = vcombine.low %v234_v26, %v242_v27  ;;  %v4064_v26 = vcombine.high %v108_v16, %v116_v17  ;;  %v4061_v27 = vcombine.low %v107_v11, %v115_v12  ;;  %v228_v11 = vld [vmem:[#allocation2 + $0x568] sm:$0xff] }
  0x72   :  { %v4144_v61 = vcombine.high %v188_v56, %v196_v57 }
  0x73   :  { %1639 = vmatpush1.bf16.msra.mxu0 %v4153_v20  ;;  %1720 = vmatpush1.bf16.msra.mxu1 %v4155_v22  ;;  %v131_v20 = vld [vmem:[#allocation2 + $0x260] sm:$0xff]  ;;  %v4047_v22 = vcombine.low %v92_v6, %v100_v7 }
  0x74   :  { %1640 = vmatprep.subr.bf16.mxu0 %v4170_v25  ;;  %1721 = vmatprep.subr.bf16.mxu1 %v4172_v30  ;;  %v132_v25 = vld [vmem:[#allocation2 + $0x268] sm:$0xff]  ;;  %v4078_v30 = vcombine.high %v123_v19, %v131_v20  ;;  %v219_v7 = vld [vmem:[#allocation2 + $0x520] sm:$0xff] }
  0x75   :  { %v4080_v34 = vcombine.high %v124_v24, %v132_v25 }
  0x77   :  { %1641 = vmatpush1.bf16.msra.mxu0 %v4169_v31  ;;  %1722 = vmatpush1.bf16.msra.mxu1 %v4171_v35  ;;  %v140_v31 = vld [vmem:[#allocation2 + $0x2a8] sm:$0xff]  ;;  %v4077_v35 = vcombine.low %v123_v19, %v131_v20 }
  0x78   :  { %1642 = vmatprep.subr.bf16.mxu0 %v4186_v36  ;;  %1723 = vmatprep.subr.bf16.mxu1 %v4188_v42  ;;  %v155_v36 = vld [vmem:[#allocation2 + $0x320] sm:$0xff]  ;;  %v164_v42 = vld [vmem:[#allocation2 + $0x368] sm:$0xff] }
  0x79   :  { %v236_v19 = vld [vmem:[#allocation2 + $0x5a8] sm:$0xff] }
  0x7a   :  { %v244_v20 = vld [vmem:[#allocation2 + $0x5e8] sm:$0xff] }
  0x7b   :  { %1643 = vmatpush1.bf16.msra.mxu0 %v4185_v43  ;;  %1724 = vmatpush1.bf16.msra.mxu1 %v4187_v48  ;;  %v4093_v43 = vcombine.low %v139_v28, %v147_v29  ;;  %v4110_v48 = vcombine.high %v155_v36, %v163_v37  ;;  %v252_v28 = vld [vmem:[#allocation2 + $0x628] sm:$0xff] }
  0x7c   :  { %1644 = vmatprep.subr.bf16.mxu0 %v4202_v44  ;;  %1725 = vmatprep.subr.bf16.mxu1 %v4204_v45  ;;  %v171_v45 = vld [vmem:[#allocation2 + $0x3a0] sm:$0xff]  ;;  %v260_v29 = vld [vmem:[#allocation2 + $0x668] sm:$0xff] }
  0x7f   :  { %1645 = vmatpush1.bf16.msra.mxu0 %v4201_v46  ;;  %1726 = vmatpush1.bf16.msra.mxu1 %v4203_v51  ;;  %v179_v46 = vld [vmem:[#allocation2 + $0x3e0] sm:$0xff]  ;;  %v4109_v51 = vcombine.low %v155_v36, %v163_v37  ;;  %v4207_v37 = vcombine.low %v252_v28, %v260_v29 }
  0x80   :  { %4241 = vmatprep.subr.msk.bf16.mxu0 %vm1409_vm1, %v4218_v52  ;;  %4247 = vmatprep.subr.msk.bf16.mxu1 %vm1409_vm1, %v4220_v55  ;;  %v4126_v52 = vcombine.high %v171_v45, %v179_v46  ;;  %v195_v55 = vld [vmem:[#allocation2 + $0x460] sm:$0xff] }
  0x81   :  { %v4142_v60 = vcombine.high %v187_v54, %v195_v55 }
  0x83   :  { %1647 = vmatpush1.bf16.msra.mxu0 %v1423_v39  ;;  %1728 = vmatpush1.bf16.msra.mxu1 %v1429_v40  ;;  %v156_v39 = vld [vmem:[#allocation2 + $0x328] sm:$0xff]  ;;  %v4096_v40 = vcombine.high %v140_v31, %v148_v33 }
  0x84   :  { %1782 = vmatprep.subr.bf16.mxu0 %v4014_v59  ;;  %1863 = vmatprep.subr.bf16.mxu1 %v4016_v63  ;;  %v4112_v44 = vcombine.high %v156_v39, %v164_v42  ;;  %v4125_v59 = vcombine.low %v171_v45, %v179_v46  ;;  %v203_v63 = vld [vmem:[#allocation2 + $0x4a0] sm:$0xff] }
  0x86   :  { %1653 = vmatmul.mubr.bf16.vlgmr.msra.gmra.mrb[20].mxu0 %v4760_v58  ;;  %1734 = vmatmul.mubr.bf16.vlgmr.msra.gmra.mrb[20].mxu1 %v4760_v58  ;;  %v4045_v58 = vcombine.low %v91_v1, %v99_v2  ;;  %v204_v1 = vld [vmem:[#allocation2 + $0x4a8] sm:$0xff] }
  0x87   :  { %1783 = vmatpush1.bf16.msra.mxu0 %v4013_v0  ;;  %1864 = vmatpush1.bf16.msra.mxu1 %v4015_v4  ;;  %v211_v0 = vld [vmem:[#allocation2 + $0x4e0] sm:$0xff]  ;;  %v212_v2 = vld [vmem:[#allocation2 + $0x4e8] sm:$0xff]  ;;  %v4141_v4 = vcombine.low %v187_v54, %v195_v55 }
  0x88   :  { %1784 = vmatprep.subr.bf16.mxu0 %v4030_v5  ;;  %1865 = vmatprep.subr.bf16.mxu1 %v4032_v9  ;;  %v4158_v5 = vcombine.high %v203_v63, %v211_v0  ;;  %v4160_v6 = vcombine.high %v204_v1, %v212_v2  ;;  %v227_v9 = vld [vmem:[#allocation2 + $0x560] sm:$0xff]  ;;  %v4157_v12 = vcombine.low %v203_v63, %v211_v0 }
  0x89   :  { %4243 = vmatprep.mubr.msk.bf16.mxu0 %vm1393_vm0, %v4765_v3  ;;  %4249 = vmatprep.mubr.msk.bf16.mxu1 %vm1393_vm0, %v4765_v3  ;;  %v4063_v3 = vcombine.low %v108_v16, %v116_v17  ;;  %v235_v17 = vld [vmem:[#allocation2 + $0x5a0] sm:$0xff] }
  0x8b   :  { %1785 = vmatpush1.bf16.msra.mxu0 %v4029_v10  ;;  %1866 = vmatpush1.bf16.msra.mxu1 %v4031_v13  ;;  %v220_v10 = vld [vmem:[#allocation2 + $0x528] sm:$0xff]  ;;  %v4159_v13 = vcombine.low %v204_v1, %v212_v2 }
  0x8c   :  { %1786 = vmatprep.subr.bf16.mxu0 %v4046_v15  ;;  %1867 = vmatprep.subr.bf16.mxu1 %v4048_v18  ;;  %v4174_v15 = vcombine.high %v219_v7, %v227_v9  ;;  %v4176_v16 = vcombine.high %v220_v10, %v228_v11  ;;  %v243_v18 = vld [vmem:[#allocation2 + $0x5e0] sm:$0xff] }
  0x8e   :  { %1663 = vmatmul.mubr.bf16.gmra.mrb[24].mxu0 %v4774_v14  ;;  %1744 = vmatmul.mubr.bf16.gmra.mrb[24].mxu1 %v4774_v14  ;;  %v4079_v14 = vcombine.low %v124_v24, %v132_v25  ;;  %v4190_v24 = vcombine.high %v235_v17, %v243_v18  ;;  %v4192_v25 = vcombine.high %v236_v19, %v244_v20 }
  0x8f   :  { %1787 = vmatpush1.bf16.msra.mxu0 %v4045_v58  ;;  %1868 = vmatpush1.bf16.msra.mxu1 %v4047_v22  ;;  %v4862_v58 = vld [vmem:[%s5426_s0 + $0x4] ss:$8 sps:$4 sm:$0xff]   ;;  %v4173_v22 = vcombine.low %v219_v7, %v227_v9  ;;  %v118_v7 = vld [vmem:[#allocation2 + $0x1f8] sm:$0xff] }
  0x90   :  { %1788 = vmatprep.subr.bf16.mxu0 %v4062_v23  ;;  %1869 = vmatprep.subr.bf16.mxu1 %v4064_v26  ;;  %v4175_v23 = vcombine.low %v220_v10, %v228_v11  ;;  %v251_v26 = vld [vmem:[#allocation2 + $0x620] sm:$0xff] }
  0x91   :  { %4244 = vmatprep.mubr.msk.bf16.mxu0 %vm1393_vm0, %v4781_v21  ;;  %4250 = vmatprep.mubr.msk.bf16.mxu1 %vm1393_vm0, %v4781_v21  ;;  %v4095_v21 = vcombine.low %v140_v31, %v148_v33  ;;  %v4208_v33 = vcombine.high %v252_v28, %v260_v29  ;;  %v150_v28 = vld [vmem:[#allocation2 + $0x2f8] sm:$0xff] }
  0x93   :  { %1789 = vmatpush1.bf16.msra.mxu0 %v4061_v27  ;;  %1870 = vmatpush1.bf16.msra.mxu1 %v4063_v3  ;;  %v259_v27 = vld [vmem:[#allocation2 + $0x660] sm:$0xff]  ;;  %v4189_v3 = vcombine.low %v235_v17, %v243_v18  ;;  %v134_v17 = vld [vmem:[#allocation2 + $0x278] sm:$0xff] }
  0x94   :  { %1790 = vmatprep.subr.bf16.mxu0 %v4078_v30  ;;  %1871 = vmatprep.subr.bf16.mxu1 %v4080_v34  ;;  %v4191_v30 = vcombine.low %v236_v19, %v244_v20  ;;  %v4206_v31 = vcombine.high %v251_v26, %v259_v27  ;;  %v267_v34 = vld [vmem:[#allocation2 + $0x6a0] sm:$0xff]  ;;  %v4205_v36 = vcombine.low %v251_v26, %v259_v27  ;;  %v4891_v18 = vld [vmem:[%s5426_s0 + $0x10] ss:$8 sps:$4 sm:$0xff]  }
  0x95   :  { %v4898_v26 = vld [vmem:[%s5426_s0 + $0x24] ss:$8 sps:$4 sm:$0xff]   ;;  %v142_v27 = vld [vmem:[#allocation2 + $0x2b8] sm:$0xff] }
  0x96   :  { %1673 = vmatmul.mubr.bf16.gmra.mrb[28].mxu0 %v4790_v32  ;;  %1754 = vmatmul.mubr.bf16.gmra.mrb[28].mxu1 %v4790_v32  ;;  %v4111_v32 = vcombine.low %v156_v39, %v164_v42  ;;  %v61_v42 = vld [vmem:[#allocation2 + $0x30] sm:$0xff] }
  0x97   :  { %1791 = vmatpush1.bf16.msra.mxu0 %v4077_v35  ;;  %1872 = vmatpush1.bf16.msra.mxu1 %v4079_v14  ;;  %v268_v35 = vld [vmem:[#allocation2 + $0x6a8] sm:$0xff]  ;;  %v4222_v14 = vcombine.high %v267_v34, %v267_v34 }
  0x98   :  { %1792 = vmatprep.subr.bf16.mxu0 %v4094_v38  ;;  %1873 = vmatprep.subr.bf16.mxu1 %v4096_v40  ;;  %v4221_v38 = vcombine.low %v267_v34, %v267_v34  ;;  %v4224_v39 = vcombine.high %v268_v35, %v268_v35  ;;  %v4223_v40 = vcombine.low %v268_v35, %v268_v35  ;;  %v165_v34 = vld [vmem:[#allocation2 + $0x370] sm:$0xff]  ;;  %v158_v35 = vld [vmem:[#allocation2 + $0x338] sm:$0xff] }
  0x99   :  { %4245 = vmatprep.mubr.msk.bf16.mxu0 %vm1393_vm0, %v4797_v41  ;;  %4251 = vmatprep.mubr.msk.bf16.mxu1 %vm1393_vm0, %v4797_v41  ;;  %v4127_v41 = vcombine.low %v172_v47, %v180_v49  ;;  %v77_v49 = vld [vmem:[#allocation2 + $0xb0] sm:$0xff] }
  0x9a   :  { %v1441_v46 = vsel %vm1409_vm1, %v4223_v40, 0 }
  0x9b   :  { %1793 = vmatpush1.bf16.msra.mxu0 %v4093_v43  ;;  %1874 = vmatpush1.bf16.msra.mxu1 %v4095_v21  ;;  %v69_v43 = vld [vmem:[#allocation2 + $0x70] sm:$0xff]  ;;  %v62_v21 = vld [vmem:[#allocation2 + $0x38] sm:$0xff] }
  0x9c   :  { %1794 = vmatprep.subr.bf16.mxu0 %v4110_v48  ;;  %1875 = vmatprep.subr.bf16.mxu1 %v4112_v44  ;;  %v70_v48 = vld [vmem:[#allocation2 + $0x78] sm:$0xff]  ;;  %v1435_v44 = vsel %vm1409_vm1, %v4221_v38, 0  ;;  %v4018_v45 = vcombine.high %v61_v42, %v69_v43  ;;  %v4099_v38 = vcombine.low %v142_v27, %v150_v28 }
  0x9d   :  { %v4020_v47 = vcombine.high %v62_v21, %v70_v48  ;;  %v4019_v54 = vcombine.low %v62_v21, %v70_v48  ;;  %v4914_v21 = vld [vmem:[%s5426_s0 + $0x34] ss:$8 sps:$4 sm:$0xff]  }
  0x9e   :  { %1683 = vmatmul.mubr.bf16.gmra.mrb[32].mxu0 %v4804_v50  ;;  %1764 = vmatmul.mubr.bf16.gmra.mrb[32].mxu1 %v4804_v50  ;;  %v4143_v50 = vcombine.low %v188_v56, %v196_v57  ;;  %v93_v57 = vld [vmem:[#allocation2 + $0x130] sm:$0xff]  ;;  %v174_v48 = vld [vmem:[#allocation2 + $0x3b8] sm:$0xff] }
  0x9f   :  { %1795 = vmatpush1.bf16.msra.mxu0 %v4109_v51  ;;  %1876 = vmatpush1.bf16.msra.mxu1 %v4111_v32  ;;  %v85_v51 = vld [vmem:[#allocation2 + $0xf0] sm:$0xff]  ;;  %v78_v32 = vld [vmem:[#allocation2 + $0xb8] sm:$0xff] }
  0xa0   :  { %1796 = vmatprep.subr.bf16.mxu0 %v4126_v52  ;;  %1877 = vmatprep.subr.bf16.mxu1 %v4128_v53  ;;  %v86_v52 = vld [vmem:[#allocation2 + $0xf8] sm:$0xff]  ;;  %v4017_v53 = vcombine.low %v61_v42, %v69_v43  ;;  %v4034_v55 = vcombine.high %v77_v49, %v85_v51  ;;  %v4033_v63 = vcombine.low %v77_v49, %v85_v51  ;;  %v173_v42 = vld [vmem:[#allocation2 + $0x3b0] sm:$0xff] }
  0xa1   :  { %4246 = vmatprep.mubr.msk.bf16.mxu0 %vm1393_vm0, %v4813_v62  ;;  %4252 = vmatprep.mubr.msk.bf16.mxu1 %vm1393_vm0, %v4813_v62  ;;  %v4036_v56 = vcombine.high %v78_v32, %v86_v52  ;;  %v4035_v0 = vcombine.low %v78_v32, %v86_v52  ;;  %v181_v43 = vld [vmem:[#allocation2 + $0x3f0] sm:$0xff]  ;;  %v190_v52 = vld [vmem:[#allocation2 + $0x438] sm:$0xff] }
  0xa2   :  { %v189_v51 = vld [vmem:[#allocation2 + $0x430] sm:$0xff] }
  0xa3   :  { %1797 = vmatpush1.bf16.msra.mxu0 %v4125_v59  ;;  %1878 = vmatpush1.bf16.msra.mxu1 %v4127_v41  ;;  %v101_v59 = vld [vmem:[#allocation2 + $0x170] sm:$0xff]  ;;  %v4875_v41 = vld [vmem:[%s5426_s0] ss:$8 sps:$4 sm:$0xff]  }
  0xa4   :  { %1798 = vmatprep.subr.bf16.mxu0 %v4142_v60  ;;  %1879 = vmatprep.subr.bf16.mxu1 %v4144_v61  ;;  %v94_v60 = vld [vmem:[#allocation2 + $0x138] sm:$0xff]  ;;  %v4050_v1 = vcombine.high %v93_v57, %v101_v59  ;;  %v4049_v9 = vcombine.low %v93_v57, %v101_v59  ;;  %v197_v32 = vld [vmem:[#allocation2 + $0x470] sm:$0xff] }
  0xa5   :  { %v102_v61 = vld [vmem:[#allocation2 + $0x178] sm:$0xff]  ;;  %v4146_v57 = vcombine.high %v189_v51, %v197_v32 }
  0xa6   :  { %1693 = vmatmul.mubr.bf16.gmra.mrb[36].mxu0 %v4819_v8  ;;  %1774 = vmatmul.mubr.bf16.gmra.mrb[36].mxu1 %v4819_v8  ;;  %v4052_v2 = vcombine.high %v94_v60, %v102_v61  ;;  %v4051_v10 = vcombine.low %v94_v60, %v102_v61  ;;  %v205_v60 = vld [vmem:[#allocation2 + $0x4b0] sm:$0xff] }
  0xa7   :  { %1799 = vmatpush1.bf16.msra.mxu0 %v4141_v4  ;;  %1880 = vmatpush1.bf16.msra.mxu1 %v4143_v50  ;;  %v109_v4 = vld [vmem:[#allocation2 + $0x1b0] sm:$0xff] }
  0xa8   :  { %1800 = vmatprep.subr.bf16.mxu0 %v4158_v5  ;;  %1881 = vmatprep.subr.bf16.mxu1 %v4160_v6  ;;  %v117_v50 = vld [vmem:[#allocation2 + $0x1f0] sm:$0xff]  ;;  %v110_v6 = vld [vmem:[#allocation2 + $0x1b8] sm:$0xff] }
  0xa9   :  { %4254 = vmatprep.mubr.msk.bf16.mxu0 %vm1393_vm0, %v4862_v58  ;;  %4260 = vmatprep.mubr.msk.bf16.mxu1 %vm1393_vm0, %v4862_v58  ;;  %v4882_v5 = vld [vmem:[%s5426_s0 + $0x14] ss:$8 sps:$4 sm:$0xff]   ;;  %v4066_v11 = vcombine.high %v109_v4, %v117_v50  ;;  %v4065_v19 = vcombine.low %v109_v4, %v117_v50  ;;  %v4067_v20 = vcombine.low %v110_v6, %v118_v7 }
  0xaa   :  { %v213_v61 = vld [vmem:[#allocation2 + $0x4f0] sm:$0xff] }
  0xab   :  { %1801 = vmatpush1.bf16.msra.mxu0 %v4157_v12  ;;  %1882 = vmatpush1.bf16.msra.mxu1 %v4159_v13  ;;  %v4068_v12 = vcombine.high %v110_v6, %v118_v7  ;;  %v125_v13 = vld [vmem:[#allocation2 + $0x230] sm:$0xff]  ;;  %v4162_v4 = vcombine.high %v205_v60, %v213_v61 }
  0xac   :  { %1802 = vmatprep.subr.bf16.mxu0 %v4174_v15  ;;  %1883 = vmatprep.subr.bf16.mxu1 %v4176_v16  ;;  %v133_v15 = vld [vmem:[#allocation2 + $0x270] sm:$0xff]  ;;  %v126_v16 = vld [vmem:[#allocation2 + $0x238] sm:$0xff] }
  0xad   :  { %v4081_v29 = vcombine.low %v125_v13, %v133_v15  ;;  %v221_v6 = vld [vmem:[#allocation2 + $0x530] sm:$0xff] }
  0xae   :  { %v229_v7 = vld [vmem:[#allocation2 + $0x570] sm:$0xff] }
  0xaf   :  { %1803 = vmatpush1.bf16.msra.mxu0 %v4173_v22  ;;  %1884 = vmatpush1.bf16.msra.mxu1 %v4175_v23  ;;  %v4082_v22 = vcombine.high %v125_v13, %v133_v15  ;;  %v4084_v23 = vcombine.high %v126_v16, %v134_v17  ;;  %v4178_v13 = vcombine.high %v221_v6, %v229_v7 }
  0xb0   :  { %1804 = vmatprep.subr.bf16.mxu0 %v4190_v24  ;;  %1885 = vmatprep.subr.bf16.mxu1 %v4192_v25  ;;  %v141_v24 = vld [vmem:[#allocation2 + $0x2b0] sm:$0xff] }
  0xb1   :  { %v149_v25 = vld [vmem:[#allocation2 + $0x2f0] sm:$0xff] }
  0xb3   :  { %1805 = vmatpush1.bf16.msra.mxu0 %v4189_v3  ;;  %1886 = vmatpush1.bf16.msra.mxu1 %v4191_v30  ;;  %v4083_v3 = vcombine.low %v126_v16, %v134_v17  ;;  %v4098_v30 = vcombine.high %v141_v24, %v149_v25  ;;  %v237_v16 = vld [vmem:[#allocation2 + $0x5b0] sm:$0xff] }
  0xb4   :  { %1806 = vmatprep.subr.bf16.mxu0 %v4206_v31  ;;  %1887 = vmatprep.subr.bf16.mxu1 %v4208_v33  ;;  %v4100_v31 = vcombine.high %v142_v27, %v150_v28  ;;  %v157_v33 = vld [vmem:[#allocation2 + $0x330] sm:$0xff] }
  0xb5   :  { %v245_v17 = vld [vmem:[#allocation2 + $0x5f0] sm:$0xff] }
  0xb6   :  { %v253_v27 = vld [vmem:[#allocation2 + $0x630] sm:$0xff] }
  0xb7   :  { %1807 = vmatpush1.bf16.msra.mxu0 %v4205_v36  ;;  %1888 = vmatpush1.bf16.msra.mxu1 %v4207_v37  ;;  %v166_v36 = vld [vmem:[#allocation2 + $0x378] sm:$0xff]  ;;  %v4907_v37 = vld [vmem:[%s5426_s0 + $0x20] ss:$8 sps:$4 sm:$0xff]   ;;  %v261_v28 = vld [vmem:[#allocation2 + $0x670] sm:$0xff] }
  0xb8   :  { %4253 = vmatprep.subr.msk.bf16.mxu0 %vm1409_vm1, %v4222_v14  ;;  %4259 = vmatprep.subr.msk.bf16.mxu1 %vm1409_vm1, %v4224_v39  ;;  %v4097_v14 = vcombine.low %v141_v24, %v149_v25  ;;  %v4114_v39 = vcombine.high %v157_v33, %v165_v34  ;;  %v4116_v40 = vcombine.high %v158_v35, %v166_v36 }
  0xb9   :  { %v4194_v24 = vcombine.high %v237_v16, %v245_v17 }
  0xbb   :  { %1809 = vmatpush1.bf16.msra.mxu0 %v1435_v44  ;;  %1890 = vmatpush1.bf16.msra.mxu1 %v1441_v46  ;;  %v182_v44 = vld [vmem:[#allocation2 + $0x3f8] sm:$0xff]  ;;  %v4115_v46 = vcombine.low %v158_v35, %v166_v36  ;;  %v4209_v36 = vcombine.low %v253_v27, %v261_v28 }
  0xbc   :  { %1944 = vmatprep.subr.bf16.mxu0 %v4018_v45  ;;  %2025 = vmatprep.subr.bf16.mxu1 %v4020_v47  ;;  %v4113_v45 = vcombine.low %v157_v33, %v165_v34  ;;  %v4130_v47 = vcombine.high %v173_v42, %v181_v43  ;;  %v4132_v49 = vcombine.high %v174_v48, %v182_v44  ;;  %v269_v34 = vld [vmem:[#allocation2 + $0x6b0] sm:$0xff]  ;;  %v270_v35 = vld [vmem:[#allocation2 + $0x6b8] sm:$0xff] }
  0xbd   :  { %v4210_v33 = vcombine.high %v253_v27, %v261_v28 }
  0xbe   :  { %1815 = vmatmul.mubr.bf16.vlgmr.msra.gmra.mrb[40].mxu0 %v4875_v41  ;;  %1896 = vmatmul.mubr.bf16.vlgmr.msra.gmra.mrb[40].mxu1 %v4875_v41 }
  0xbf   :  { %1945 = vmatpush1.bf16.msra.mxu0 %v4017_v53  ;;  %2026 = vmatpush1.bf16.msra.mxu1 %v4019_v54  ;;  %v198_v53 = vld [vmem:[#allocation2 + $0x478] sm:$0xff] }
  0xc0   :  { %1946 = vmatprep.subr.bf16.mxu0 %v4034_v55  ;;  %2027 = vmatprep.subr.bf16.mxu1 %v4036_v56  ;;  %v4923_v54 = vld [vmem:[%s5426_s0 + $0x30] ss:$8 sps:$4 sm:$0xff]   ;;  %v4129_v55 = vcombine.low %v173_v42, %v181_v43  ;;  %v4131_v56 = vcombine.low %v174_v48, %v182_v44  ;;  %v4148_v59 = vcombine.high %v190_v52, %v198_v53 }
  0xc1   :  { %4255 = vmatprep.mubr.msk.bf16.mxu0 %vm1393_vm0, %v4882_v5  ;;  %4261 = vmatprep.mubr.msk.bf16.mxu1 %vm1393_vm0, %v4882_v5  ;;  %v4227_v42 = vcombine.low %v270_v35, %v270_v35 }
  0xc3   :  { %1947 = vmatpush1.bf16.msra.mxu0 %v4033_v63  ;;  %2028 = vmatpush1.bf16.msra.mxu1 %v4035_v0  ;;  %v206_v63 = vld [vmem:[#allocation2 + $0x4b8] sm:$0xff]  ;;  %v1453_v48 = vsel %vm1409_vm1, %v4227_v42, 0 }
  0xc4   :  { %1948 = vmatprep.subr.bf16.mxu0 %v4050_v1  ;;  %2029 = vmatprep.subr.bf16.mxu1 %v4052_v2  ;;  %v214_v0 = vld [vmem:[#allocation2 + $0x4f8] sm:$0xff]  ;;  %v4145_v1 = vcombine.low %v189_v51, %v197_v32  ;;  %v4147_v2 = vcombine.low %v190_v52, %v198_v53 }
  0xc5   :  { %v4164_v50 = vcombine.high %v206_v63, %v214_v0 }
  0xc6   :  { %1825 = vmatmul.mubr.bf16.gmra.mrb[44].mxu0 %v4891_v18  ;;  %1906 = vmatmul.mubr.bf16.gmra.mrb[44].mxu1 %v4891_v18 }
  0xc7   :  { %1949 = vmatpush1.bf16.msra.mxu0 %v4049_v9  ;;  %2030 = vmatpush1.bf16.msra.mxu1 %v4051_v10  ;;  %v222_v9 = vld [vmem:[#allocation2 + $0x538] sm:$0xff] }
  0xc8   :  { %1950 = vmatprep.subr.bf16.mxu0 %v4066_v11  ;;  %2031 = vmatprep.subr.bf16.mxu1 %v4068_v12  ;;  %v230_v10 = vld [vmem:[#allocation2 + $0x578] sm:$0xff]  ;;  %v4161_v11 = vcombine.low %v205_v60, %v213_v61  ;;  %v4163_v12 = vcombine.low %v206_v63, %v214_v0 }
  0xc9   :  { %4256 = vmatprep.mubr.msk.bf16.mxu0 %vm1393_vm0, %v4898_v26  ;;  %4262 = vmatprep.mubr.msk.bf16.mxu1 %vm1393_vm0, %v4898_v26  ;;  %v4180_v15 = vcombine.high %v222_v9, %v230_v10 }
  0xcb   :  { %1951 = vmatpush1.bf16.msra.mxu0 %v4065_v19  ;;  %2032 = vmatpush1.bf16.msra.mxu1 %v4067_v20  ;;  %v238_v19 = vld [vmem:[#allocation2 + $0x5b8] sm:$0xff] }
  0xcc   :  { %1952 = vmatprep.subr.bf16.mxu0 %v4082_v22  ;;  %2033 = vmatprep.subr.bf16.mxu1 %v4084_v23  ;;  %v246_v20 = vld [vmem:[#allocation2 + $0x5f8] sm:$0xff]  ;;  %v4177_v22 = vcombine.low %v221_v6, %v229_v7  ;;  %v4179_v23 = vcombine.low %v222_v9, %v230_v10 }
  0xcd   :  { %v4196_v25 = vcombine.high %v238_v19, %v246_v20 }
  0xce   :  { %1835 = vmatmul.mubr.bf16.gmra.mrb[48].mxu0 %v4907_v37  ;;  %1916 = vmatmul.mubr.bf16.gmra.mrb[48].mxu1 %v4907_v37 }
  0xcf   :  { %1953 = vmatpush1.bf16.msra.mxu0 %v4081_v29  ;;  %2034 = vmatpush1.bf16.msra.mxu1 %v4083_v3  ;;  %v254_v29 = vld [vmem:[#allocation2 + $0x638] sm:$0xff] }
  0xd0   :  { %1954 = vmatprep.subr.bf16.mxu0 %v4098_v30  ;;  %2035 = vmatprep.subr.bf16.mxu1 %v4100_v31  ;;  %v262_v3 = vld [vmem:[#allocation2 + $0x678] sm:$0xff]  ;;  %v4193_v30 = vcombine.low %v237_v16, %v245_v17  ;;  %v4195_v31 = vcombine.low %v238_v19, %v246_v20 }
  0xd1   :  { %4257 = vmatprep.mubr.msk.bf16.mxu0 %vm1393_vm0, %v4914_v21  ;;  %4263 = vmatprep.mubr.msk.bf16.mxu1 %vm1393_vm0, %v4914_v21 }
  0xd3   :  { %1955 = vmatpush1.bf16.msra.mxu0 %v4097_v14  ;;  %2036 = vmatpush1.bf16.msra.mxu1 %v4099_v38  ;;  %v4211_v14 = vcombine.low %v254_v29, %v262_v3  ;;  %v4226_v38 = vcombine.high %v269_v34, %v269_v34 }
  0xd4   :  { %1956 = vmatprep.subr.bf16.mxu0 %v4114_v39  ;;  %2037 = vmatprep.subr.bf16.mxu1 %v4116_v40  ;;  %v4225_v39 = vcombine.low %v269_v34, %v269_v34  ;;  %v4228_v40 = vcombine.high %v270_v35, %v270_v35 }
  0xd6   :  { %1845 = vmatmul.mubr.bf16.gmra.mrb[52].mxu0 %v4923_v54  ;;  %1926 = vmatmul.mubr.bf16.gmra.mrb[52].mxu1 %v4923_v54  ;;  %v1447_v43 = vsel %vm1409_vm1, %v4225_v39, 0 }
  0xd7   :  { %1957 = vmatpush1.bf16.msra.mxu0 %v4113_v45  ;;  %2038 = vmatpush1.bf16.msra.mxu1 %v4115_v46 }
  0xd8   :  { %1958 = vmatprep.subr.bf16.mxu0 %v4130_v47  ;;  %2039 = vmatprep.subr.bf16.mxu1 %v4132_v49 }
  0xd9   :  { %4258 = vmatprep.mubr.msk.bf16.mxu0 %vm1393_vm0, %v4813_v62  ;;  %4264 = vmatprep.mubr.msk.bf16.mxu1 %vm1393_vm0, %v4813_v62 }
  0xdb   :  { %1959 = vmatpush1.bf16.msra.mxu0 %v4129_v55  ;;  %2040 = vmatpush1.bf16.msra.mxu1 %v4131_v56 }
  0xdc   :  { %1960 = vmatprep.subr.bf16.mxu0 %v4146_v57  ;;  %2041 = vmatprep.subr.bf16.mxu1 %v4148_v59 }
  0xde   :  { %1855 = vmatmul.mubr.bf16.gmra.mrb[56].mxu0 %v4819_v8  ;;  %1936 = vmatmul.mubr.bf16.gmra.mrb[56].mxu1 %v4819_v8 }
  0xdf   :  { %1961 = vmatpush1.bf16.msra.mxu0 %v4145_v1  ;;  %2042 = vmatpush1.bf16.msra.mxu1 %v4147_v2 }
  0xe0   :  { %1962 = vmatprep.subr.bf16.mxu0 %v4162_v4  ;;  %2043 = vmatprep.subr.bf16.mxu1 %v4164_v50 }
  0xe1   :  { %4266 = vmatprep.mubr.msk.bf16.mxu0 %vm1393_vm0, %v4862_v58  ;;  %4272 = vmatprep.mubr.msk.bf16.mxu1 %vm1393_vm0, %v4862_v58  ;;  %v4212_v58 = vcombine.high %v254_v29, %v262_v3 }
  0xe3   :  { %1963 = vmatpush1.bf16.msra.mxu0 %v4161_v11  ;;  %2044 = vmatpush1.bf16.msra.mxu1 %v4163_v12 }
  0xe4   :  { %1964 = vmatprep.subr.bf16.mxu0 %v4178_v13  ;;  %2045 = vmatprep.subr.bf16.mxu1 %v4180_v15 }
  0xe7   :  { %1965 = vmatpush1.bf16.msra.mxu0 %v4177_v22  ;;  %2046 = vmatpush1.bf16.msra.mxu1 %v4179_v23 }
  0xe8   :  { %1966 = vmatprep.subr.bf16.mxu0 %v4194_v24  ;;  %2047 = vmatprep.subr.bf16.mxu1 %v4196_v25 }
  0xeb   :  { %1967 = vmatpush1.bf16.msra.mxu0 %v4193_v30  ;;  %2048 = vmatpush1.bf16.msra.mxu1 %v4195_v31 }
  0xec   :  { %1968 = vmatprep.subr.bf16.mxu0 %v4210_v33  ;;  %2049 = vmatprep.subr.bf16.mxu1 %v4212_v58 }
  0xef   :  { %1969 = vmatpush1.bf16.msra.mxu0 %v4209_v36  ;;  %2050 = vmatpush1.bf16.msra.mxu1 %v4211_v14 }
  0xf0   :  { %4265 = vmatprep.subr.msk.bf16.mxu0 %vm1409_vm1, %v4226_v38  ;;  %4271 = vmatprep.subr.msk.bf16.mxu1 %vm1409_vm1, %v4228_v40 }
  0xf3   :  { %1971 = vmatpush1.bf16.msra.mxu0 %v1447_v43  ;;  %2052 = vmatpush1.bf16.msra.mxu1 %v1453_v48 }
  0xf6   :  { %1977 = vmatmul.mubr.bf16.vlgmr.msra.gmra.mrb[60].mxu0 %v4875_v41  ;;  %2058 = vmatmul.mubr.bf16.vlgmr.msra.gmra.mrb[60].mxu1 %v4875_v41  ;;  %v4681_v41 = vmov 0  }
  0xf7   :  { %4267 = vmatprep.mubr.msk.bf16.mxu0 %vm1393_vm0, %v4882_v5  ;;  %4273 = vmatprep.mubr.msk.bf16.mxu1 %vm1393_vm0, %v4882_v5 }
  0xfe   :  { %1987 = vmatmul.mubr.bf16.gmra.mrb[64].mxu0 %v4891_v18  ;;  %2068 = vmatmul.mubr.bf16.gmra.mrb[64].mxu1 %v4891_v18 }
  0xff   :  { %4268 = vmatprep.mubr.msk.bf16.mxu0 %vm1393_vm0, %v4898_v26  ;;  %4274 = vmatprep.mubr.msk.bf16.mxu1 %vm1393_vm0, %v4898_v26 }
 0x106   :  { %1997 = vmatmul.mubr.bf16.gmra.mrb[68].mxu0 %v4907_v37  ;;  %2078 = vmatmul.mubr.bf16.gmra.mrb[68].mxu1 %v4907_v37 }
 0x107   :  { %4269 = vmatprep.mubr.msk.bf16.mxu0 %vm1393_vm0, %v4914_v21  ;;  %4275 = vmatprep.mubr.msk.bf16.mxu1 %vm1393_vm0, %v4914_v21 }
 0x10e   :  { %2007 = vmatmul.mubr.bf16.gmra.mrb[72].mxu0 %v4923_v54  ;;  %2088 = vmatmul.mubr.bf16.gmra.mrb[72].mxu1 %v4923_v54 }
 0x10f   :  { %4270 = vmatprep.mubr.msk.bf16.mxu0 %vm1393_vm0, %v4813_v62  ;;  %4276 = vmatprep.mubr.msk.bf16.mxu1 %vm1393_vm0, %v4813_v62 }
 0x116   :  { %2017 = vmatmul.mubr.bf16.gmra.mrb[76].mxu0 %v4819_v8  ;;  %2098 = vmatmul.mubr.bf16.gmra.mrb[76].mxu1 %v4819_v8 }
 0x117   :  { %2415 = vmatprep.mubr.bf16.mxu0 %v4681_v41  ;;  %2456 = vmatprep.mubr.bf16.mxu1 %v4681_v41 }
 0x121   :  { %v1492_v5 = vpop.f32.mrb[0].mxu0  ;;  %v1573_v37 = vpop.f32.mrb[0].mxu1 }
 0x122   :  { %v2106_v18 = vmax.f32 %v1492_v5, 0.0  ;;  %v1494_v26 = vpop.f32.mrb[1].mxu0  ;;  %v2108_v21 = vmax.f32 %v1573_v37, 0.0  ;;  %v1575_v45 = vpop.f32.mrb[1].mxu1 }
 0x123   :  { %v1496_v44 = vpop.f32.mrb[2].mxu0  ;;  %v2109_v47 = vmax.f32 %v1575_v45, 0.0  ;;  %v1577_v62 = vpop.f32.mrb[2].mxu1  ;;  %v2107_v51 = vmax.f32 %v1494_v26, 0.0 }
 0x124   :  { %v2122_v46 = vmax.f32 %v1496_v44, 0.0  ;;  %v1498_v49 = vpop.f32.mrb[3].mxu0  ;;  %v2124_v52 = vmax.f32 %v1577_v62, 0.0  ;;  %v1579_v8 = vpop.f32.mrb[3].mxu1 }
 0x125   :  { %v2123_v32 = vmax.f32 %v1498_v49, 0.0  ;;  %v2125_v54 = vmax.f32 %v1579_v8, 0.0 }
 0x126   :  { %v2251_v53 = vpack.c.bf16 %v2122_v46, %v2106_v18  ;;  %v2253_v56 = vpack.c.bf16 %v2124_v52, %v2108_v21 }
 0x127   :  { %v2252_v55 = vpack.c.bf16 %v2123_v32, %v2107_v51  ;;  %v2254_v57 = vpack.c.bf16 %v2125_v54, %v2109_v47 }
 0x129   :  { %2383 = vmatprep.subr.bf16.mxu0 %v2252_v55  ;;  %v1502_v59 = vpop.f32.mrb[4].mxu0  ;;  %2424 = vmatprep.subr.bf16.mxu1 %v2254_v57  ;;  %v1583_v63 = vpop.f32.mrb[4].mxu1 }
 0x12a   :  { %2384 = vmatpush1.bf16.msra.mxu0 %v2251_v53  ;;  %v2138_v60 = vmax.f32 %v1502_v59, 0.0  ;;  %v1504_v61 = vpop.f32.mrb[5].mxu0  ;;  %2425 = vmatpush1.bf16.msra.mxu1 %v2253_v56  ;;  %v2140_v2 = vmax.f32 %v1583_v63, 0.0  ;;  %v1585_v4 = vpop.f32.mrb[5].mxu1 }
 0x12b   :  { %v2139_v0 = vmax.f32 %v1504_v61, 0.0  ;;  %v1506_v1 = vpop.f32.mrb[6].mxu0  ;;  %v2141_v7 = vmax.f32 %v1585_v4, 0.0  ;;  %v1587_v9 = vpop.f32.mrb[6].mxu1 }
 0x12c   :  { %v2154_v50 = vmax.f32 %v1506_v1, 0.0  ;;  %v1508_v6 = vpop.f32.mrb[7].mxu0  ;;  %v2156_v11 = vmax.f32 %v1587_v9, 0.0  ;;  %v1589_v12 = vpop.f32.mrb[7].mxu1 }
 0x12d   :  { %v2155_v10 = vmax.f32 %v1508_v6, 0.0  ;;  %v2157_v15 = vmax.f32 %v1589_v12, 0.0 }
 0x12e   :  { %v2267_v13 = vpack.c.bf16 %v2154_v50, %v2138_v60  ;;  %v2269_v17 = vpack.c.bf16 %v2156_v11, %v2140_v2 }
 0x12f   :  { %v2268_v16 = vpack.c.bf16 %v2155_v10, %v2139_v0  ;;  %v2270_v19 = vpack.c.bf16 %v2157_v15, %v2141_v7 }
 0x131   :  { %v1512_v20 = vpop.f32.mrb[8].mxu0  ;;  %2385 = vmatprep.subr.bf16.mxu0 %v2268_v16  ;;  %v1593_v24 = vpop.f32.mrb[8].mxu1  ;;  %2426 = vmatprep.subr.bf16.mxu1 %v2270_v19 }
 0x132   :  { %v2170_v22 = vmax.f32 %v1512_v20, 0.0  ;;  %v1514_v23 = vpop.f32.mrb[9].mxu0  ;;  %2386 = vmatpush1.bf16.msra.mxu0 %v2267_v13  ;;  %v2172_v28 = vmax.f32 %v1593_v24, 0.0  ;;  %v1595_v29 = vpop.f32.mrb[9].mxu1  ;;  %2427 = vmatpush1.bf16.msra.mxu1 %v2269_v17  ;;  %v4976_v13 = vld [vmem:[%s5428_s2] sm:$0x3] }
 0x133   :  { %v2171_v25 = vmax.f32 %v1514_v23, 0.0  ;;  %v1516_v27 = vpop.f32.mrb[10].mxu0  ;;  %v2173_v31 = vmax.f32 %v1595_v29, 0.0  ;;  %v1597_v33 = vpop.f32.mrb[10].mxu1 }
 0x134   :  { %v2186_v3 = vmax.f32 %v1516_v27, 0.0  ;;  %v1518_v30 = vpop.f32.mrb[11].mxu0  ;;  %v2188_v34 = vmax.f32 %v1597_v33, 0.0  ;;  %v1599_v35 = vpop.f32.mrb[11].mxu1 }
 0x135   :  { %v2187_v58 = vmax.f32 %v1518_v30, 0.0  ;;  %v2189_v14 = vmax.f32 %v1599_v35, 0.0 }
 0x136   :  { %v2283_v36 = vpack.c.bf16 %v2186_v3, %v2170_v22  ;;  %v2285_v39 = vpack.c.bf16 %v2188_v34, %v2172_v28 }
 0x137   :  { %v2284_v38 = vpack.c.bf16 %v2187_v58, %v2171_v25  ;;  %v2286_v40 = vpack.c.bf16 %v2189_v14, %v2173_v31 }
 0x139   :  { %v1522_v42 = vpop.f32.mrb[12].mxu0  ;;  %2387 = vmatprep.subr.bf16.mxu0 %v2284_v38  ;;  %v1603_v5 = vpop.f32.mrb[12].mxu1  ;;  %2428 = vmatprep.subr.bf16.mxu1 %v2286_v40 }
 0x13a   :  { %v2202_v43 = vmax.f32 %v1522_v42, 0.0  ;;  %v1524_v48 = vpop.f32.mrb[13].mxu0  ;;  %2388 = vmatpush1.bf16.msra.mxu0 %v2283_v36  ;;  %v2204_v37 = vmax.f32 %v1603_v5, 0.0  ;;  %v1605_v21 = vpop.f32.mrb[13].mxu1  ;;  %2429 = vmatpush1.bf16.msra.mxu1 %v2285_v39 }
 0x13b   :  { %v2203_v18 = vmax.f32 %v1524_v48, 0.0  ;;  %v1526_v26 = vpop.f32.mrb[14].mxu0  ;;  %v2205_v46 = vmax.f32 %v1605_v21, 0.0  ;;  %v1607_v47 = vpop.f32.mrb[14].mxu1 }
 0x13c   :  { %v2218_v44 = vmax.f32 %v1526_v26, 0.0  ;;  %v1528_v45 = vpop.f32.mrb[15].mxu0  ;;  %v2220_v62 = vmax.f32 %v1607_v47, 0.0  ;;  %v1609_v51 = vpop.f32.mrb[15].mxu1 }
 0x13d   :  { %v2219_v49 = vmax.f32 %v1528_v45, 0.0  ;;  %v2221_v52 = vmax.f32 %v1609_v51, 0.0 }
 0x13e   :  { %v2299_v32 = vpack.c.bf16 %v2218_v44, %v2202_v43  ;;  %v2301_v53 = vpack.c.bf16 %v2220_v62, %v2204_v37 }
 0x13f   :  { %v2300_v8 = vpack.c.bf16 %v2219_v49, %v2203_v18  ;;  %v2302_v54 = vpack.c.bf16 %v2221_v52, %v2205_v46 }
 0x141   :  { %2389 = vmatprep.subr.bf16.mxu0 %v2300_v8  ;;  %v1532_v55 = vpop.f32.mrb[16].mxu0  ;;  %2430 = vmatprep.subr.bf16.mxu1 %v2302_v54  ;;  %v1613_v59 = vpop.f32.mrb[16].mxu1 }
 0x142   :  { %v2234_v56 = vmax.f32 %v1532_v55, 0.0  ;;  %2390 = vmatpush1.bf16.msra.mxu0 %v2299_v32  ;;  %v1534_v57 = vpop.f32.mrb[17].mxu0  ;;  %v2236_v63 = vmax.f32 %v1613_v59, 0.0  ;;  %2431 = vmatpush1.bf16.msra.mxu1 %v2301_v53  ;;  %v1615_v0 = vpop.f32.mrb[17].mxu1 }
 0x143   :  { %v2235_v60 = vmax.f32 %v1534_v57, 0.0  ;;  %v1536_v61 = vpop.f32.mrb[18].mxu0  ;;  %v2237_v4 = vmax.f32 %v1615_v0, 0.0  ;;  %v1617_v50 = vpop.f32.mrb[18].mxu1 }
 0x144   :  { %v2315_v1 = vpack.c.bf16 %v2234_v56, %v2234_v56  ;;  %v1537_v2 = vpop.f32.mrb[19].mxu0  ;;  %v2317_v7 = vpack.c.bf16 %v2236_v63, %v2236_v63  ;;  %v1618_v9 = vpop.f32.mrb[19].mxu1 }
 0x145   :  { %v2316_v6 = vpack.c.bf16 %v2235_v60, %v2235_v60  ;;  %v2318_v11 = vpack.c.bf16 %v2237_v4, %v2237_v4 }
 0x146   :  { %v2336_v10 = vsel %vm1409_vm1, %v2315_v1, 0  ;;  %v2342_v12 = vsel %vm1409_vm1, %v2317_v7, 0 }
 0x147   :  { %4277 = vmatprep.subr.msk.bf16.mxu0 %vm1409_vm1, %v2316_v6  ;;  %4279 = vmatprep.subr.msk.bf16.mxu1 %vm1409_vm1, %v2318_v11 }
 0x148   :  { %2392 = vmatpush1.bf16.msra.mxu0 %v2336_v10  ;;  %2433 = vmatpush1.bf16.msra.mxu1 %v2342_v12 }
 0x14b   :  { %4278 = vmatmul.mubr.msk.bf16.vlgmr.msra.gmra.mrb[80].mxu0 %vm2331_vm2, %v4976_v13  ;;  %4280 = vmatmul.mubr.msk.bf16.vlgmr.msra.gmra.mrb[80].mxu1 %vm2331_vm2, %v4976_v13 }
 0x14c   :  { %2497 = vmatprep.mubr.bf16.mxu0 %v4681_v41  ;;  %2538 = vmatprep.mubr.bf16.mxu1 %v4681_v41 }
 0x159   :  { %v1654_v15 = vpop.f32.mrb[20].mxu0  ;;  %v1735_v19 = vpop.f32.mrb[20].mxu1 }
 0x15a   :  { %v2110_v16 = vmax.f32 %v1654_v15, 0.0  ;;  %v1656_v17 = vpop.f32.mrb[21].mxu0  ;;  %v2112_v20 = vmax.f32 %v1735_v19, 0.0  ;;  %v1737_v23 = vpop.f32.mrb[21].mxu1 }
 0x15b   :  { %v1658_v22 = vpop.f32.mrb[22].mxu0  ;;  %v2113_v25 = vmax.f32 %v1737_v23, 0.0  ;;  %v1739_v28 = vpop.f32.mrb[22].mxu1  ;;  %v2111_v29 = vmax.f32 %v1656_v17, 0.0 }
 0x15c   :  { %v2126_v24 = vmax.f32 %v1658_v22, 0.0  ;;  %v1660_v27 = vpop.f32.mrb[23].mxu0  ;;  %v2128_v30 = vmax.f32 %v1739_v28, 0.0  ;;  %v1741_v31 = vpop.f32.mrb[23].mxu1 }
 0x15d   :  { %v2127_v3 = vmax.f32 %v1660_v27, 0.0  ;;  %v2129_v58 = vmax.f32 %v1741_v31, 0.0 }
 0x15e   :  { %v2255_v33 = vpack.c.bf16 %v2126_v24, %v2110_v16  ;;  %v2257_v35 = vpack.c.bf16 %v2128_v30, %v2112_v20 }
 0x15f   :  { %v2256_v34 = vpack.c.bf16 %v2127_v3, %v2111_v29  ;;  %v2258_v36 = vpack.c.bf16 %v2129_v58, %v2113_v25 }
 0x161   :  { %2465 = vmatprep.subr.bf16.mxu0 %v2256_v34  ;;  %v1664_v14 = vpop.f32.mrb[24].mxu0  ;;  %2506 = vmatprep.subr.bf16.mxu1 %v2258_v36  ;;  %v1745_v40 = vpop.f32.mrb[24].mxu1 }
 0x162   :  { %2466 = vmatpush1.bf16.msra.mxu0 %v2255_v33  ;;  %v2142_v38 = vmax.f32 %v1664_v14, 0.0  ;;  %v1666_v39 = vpop.f32.mrb[25].mxu0  ;;  %2507 = vmatpush1.bf16.msra.mxu1 %v2257_v35  ;;  %v2144_v48 = vmax.f32 %v1745_v40, 0.0  ;;  %v1747_v5 = vpop.f32.mrb[25].mxu1 }
 0x163   :  { %v2143_v42 = vmax.f32 %v1666_v39, 0.0  ;;  %v1668_v43 = vpop.f32.mrb[26].mxu0  ;;  %v2145_v37 = vmax.f32 %v1747_v5, 0.0  ;;  %v1749_v21 = vpop.f32.mrb[26].mxu1 }
 0x164   :  { %v2158_v18 = vmax.f32 %v1668_v43, 0.0  ;;  %v1670_v26 = vpop.f32.mrb[27].mxu0  ;;  %v2160_v45 = vmax.f32 %v1749_v21, 0.0  ;;  %v1751_v46 = vpop.f32.mrb[27].mxu1 }
 0x165   :  { %v2159_v44 = vmax.f32 %v1670_v26, 0.0  ;;  %v2161_v49 = vmax.f32 %v1751_v46, 0.0 }
 0x166   :  { %v2271_v47 = vpack.c.bf16 %v2158_v18, %v2142_v38  ;;  %v2273_v51 = vpack.c.bf16 %v2160_v45, %v2144_v48 }
 0x167   :  { %v2272_v62 = vpack.c.bf16 %v2159_v44, %v2143_v42  ;;  %v2274_v32 = vpack.c.bf16 %v2161_v49, %v2145_v37 }
 0x169   :  { %v1674_v52 = vpop.f32.mrb[28].mxu0  ;;  %2467 = vmatprep.subr.bf16.mxu0 %v2272_v62  ;;  %v1755_v54 = vpop.f32.mrb[28].mxu1  ;;  %2508 = vmatprep.subr.bf16.mxu1 %v2274_v32 }
 0x16a   :  { %v2174_v8 = vmax.f32 %v1674_v52, 0.0  ;;  %v1676_v53 = vpop.f32.mrb[29].mxu0  ;;  %2468 = vmatpush1.bf16.msra.mxu0 %v2271_v47  ;;  %v2176_v57 = vmax.f32 %v1755_v54, 0.0  ;;  %v1757_v59 = vpop.f32.mrb[29].mxu1  ;;  %2509 = vmatpush1.bf16.msra.mxu1 %v2273_v51 }
 0x16b   :  { %v2175_v55 = vmax.f32 %v1676_v53, 0.0  ;;  %v1678_v56 = vpop.f32.mrb[30].mxu0  ;;  %v2177_v63 = vmax.f32 %v1757_v59, 0.0  ;;  %v1759_v0 = vpop.f32.mrb[30].mxu1 }
 0x16c   :  { %v2190_v60 = vmax.f32 %v1678_v56, 0.0  ;;  %v1680_v61 = vpop.f32.mrb[31].mxu0  ;;  %v2192_v2 = vmax.f32 %v1759_v0, 0.0  ;;  %v1761_v4 = vpop.f32.mrb[31].mxu1 }
 0x16d   :  { %v2191_v1 = vmax.f32 %v1680_v61, 0.0  ;;  %v2193_v6 = vmax.f32 %v1761_v4, 0.0 }
 0x16e   :  { %v2287_v50 = vpack.c.bf16 %v2190_v60, %v2174_v8  ;;  %v2289_v9 = vpack.c.bf16 %v2192_v2, %v2176_v57 }
 0x16f   :  { %v2288_v7 = vpack.c.bf16 %v2191_v1, %v2175_v55  ;;  %v2290_v10 = vpack.c.bf16 %v2193_v6, %v2177_v63 }
 0x171   :  { %v1684_v11 = vpop.f32.mrb[32].mxu0  ;;  %2469 = vmatprep.subr.bf16.mxu0 %v2288_v7  ;;  %v1765_v16 = vpop.f32.mrb[32].mxu1  ;;  %2510 = vmatprep.subr.bf16.mxu1 %v2290_v10 }
 0x172   :  { %v2206_v12 = vmax.f32 %v1684_v11, 0.0  ;;  %v1686_v15 = vpop.f32.mrb[33].mxu0  ;;  %2470 = vmatpush1.bf16.msra.mxu0 %v2287_v50  ;;  %v2208_v20 = vmax.f32 %v1765_v16, 0.0  ;;  %v1767_v22 = vpop.f32.mrb[33].mxu1  ;;  %2511 = vmatpush1.bf16.msra.mxu1 %v2289_v9 }
 0x173   :  { %v2207_v17 = vmax.f32 %v1686_v15, 0.0  ;;  %v1688_v19 = vpop.f32.mrb[34].mxu0  ;;  %v2209_v25 = vmax.f32 %v1767_v22, 0.0  ;;  %v1769_v27 = vpop.f32.mrb[34].mxu1 }
 0x174   :  { %v2222_v23 = vmax.f32 %v1688_v19, 0.0  ;;  %v1690_v24 = vpop.f32.mrb[35].mxu0  ;;  %v2224_v29 = vmax.f32 %v1769_v27, 0.0  ;;  %v1771_v3 = vpop.f32.mrb[35].mxu1 }
 0x175   :  { %v2223_v28 = vmax.f32 %v1690_v24, 0.0  ;;  %v2225_v31 = vmax.f32 %v1771_v3, 0.0 }
 0x176   :  { %v2303_v30 = vpack.c.bf16 %v2222_v23, %v2206_v12  ;;  %v2305_v58 = vpack.c.bf16 %v2224_v29, %v2208_v20 }
 0x177   :  { %v2304_v33 = vpack.c.bf16 %v2223_v28, %v2207_v17  ;;  %v2306_v34 = vpack.c.bf16 %v2225_v31, %v2209_v25 }
 0x179   :  { %2471 = vmatprep.subr.bf16.mxu0 %v2304_v33  ;;  %v1694_v35 = vpop.f32.mrb[36].mxu0  ;;  %2512 = vmatprep.subr.bf16.mxu1 %v2306_v34  ;;  %v1775_v38 = vpop.f32.mrb[36].mxu1 }
 0x17a   :  { %v2238_v36 = vmax.f32 %v1694_v35, 0.0  ;;  %2472 = vmatpush1.bf16.msra.mxu0 %v2303_v30  ;;  %v1696_v14 = vpop.f32.mrb[37].mxu0  ;;  %v2240_v42 = vmax.f32 %v1775_v38, 0.0  ;;  %2513 = vmatpush1.bf16.msra.mxu1 %v2305_v58  ;;  %v1777_v43 = vpop.f32.mrb[37].mxu1 }
 0x17b   :  { %v2239_v39 = vmax.f32 %v1696_v14, 0.0  ;;  %v1698_v40 = vpop.f32.mrb[38].mxu0  ;;  %v2241_v18 = vmax.f32 %v1777_v43, 0.0  ;;  %v1779_v26 = vpop.f32.mrb[38].mxu1 }
 0x17c   :  { %v2319_v48 = vpack.c.bf16 %v2238_v36, %v2238_v36  ;;  %v1699_v5 = vpop.f32.mrb[39].mxu0  ;;  %v2321_v21 = vpack.c.bf16 %v2240_v42, %v2240_v42  ;;  %v1780_v44 = vpop.f32.mrb[39].mxu1 }
 0x17d   :  { %v2320_v37 = vpack.c.bf16 %v2239_v39, %v2239_v39  ;;  %v2322_v46 = vpack.c.bf16 %v2241_v18, %v2241_v18 }
 0x17e   :  { %v2348_v45 = vsel %vm1409_vm1, %v2319_v48, 0  ;;  %v2354_v47 = vsel %vm1409_vm1, %v2321_v21, 0 }
 0x17f   :  { %4281 = vmatprep.subr.msk.bf16.mxu0 %vm1409_vm1, %v2320_v37  ;;  %4283 = vmatprep.subr.msk.bf16.mxu1 %vm1409_vm1, %v2322_v46 }
 0x180   :  { %2474 = vmatpush1.bf16.msra.mxu0 %v2348_v45  ;;  %2515 = vmatpush1.bf16.msra.mxu1 %v2354_v47 }
 0x183   :  { %4282 = vmatmul.mubr.msk.bf16.vlgmr.msra.gmra.mrb[84].mxu0 %vm2331_vm2, %v4976_v13  ;;  %4284 = vmatmul.mubr.msk.bf16.vlgmr.msra.gmra.mrb[84].mxu1 %vm2331_vm2, %v4976_v13 }
 0x184   :  { %2579 = vmatprep.mubr.bf16.mxu0 %v4681_v41  ;;  %2620 = vmatprep.mubr.bf16.mxu1 %v4681_v41 }
 0x191   :  { %v1816_v49 = vpop.f32.mrb[40].mxu0  ;;  %v1897_v32 = vpop.f32.mrb[40].mxu1 }
 0x192   :  { %v2114_v62 = vmax.f32 %v1816_v49, 0.0  ;;  %v1818_v51 = vpop.f32.mrb[41].mxu0  ;;  %v2116_v52 = vmax.f32 %v1897_v32, 0.0  ;;  %v1899_v53 = vpop.f32.mrb[41].mxu1 }
 0x193   :  { %v1820_v8 = vpop.f32.mrb[42].mxu0  ;;  %v2117_v55 = vmax.f32 %v1899_v53, 0.0  ;;  %v1901_v57 = vpop.f32.mrb[42].mxu1  ;;  %v2115_v59 = vmax.f32 %v1818_v51, 0.0 }
 0x194   :  { %v2130_v54 = vmax.f32 %v1820_v8, 0.0  ;;  %v1822_v56 = vpop.f32.mrb[43].mxu0  ;;  %v2132_v61 = vmax.f32 %v1901_v57, 0.0  ;;  %v1903_v63 = vpop.f32.mrb[43].mxu1 }
 0x195   :  { %v2131_v60 = vmax.f32 %v1822_v56, 0.0  ;;  %v2133_v1 = vmax.f32 %v1903_v63, 0.0 }
 0x196   :  { %v2259_v0 = vpack.c.bf16 %v2130_v54, %v2114_v62  ;;  %v2261_v4 = vpack.c.bf16 %v2132_v61, %v2116_v52 }
 0x197   :  { %v2260_v2 = vpack.c.bf16 %v2131_v60, %v2115_v59  ;;  %v2262_v50 = vpack.c.bf16 %v2133_v1, %v2117_v55 }
 0x199   :  { %2547 = vmatprep.subr.bf16.mxu0 %v2260_v2  ;;  %v1826_v6 = vpop.f32.mrb[44].mxu0  ;;  %2588 = vmatprep.subr.bf16.mxu1 %v2262_v50  ;;  %v1907_v10 = vpop.f32.mrb[44].mxu1 }
 0x19a   :  { %2548 = vmatpush1.bf16.msra.mxu0 %v2259_v0  ;;  %v2146_v7 = vmax.f32 %v1826_v6, 0.0  ;;  %v1828_v9 = vpop.f32.mrb[45].mxu0  ;;  %2589 = vmatpush1.bf16.msra.mxu1 %v2261_v4  ;;  %v2148_v15 = vmax.f32 %v1907_v10, 0.0  ;;  %v1909_v16 = vpop.f32.mrb[45].mxu1 }
 0x19b   :  { %v2147_v11 = vmax.f32 %v1828_v9, 0.0  ;;  %v1830_v12 = vpop.f32.mrb[46].mxu0  ;;  %v2149_v20 = vmax.f32 %v1909_v16, 0.0  ;;  %v1911_v22 = vpop.f32.mrb[46].mxu1 }
 0x19c   :  { %v2162_v17 = vmax.f32 %v1830_v12, 0.0  ;;  %v1832_v19 = vpop.f32.mrb[47].mxu0  ;;  %v2164_v24 = vmax.f32 %v1911_v22, 0.0  ;;  %v1913_v25 = vpop.f32.mrb[47].mxu1 }
 0x19d   :  { %v2163_v23 = vmax.f32 %v1832_v19, 0.0  ;;  %v2165_v28 = vmax.f32 %v1913_v25, 0.0 }
 0x19e   :  { %v2275_v27 = vpack.c.bf16 %v2162_v17, %v2146_v7  ;;  %v2277_v3 = vpack.c.bf16 %v2164_v24, %v2148_v15 }
 0x19f   :  { %v2276_v29 = vpack.c.bf16 %v2163_v23, %v2147_v11  ;;  %v2278_v30 = vpack.c.bf16 %v2165_v28, %v2149_v20 }
 0x1a1   :  { %v1836_v31 = vpop.f32.mrb[48].mxu0  ;;  %2549 = vmatprep.subr.bf16.mxu0 %v2276_v29  ;;  %v1917_v34 = vpop.f32.mrb[48].mxu1  ;;  %2590 = vmatprep.subr.bf16.mxu1 %v2278_v30 }
 0x1a2   :  { %v2178_v33 = vmax.f32 %v1836_v31, 0.0  ;;  %v1838_v58 = vpop.f32.mrb[49].mxu0  ;;  %2550 = vmatpush1.bf16.msra.mxu0 %v2275_v27  ;;  %v2180_v14 = vmax.f32 %v1917_v34, 0.0  ;;  %v1919_v38 = vpop.f32.mrb[49].mxu1  ;;  %2591 = vmatpush1.bf16.msra.mxu1 %v2277_v3 }
 0x1a3   :  { %v2179_v35 = vmax.f32 %v1838_v58, 0.0  ;;  %v1840_v36 = vpop.f32.mrb[50].mxu0  ;;  %v2181_v42 = vmax.f32 %v1919_v38, 0.0  ;;  %v1921_v43 = vpop.f32.mrb[50].mxu1 }
 0x1a4   :  { %v2194_v39 = vmax.f32 %v1840_v36, 0.0  ;;  %v1842_v40 = vpop.f32.mrb[51].mxu0  ;;  %v2196_v5 = vmax.f32 %v1921_v43, 0.0  ;;  %v1923_v18 = vpop.f32.mrb[51].mxu1 }
 0x1a5   :  { %v2195_v48 = vmax.f32 %v1842_v40, 0.0  ;;  %v2197_v37 = vmax.f32 %v1923_v18, 0.0 }
 0x1a6   :  { %v2291_v26 = vpack.c.bf16 %v2194_v39, %v2178_v33  ;;  %v2293_v44 = vpack.c.bf16 %v2196_v5, %v2180_v14 }
 0x1a7   :  { %v2292_v21 = vpack.c.bf16 %v2195_v48, %v2179_v35  ;;  %v2294_v45 = vpack.c.bf16 %v2197_v37, %v2181_v42 }
 0x1a9   :  { %v1846_v46 = vpop.f32.mrb[52].mxu0  ;;  %2551 = vmatprep.subr.bf16.mxu0 %v2292_v21  ;;  %v1927_v62 = vpop.f32.mrb[52].mxu1  ;;  %2592 = vmatprep.subr.bf16.mxu1 %v2294_v45 }
 0x1aa   :  { %v2210_v47 = vmax.f32 %v1846_v46, 0.0  ;;  %v1848_v49 = vpop.f32.mrb[53].mxu0  ;;  %2552 = vmatpush1.bf16.msra.mxu0 %v2291_v26  ;;  %v2212_v52 = vmax.f32 %v1927_v62, 0.0  ;;  %v1929_v8 = vpop.f32.mrb[53].mxu1  ;;  %2593 = vmatpush1.bf16.msra.mxu1 %v2293_v44 }
 0x1ab   :  { %v2211_v51 = vmax.f32 %v1848_v49, 0.0  ;;  %v1850_v32 = vpop.f32.mrb[54].mxu0  ;;  %v2213_v55 = vmax.f32 %v1929_v8, 0.0  ;;  %v1931_v56 = vpop.f32.mrb[54].mxu1 }
 0x1ac   :  { %v2226_v53 = vmax.f32 %v1850_v32, 0.0  ;;  %v1852_v54 = vpop.f32.mrb[55].mxu0  ;;  %v2228_v59 = vmax.f32 %v1931_v56, 0.0  ;;  %v1933_v60 = vpop.f32.mrb[55].mxu1 }
 0x1ad   :  { %v2227_v57 = vmax.f32 %v1852_v54, 0.0  ;;  %v2229_v63 = vmax.f32 %v1933_v60, 0.0 }
 0x1ae   :  { %v2307_v61 = vpack.c.bf16 %v2226_v53, %v2210_v47  ;;  %v2309_v1 = vpack.c.bf16 %v2228_v59, %v2212_v52 }
 0x1af   :  { %v2308_v0 = vpack.c.bf16 %v2227_v57, %v2211_v51  ;;  %v2310_v2 = vpack.c.bf16 %v2229_v63, %v2213_v55 }
 0x1b1   :  { %v1856_v4 = vpop.f32.mrb[56].mxu0  ;;  %2553 = vmatprep.subr.bf16.mxu0 %v2308_v0  ;;  %v1937_v7 = vpop.f32.mrb[56].mxu1  ;;  %2594 = vmatprep.subr.bf16.mxu1 %v2310_v2 }
 0x1b2   :  { %v2242_v50 = vmax.f32 %v1856_v4, 0.0  ;;  %v1858_v6 = vpop.f32.mrb[57].mxu0  ;;  %2554 = vmatpush1.bf16.msra.mxu0 %v2307_v61  ;;  %v2244_v11 = vmax.f32 %v1937_v7, 0.0  ;;  %v1939_v12 = vpop.f32.mrb[57].mxu1  ;;  %2595 = vmatpush1.bf16.msra.mxu1 %v2309_v1 }
 0x1b3   :  { %v2243_v9 = vmax.f32 %v1858_v6, 0.0  ;;  %v1860_v10 = vpop.f32.mrb[58].mxu0  ;;  %v2245_v17 = vmax.f32 %v1939_v12, 0.0  ;;  %v1941_v19 = vpop.f32.mrb[58].mxu1 }
 0x1b4   :  { %v2323_v15 = vpack.c.bf16 %v2242_v50, %v2242_v50  ;;  %v1861_v16 = vpop.f32.mrb[59].mxu0  ;;  %v2325_v22 = vpack.c.bf16 %v2244_v11, %v2244_v11  ;;  %v1942_v23 = vpop.f32.mrb[59].mxu1 }
 0x1b5   :  { %v2324_v20 = vpack.c.bf16 %v2243_v9, %v2243_v9  ;;  %v2326_v25 = vpack.c.bf16 %v2245_v17, %v2245_v17 }
 0x1b6   :  { %v2360_v24 = vsel %vm1409_vm1, %v2323_v15, 0  ;;  %v2366_v27 = vsel %vm1409_vm1, %v2325_v22, 0 }
 0x1b7   :  { %4285 = vmatprep.subr.msk.bf16.mxu0 %vm1409_vm1, %v2324_v20  ;;  %4287 = vmatprep.subr.msk.bf16.mxu1 %vm1409_vm1, %v2326_v25 }
 0x1b8   :  { %2556 = vmatpush1.bf16.msra.mxu0 %v2360_v24  ;;  %2597 = vmatpush1.bf16.msra.mxu1 %v2366_v27 }
 0x1bb   :  { %4286 = vmatmul.mubr.msk.bf16.vlgmr.msra.gmra.mrb[88].mxu0 %vm2331_vm2, %v4976_v13  ;;  %4288 = vmatmul.mubr.msk.bf16.vlgmr.msra.gmra.mrb[88].mxu1 %vm2331_vm2, %v4976_v13 }
 0x1bc   :  { %2661 = vmatprep.mubr.bf16.mxu0 %v4681_v41  ;;  %2702 = vmatprep.mubr.bf16.mxu1 %v4681_v41 }
 0x1c9   :  { %v1978_v28 = vpop.f32.mrb[60].mxu0  ;;  %v2059_v29 = vpop.f32.mrb[60].mxu1 }
 0x1ca   :  { %v1980_v3 = vpop.f32.mrb[61].mxu0  ;;  %v2120_v30 = vmax.f32 %v2059_v29, 0.0  ;;  %v2061_v31 = vpop.f32.mrb[61].mxu1  ;;  %v2118_v58 = vmax.f32 %v1978_v28, 0.0 }
 0x1cb   :  { %v1982_v33 = vpop.f32.mrb[62].mxu0  ;;  %v2121_v34 = vmax.f32 %v2061_v31, 0.0  ;;  %v2063_v36 = vpop.f32.mrb[62].mxu1  ;;  %v2119_v38 = vmax.f32 %v1980_v3, 0.0 }
 0x1cc   :  { %v2134_v35 = vmax.f32 %v1982_v33, 0.0  ;;  %v1984_v14 = vpop.f32.mrb[63].mxu0  ;;  %v2136_v39 = vmax.f32 %v2063_v36, 0.0  ;;  %v2065_v42 = vpop.f32.mrb[63].mxu1 }
 0x1cd   :  { %v2135_v40 = vmax.f32 %v1984_v14, 0.0  ;;  %v2137_v48 = vmax.f32 %v2065_v42, 0.0 }
 0x1ce   :  { %v2263_v43 = vpack.c.bf16 %v2134_v35, %v2118_v58  ;;  %v2265_v5 = vpack.c.bf16 %v2136_v39, %v2120_v30 }
 0x1cf   :  { %v2264_v18 = vpack.c.bf16 %v2135_v40, %v2119_v38  ;;  %v2266_v26 = vpack.c.bf16 %v2137_v48, %v2121_v34 }
 0x1d1   :  { %v1988_v37 = vpop.f32.mrb[64].mxu0  ;;  %2629 = vmatprep.subr.bf16.mxu0 %v2264_v18  ;;  %v2069_v21 = vpop.f32.mrb[64].mxu1  ;;  %2670 = vmatprep.subr.bf16.mxu1 %v2266_v26 }
 0x1d2   :  { %v1990_v44 = vpop.f32.mrb[65].mxu0  ;;  %2630 = vmatpush1.bf16.msra.mxu0 %v2263_v43  ;;  %v2152_v45 = vmax.f32 %v2069_v21, 0.0  ;;  %v2071_v46 = vpop.f32.mrb[65].mxu1  ;;  %2671 = vmatpush1.bf16.msra.mxu1 %v2265_v5  ;;  %v2150_v49 = vmax.f32 %v1988_v37, 0.0 }
 0x1d3   :  { %v1992_v47 = vpop.f32.mrb[66].mxu0  ;;  %v2153_v62 = vmax.f32 %v2071_v46, 0.0  ;;  %v2073_v32 = vpop.f32.mrb[66].mxu1  ;;  %v2151_v8 = vmax.f32 %v1990_v44, 0.0 }
 0x1d4   :  { %v2166_v51 = vmax.f32 %v1992_v47, 0.0  ;;  %v1994_v52 = vpop.f32.mrb[67].mxu0  ;;  %v2168_v53 = vmax.f32 %v2073_v32, 0.0  ;;  %v2075_v55 = vpop.f32.mrb[67].mxu1 }
 0x1d5   :  { %v2167_v54 = vmax.f32 %v1994_v52, 0.0  ;;  %v2169_v57 = vmax.f32 %v2075_v55, 0.0 }
 0x1d6   :  { %v2279_v56 = vpack.c.bf16 %v2166_v51, %v2150_v49  ;;  %v2281_v59 = vpack.c.bf16 %v2168_v53, %v2152_v45 }
 0x1d7   :  { %v2280_v60 = vpack.c.bf16 %v2167_v54, %v2151_v8  ;;  %v2282_v61 = vpack.c.bf16 %v2169_v57, %v2153_v62  ;;  %v4512_v57 = vld [vmem:[%s5429_s3] ss:$16 sps:$4 sm:$0xff]  }
 0x1d9   :  { %v1998_v63 = vpop.f32.mrb[68].mxu0  ;;  %2631 = vmatprep.subr.bf16.mxu0 %v2280_v60  ;;  %v2079_v0 = vpop.f32.mrb[68].mxu1  ;;  %2672 = vmatprep.subr.bf16.mxu1 %v2282_v61  ;;  %v4515_v60 = vld [vmem:[%s5429_s3 + $0x8] ss:$16 sps:$4 sm:$0xff]   ;;  %v4523_v61 = vld [vmem:[%s5429_s3 + $0x2c] ss:$16 sps:$4 sm:$0xff]  }
 0x1da   :  { %v2000_v1 = vpop.f32.mrb[69].mxu0  ;;  %2632 = vmatpush1.bf16.msra.mxu0 %v2279_v56  ;;  %v2184_v2 = vmax.f32 %v2079_v0, 0.0  ;;  %v2081_v4 = vpop.f32.mrb[69].mxu1  ;;  %2673 = vmatpush1.bf16.msra.mxu1 %v2281_v59  ;;  %v2182_v6 = vmax.f32 %v1998_v63, 0.0  ;;  %v4514_v59 = vld [vmem:[%s5429_s3 + $0x4] ss:$16 sps:$4 sm:$0xff]  }
 0x1db   :  { %v2002_v50 = vpop.f32.mrb[70].mxu0  ;;  %v2185_v7 = vmax.f32 %v2081_v4, 0.0  ;;  %v2083_v10 = vpop.f32.mrb[70].mxu1  ;;  %v2183_v12 = vmax.f32 %v2000_v1, 0.0  ;;  %v4518_v63 = vld [vmem:[%s5429_s3 + $0x20] ss:$16 sps:$4 sm:$0xff]  }
 0x1dc   :  { %v2198_v9 = vmax.f32 %v2002_v50, 0.0  ;;  %v2004_v11 = vpop.f32.mrb[71].mxu0  ;;  %v2200_v15 = vmax.f32 %v2083_v10, 0.0  ;;  %v2085_v17 = vpop.f32.mrb[71].mxu1  ;;  %v4521_v0 = vld [vmem:[%s5429_s3 + $0x28] ss:$16 sps:$4 sm:$0xff]  }
 0x1dd   :  { %v2199_v16 = vmax.f32 %v2004_v11, 0.0  ;;  %v2201_v20 = vmax.f32 %v2085_v17, 0.0  ;;  %v4526_v1 = vld [vmem:[%s5429_s3 + $0x44] ss:$16 sps:$4 sm:$0xff]   ;;  %v4524_v4 = vld [vmem:[%s5429_s3 + $0x40] ss:$16 sps:$4 sm:$0xff]  }
 0x1de   :  { %v2295_v19 = vpack.c.bf16 %v2198_v9, %v2182_v6  ;;  %v2297_v22 = vpack.c.bf16 %v2200_v15, %v2184_v2  ;;  %v4529_v2 = vld [vmem:[%s5429_s3 + $0x4c] ss:$16 sps:$4 sm:$0xff]   ;;  %v4527_v50 = vld [vmem:[%s5429_s3 + $0x48] ss:$16 sps:$4 sm:$0xff]   ;;  %v4532_v6 = vld [vmem:[%s5429_s3 + $0x64] ss:$16 sps:$4 sm:$0xff]  }
 0x1df   :  { %v2296_v23 = vpack.c.bf16 %v2199_v16, %v2183_v12  ;;  %v2298_v24 = vpack.c.bf16 %v2201_v20, %v2185_v7  ;;  %v4535_v9 = vld [vmem:[%s5429_s3 + $0x6c] ss:$16 sps:$4 sm:$0xff]   ;;  %v4530_v17 = vld [vmem:[%s5429_s3 + $0x60] ss:$16 sps:$4 sm:$0xff]  }
 0x1e1   :  { %v2008_v25 = vpop.f32.mrb[72].mxu0  ;;  %2633 = vmatprep.subr.bf16.mxu0 %v2296_v23  ;;  %v2089_v27 = vpop.f32.mrb[72].mxu1  ;;  %2674 = vmatprep.subr.bf16.mxu1 %v2298_v24  ;;  %v4538_v23 = vld [vmem:[%s5429_s3 + $0x84] ss:$16 sps:$4 sm:$0xff]  }
 0x1e2   :  { %v2010_v28 = vpop.f32.mrb[73].mxu0  ;;  %2634 = vmatpush1.bf16.msra.mxu0 %v2295_v19  ;;  %v2216_v29 = vmax.f32 %v2089_v27, 0.0  ;;  %v2091_v3 = vpop.f32.mrb[73].mxu1  ;;  %2675 = vmatpush1.bf16.msra.mxu1 %v2297_v22  ;;  %v2214_v31 = vmax.f32 %v2008_v25, 0.0  ;;  %v4533_v22 = vld [vmem:[%s5429_s3 + $0x68] ss:$16 sps:$4 sm:$0xff]  }
 0x1e3   :  { %v2012_v30 = vpop.f32.mrb[74].mxu0  ;;  %v2217_v33 = vmax.f32 %v2091_v3, 0.0  ;;  %v2093_v34 = vpop.f32.mrb[74].mxu1  ;;  %v2215_v36 = vmax.f32 %v2010_v28, 0.0  ;;  %v4541_v27 = vld [vmem:[%s5429_s3 + $0x8c] ss:$16 sps:$4 sm:$0xff]  }
 0x1e4   :  { %v2230_v58 = vmax.f32 %v2012_v30, 0.0  ;;  %v2014_v35 = vpop.f32.mrb[75].mxu0  ;;  %v2232_v14 = vmax.f32 %v2093_v34, 0.0  ;;  %v2095_v39 = vpop.f32.mrb[75].mxu1  ;;  %v4539_v3 = vld [vmem:[%s5429_s3 + $0x88] ss:$16 sps:$4 sm:$0xff]  }
 0x1e5   :  { %v2231_v38 = vmax.f32 %v2014_v35, 0.0  ;;  %v2233_v42 = vmax.f32 %v2095_v39, 0.0  ;;  %v4544_v30 = vld [vmem:[%s5429_s3 + $0xa4] ss:$16 sps:$4 sm:$0xff]   ;;  %v4553_v35 = vld [vmem:[%s5429_s3 + $0xcc] ss:$16 sps:$4 sm:$0xff]  }
 0x1e6   :  { %v2311_v40 = vpack.c.bf16 %v2230_v58, %v2214_v31  ;;  %v2313_v43 = vpack.c.bf16 %v2232_v14, %v2216_v29  ;;  %v4536_v29 = vld [vmem:[%s5429_s3 + $0x80] ss:$16 sps:$4 sm:$0xff]   ;;  %v4547_v31 = vld [vmem:[%s5429_s3 + $0xac] ss:$16 sps:$4 sm:$0xff]   ;;  %v4545_v58 = vld [vmem:[%s5429_s3 + $0xa8] ss:$16 sps:$4 sm:$0xff]  }
 0x1e7   :  { %v2312_v48 = vpack.c.bf16 %v2231_v38, %v2215_v36  ;;  %v2314_v5 = vpack.c.bf16 %v2233_v42, %v2217_v33  ;;  %v4542_v33 = vld [vmem:[%s5429_s3 + $0xa0] ss:$16 sps:$4 sm:$0xff]   ;;  %v4550_v34 = vld [vmem:[%s5429_s3 + $0xc4] ss:$16 sps:$4 sm:$0xff]   ;;  %v4551_v14 = vld [vmem:[%s5429_s3 + $0xc8] ss:$16 sps:$4 sm:$0xff]  }
 0x1e8   :  { %v4548_v36 = vld [vmem:[%s5429_s3 + $0xc0] ss:$16 sps:$4 sm:$0xff]   ;;  %v4556_v38 = vld [vmem:[%s5429_s3 + $0xe4] ss:$16 sps:$4 sm:$0xff]   ;;  %v4559_v39 = vld [vmem:[%s5429_s3 + $0xec] ss:$16 sps:$4 sm:$0xff]  }
 0x1e9   :  { %v2018_v18 = vpop.f32.mrb[76].mxu0  ;;  %2635 = vmatprep.subr.bf16.mxu0 %v2312_v48  ;;  %2676 = vmatprep.subr.bf16.mxu1 %v2314_v5  ;;  %v2099_v21 = vpop.f32.mrb[76].mxu1  ;;  %v4557_v42 = vld [vmem:[%s5429_s3 + $0xe8] ss:$16 sps:$4 sm:$0xff]  }
 0x1ea   :  { %v2246_v26 = vmax.f32 %v2018_v18, 0.0  ;;  %v2020_v37 = vpop.f32.mrb[77].mxu0  ;;  %2636 = vmatpush1.bf16.msra.mxu0 %v2311_v40  ;;  %v2248_v45 = vmax.f32 %v2099_v21, 0.0  ;;  %2677 = vmatpush1.bf16.msra.mxu1 %v2313_v43  ;;  %v2101_v47 = vpop.f32.mrb[77].mxu1  ;;  %v4554_v40 = vld [vmem:[%s5429_s3 + $0xe0] ss:$16 sps:$4 sm:$0xff]  }
 0x1eb   :  { %v2247_v44 = vmax.f32 %v2020_v37, 0.0  ;;  %v2022_v46 = vpop.f32.mrb[78].mxu0  ;;  %v2249_v62 = vmax.f32 %v2101_v47, 0.0  ;;  %v2103_v32 = vpop.f32.mrb[78].mxu1 }
 0x1ec   :  { %v2327_v49 = vpack.c.bf16 %v2246_v26, %v2246_v26  ;;  %v2023_v51 = vpop.f32.mrb[79].mxu0  ;;  %v2329_v8 = vpack.c.bf16 %v2248_v45, %v2248_v45  ;;  %v2104_v53 = vpop.f32.mrb[79].mxu1 }
 0x1ed   :  { %v2328_v52 = vpack.c.bf16 %v2247_v44, %v2247_v44  ;;  %v2330_v55 = vpack.c.bf16 %v2249_v62, %v2249_v62 }
 0x1ee   :  { %v2372_v54 = vsel %vm1409_vm1, %v2327_v49, 0  ;;  %v2378_v56 = vsel %vm1409_vm1, %v2329_v8, 0 }
 0x1ef   :  { %4289 = vmatprep.subr.msk.bf16.mxu0 %vm1409_vm1, %v2328_v52  ;;  %4291 = vmatprep.subr.msk.bf16.mxu1 %vm1409_vm1, %v2330_v55 }
 0x1f0   :  { %2638 = vmatpush1.bf16.msra.mxu0 %v2372_v54  ;;  %2679 = vmatpush1.bf16.msra.mxu1 %v2378_v56 }
 0x1f1   :  { %2927 = vmatprep.subr.bf16.mxu0 %v4514_v59 }
 0x1f3   :  { %4290 = vmatmul.mubr.msk.bf16.vlgmr.msra.gmra.mrb[92].mxu0 %vm2331_vm2, %v4976_v13  ;;  %4292 = vmatmul.mubr.msk.bf16.vlgmr.msra.gmra.mrb[92].mxu1 %vm2331_vm2, %v4976_v13  ;;  %v4517_v13 = vld [vmem:[%s5429_s3 + $0xc] ss:$16 sps:$4 sm:$0xff]  }
 0x1f4   :  { %2959 = vmatprep.mubr.bf16.mxu0 %v4681_v41  ;;  %3000 = vmatprep.mubr.bf16.mxu1 %v4681_v41  ;;  %v4520_v41 = vld [vmem:[%s5429_s3 + $0x24] ss:$16 sps:$4 sm:$0xff]  }
 0x1f5   :  { %2968 = vmatprep.subr.bf16.mxu1 %v4517_v13  ;;  %2928 = vmatpush1.bf16.msra.mxu0 %v4512_v57 }
 0x1f6   :  { %2969 = vmatpush1.bf16.msra.mxu1 %v4515_v60  ;;  %2929 = vmatprep.subr.bf16.mxu0 %v4520_v41 }
 0x1f7   :  { %2970 = vmatprep.subr.bf16.mxu1 %v4523_v61 }
 0x1f9   :  { %2930 = vmatpush1.bf16.msra.mxu0 %v4518_v63 }
 0x1fa   :  { %2971 = vmatpush1.bf16.msra.mxu1 %v4521_v0  ;;  %2931 = vmatprep.subr.bf16.mxu0 %v4526_v1 }
 0x1fb   :  { %2972 = vmatprep.subr.bf16.mxu1 %v4529_v2 }
 0x1fd   :  { %2932 = vmatpush1.bf16.msra.mxu0 %v4524_v4 }
 0x1fe   :  { %2973 = vmatpush1.bf16.msra.mxu1 %v4527_v50  ;;  %2933 = vmatprep.subr.bf16.mxu0 %v4532_v6 }
 0x1ff   :  { %2974 = vmatprep.subr.bf16.mxu1 %v4535_v9 }
 0x201   :  { %2934 = vmatpush1.bf16.msra.mxu0 %v4530_v17  ;;  %v4562_v17 = vld [vmem:[%s5432_s6] sm:$0xff]  }
 0x202   :  { %2975 = vmatpush1.bf16.msra.mxu1 %v4533_v22  ;;  %2935 = vmatprep.subr.bf16.mxu0 %v4538_v23  ;;  %v4565_v22 = vld [vmem:[%s5432_s6 + $0xc8] sm:$0xff]  }
 0x203   :  { %2976 = vmatprep.subr.bf16.mxu1 %v4541_v27  ;;  %v4566_v23 = vld [vmem:[%s5432_s6 + $0x8] sm:$0xff]   ;;  %v4569_v27 = vld [vmem:[%s5432_s6 + $0xd0] sm:$0xff]  }
 0x205   :  { %2936 = vmatpush1.bf16.msra.mxu0 %v4536_v29  ;;  %v4571_v29 = vld [vmem:[%s5432_s6 + $0x90] sm:$0xff]  }
 0x206   :  { %2977 = vmatpush1.bf16.msra.mxu1 %v4539_v3  ;;  %2937 = vmatprep.subr.bf16.mxu0 %v4544_v30  ;;  %v4572_v3 = vld [vmem:[%s5432_s6 + $0x58] sm:$0xff]  }
 0x207   :  { %2978 = vmatprep.subr.bf16.mxu1 %v4547_v31  ;;  %v4573_v30 = vld [vmem:[%s5432_s6 + $0xd8] sm:$0xff]  }
 0x208   :  { %v4574_v31 = vld [vmem:[%s5432_s6 + $0x18] sm:$0xff]  }
 0x209   :  { %2938 = vmatpush1.bf16.msra.mxu0 %v4542_v33  ;;  %v4575_v33 = vld [vmem:[%s5432_s6 + $0x98] sm:$0xff]  }
 0x20a   :  { %2979 = vmatpush1.bf16.msra.mxu1 %v4545_v58  ;;  %2939 = vmatprep.subr.bf16.mxu0 %v4550_v34  ;;  %v4576_v58 = vld [vmem:[%s5432_s6 + $0x60] sm:$0xff]  }
 0x20b   :  { %2980 = vmatprep.subr.bf16.mxu1 %v4553_v35  ;;  %v4577_v34 = vld [vmem:[%s5432_s6 + $0xe0] sm:$0xff]  }
 0x20c   :  { %v4578_v35 = vld [vmem:[%s5432_s6 + $0x20] sm:$0xff]  }
 0x20d   :  { %2940 = vmatpush1.bf16.msra.mxu0 %v4548_v36  ;;  %v4579_v36 = vld [vmem:[%s5432_s6 + $0xa0] sm:$0xff]  }
 0x20e   :  { %2981 = vmatpush1.bf16.msra.mxu1 %v4551_v14  ;;  %2941 = vmatprep.subr.bf16.mxu0 %v4556_v38  ;;  %v4580_v14 = vld [vmem:[%s5432_s6 + $0x68] sm:$0xff]  }
 0x20f   :  { %2982 = vmatprep.subr.bf16.mxu1 %v4559_v39  ;;  %v4581_v38 = vld [vmem:[%s5432_s6 + $0xe8] sm:$0xff]  }
 0x210   :  { %v4582_v39 = vld [vmem:[%s5432_s6 + $0x28] sm:$0xff]  }
 0x211   :  { %2942 = vmatpush1.bf16.msra.mxu0 %v4554_v40  ;;  %v4583_v40 = vld [vmem:[%s5432_s6 + $0xa8] sm:$0xff]  }
 0x212   :  { %2983 = vmatpush1.bf16.msra.mxu1 %v4557_v42  ;;  %v4584_v42 = vld [vmem:[%s5432_s6 + $0x70] sm:$0xff]  }
 0x21e   :  { %v2417_v7 = vpop.f32.mrb[80].mxu0  ;;  %v2458_v11 = vpop.f32.mrb[80].mxu1 }
 0x21f   :  { %v2419_v10 = vpop.f32.mrb[81].mxu0  ;;  %v2460_v16 = vpop.f32.mrb[81].mxu1 }
 0x220   :  { %v2711_v12 = vadd.f32 %v2419_v10, %v2417_v7  ;;  %v2421_v15 = vpop.f32.mrb[82].mxu0  ;;  %v2462_v20 = vpop.f32.mrb[82].mxu1 }
 0x221   :  { %v2422_v19 = vpop.f32.mrb[83].mxu0  ;;  %v2463_v25 = vpop.f32.mrb[83].mxu1  ;;  %v4560_v15 = vld [vmem:[%s5432_s6 + $0x40] sm:$0xff]   ;;  %v4564_v20 = vld [vmem:[%s5432_s6 + $0x48] sm:$0xff]  }
 0x222   :  { %v2712_v24 = vadd.f32 %v2711_v12, %v2458_v11  ;;  %v4563_v19 = vld [vmem:[%s5432_s6 + $0x80] sm:$0xff]   ;;  %4390 = vmatprep.subr.bf16.mxu0 %v4560_v15  ;;  %v4568_v25 = vld [vmem:[%s5432_s6 + $0x50] sm:$0xff]  }
 0x224   :  { %v2713_v28 = vadd.f32 %v2712_v24, %v2460_v16  ;;  %v4561_v16 = vld [vmem:[%s5432_s6 + $0xc0] sm:$0xff]   ;;  %v4567_v24 = vld [vmem:[%s5432_s6 + $0x88] sm:$0xff]  }
 0x225   :  { %4412 = vmatprep.subr.bf16.mxu1 %v4561_v16 }
 0x256   :  { %v2499_v43 = vpop.f32.mrb[84].mxu0  ;;  %v2540_v18 = vpop.f32.mrb[84].mxu1 }
 0x257   :  { %v2714_v48 = vadd.f32 %v2713_v28, %v2499_v43  ;;  %v2501_v5 = vpop.f32.mrb[85].mxu0  ;;  %v2542_v37 = vpop.f32.mrb[85].mxu1  ;;  %v4570_v28 = vld [vmem:[%s5432_s6 + $0x10] sm:$0xff]  }
 0x258   :  { %v2503_v26 = vpop.f32.mrb[86].mxu0  ;;  %v2544_v45 = vpop.f32.mrb[86].mxu1  ;;  %v4585_v43 = vld [vmem:[%s5432_s6 + $0xf0] sm:$0xff]  }
 0x259   :  { %v2715_v21 = vadd.f32 %v2714_v48, %v2501_v5  ;;  %v2504_v44 = vpop.f32.mrb[87].mxu0  ;;  %v2545_v46 = vpop.f32.mrb[87].mxu1  ;;  %v4586_v48 = vld [vmem:[%s5432_s6 + $0x30] sm:$0xff]   ;;  %v4591_v45 = vld [vmem:[%s5432_s6 + $0xb8] sm:$0xff]  }
 0x25a   :  { %v4587_v5 = vld [vmem:[%s5432_s6 + $0xb0] sm:$0xff]   ;;  %v4590_v44 = vld [vmem:[%s5432_s6 + $0x38] sm:$0xff]   ;;  %v4592_v46 = vld [vmem:[%s5432_s6 + $0x40] sm:$0xff]  }
 0x25b   :  { %v2716_v47 = vadd.f32 %v2715_v21, %v2540_v18  ;;  %v4589_v21 = vld [vmem:[%s5432_s6 + $0xf8] sm:$0xff]  }
 0x25d   :  { %v2717_v49 = vadd.f32 %v2716_v47, %v2542_v37  ;;  %v4588_v37 = vld [vmem:[%s5432_s6 + $0x78] sm:$0xff]   ;;  %v4593_v47 = vld [vmem:[%s5432_s6 + $0xc0] sm:$0xff]  }
 0x28e   :  { %v2581_v62 = vpop.f32.mrb[88].mxu0  ;;  %v2622_v52 = vpop.f32.mrb[88].mxu1 }
 0x28f   :  { %v2718_v51 = vadd.f32 %v2717_v49, %v2581_v62  ;;  %v2583_v32 = vpop.f32.mrb[89].mxu0  ;;  %v2624_v8 = vpop.f32.mrb[89].mxu1 }
 0x290   :  { %v2585_v53 = vpop.f32.mrb[90].mxu0  ;;  %v2626_v56 = vpop.f32.mrb[90].mxu1 }
 0x291   :  { %v2719_v54 = vadd.f32 %v2718_v51, %v2583_v32  ;;  %v2586_v55 = vpop.f32.mrb[91].mxu0  ;;  %v2627_v57 = vpop.f32.mrb[91].mxu1 }
 0x293   :  { %v2720_v59 = vadd.f32 %v2719_v54, %v2622_v52 }
 0x295   :  { %v2721_v60 = vadd.f32 %v2720_v59, %v2624_v8 }
 0x2c6   :  { %v2663_v13 = vpop.f32.mrb[92].mxu0  ;;  %v2704_v63 = vpop.f32.mrb[92].mxu1 }
 0x2c7   :  { %v2722_v41 = vadd.f32 %v2721_v60, %v2663_v13  ;;  %v2665_v61 = vpop.f32.mrb[93].mxu0  ;;  %v2706_v1 = vpop.f32.mrb[93].mxu1 }
 0x2c8   :  { %v2667_v0 = vpop.f32.mrb[94].mxu0  ;;  %v2708_v50 = vpop.f32.mrb[94].mxu1 }
 0x2c9   :  { %v2723_v2 = vadd.f32 %v2722_v41, %v2665_v61  ;;  %v2668_v4 = vpop.f32.mrb[95].mxu0  ;;  %v2709_v6 = vpop.f32.mrb[95].mxu1 }
 0x2cb   :  { %v2724_v7 = vadd.f32 %v2723_v2, %v2704_v63 }
 0x2cd   :  { %v5110_v9 = vadd.f32 %v2724_v7, %v2706_v1 }
 0x2cf   :  { %v2766_v10 = vpack.c.bf16 %v5110_v9, %v5110_v9  ;;  %v2726_v11 = vmul.f32 %v5110_v9, %v5110_v9 }
 0x2d1   :  { %2960 = vmatmul.mubr.bf16.vlgmr.msra.gmra.mrb[96].mxu0 %v2766_v10  ;;  %3001 = vmatmul.mubr.bf16.vlgmr.msra.gmra.mrb[96].mxu1 %v2766_v10  ;;  %v2727_v12 = vsel %vm1409_vm1, %v2726_v11, 0.0 }
 0x2d2   :  { %2728 = vadd.xlane.f32.xlu0 %v2727_v12  ;;  %4391 = vmatpush3.bf16.msra.mxu0 %v4562_v17 }
 0x2d3   :  { %4413 = vmatpush3.bf16.msra.mxu1 %v4563_v19  ;;  %4392 = vmatprep.subr.bf16.mxu0 %v4564_v20 }
 0x2d4   :  { %4414 = vmatprep.subr.bf16.mxu1 %v4565_v22 }
 0x2d6   :  { %4393 = vmatpush3.bf16.msra.mxu0 %v4566_v23 }
 0x2d7   :  { %4415 = vmatpush3.bf16.msra.mxu1 %v4567_v24  ;;  %4394 = vmatprep.subr.bf16.mxu0 %v4568_v25 }
 0x2d8   :  { %4416 = vmatprep.subr.bf16.mxu1 %v4569_v27 }
 0x2da   :  { %4395 = vmatpush3.bf16.msra.mxu0 %v4570_v28 }
 0x2db   :  { %4417 = vmatpush3.bf16.msra.mxu1 %v4571_v29  ;;  %4396 = vmatprep.subr.bf16.mxu0 %v4572_v3 }
 0x2dc   :  { %4418 = vmatprep.subr.bf16.mxu1 %v4573_v30 }
 0x2de   :  { %4397 = vmatpush3.bf16.msra.mxu0 %v4574_v31 }
 0x2df   :  { %4419 = vmatpush3.bf16.msra.mxu1 %v4575_v33  ;;  %4398 = vmatprep.subr.bf16.mxu0 %v4576_v58 }
 0x2e0   :  { %4420 = vmatprep.subr.bf16.mxu1 %v4577_v34 }
 0x2e2   :  { %4399 = vmatpush3.bf16.msra.mxu0 %v4578_v35 }
 0x2e3   :  { %4421 = vmatpush3.bf16.msra.mxu1 %v4579_v36  ;;  %4400 = vmatprep.subr.bf16.mxu0 %v4580_v14 }
 0x2e4   :  { %4422 = vmatprep.subr.bf16.mxu1 %v4581_v38 }
 0x2e6   :  { %4401 = vmatpush3.bf16.msra.mxu0 %v4582_v39 }
 0x2e7   :  { %4423 = vmatpush3.bf16.msra.mxu1 %v4583_v40  ;;  %4402 = vmatprep.subr.bf16.mxu0 %v4584_v42 }
 0x2e8   :  { %4424 = vmatprep.subr.bf16.mxu1 %v4585_v43 }
 0x2ea   :  { %4403 = vmatpush3.bf16.msra.mxu0 %v4586_v48 }
 0x2eb   :  { %4425 = vmatpush3.bf16.msra.mxu1 %v4587_v5  ;;  %4404 = vmatprep.subr.bf16.mxu0 %v4588_v37 }
 0x2ec   :  { %4426 = vmatprep.subr.bf16.mxu1 %v4589_v21 }
 0x2ee   :  { %4405 = vmatpush3.bf16.msra.mxu0 %v4590_v44 }
 0x2ef   :  { %4427 = vmatpush3.bf16.msra.mxu1 %v4591_v45  ;;  %4434 = vmatprep.subr.bf16.mxu0 %v4592_v46 }
 0x2f0   :  { %4456 = vmatprep.subr.bf16.mxu1 %v4593_v47 }
 0x35f   :  { %v2729_v18 = vpop.xlane.xlu0 %2728 }
 0x360   :  { %v2730_v26 = vmax.f32 %v2729_v18, 1e-24 }
 0x362   :  { %4624 = vrsqrt.f32 %v2730_v26 }
 0x36c   :  { %v4625_v49 = vpop.eup %4624 }
 0x36d   :  { %v2732_v62 = vmul.f32 %v4625_v49, %v5110_v9 }
 0x36f   :  { %2733 = vst [vmem:[%s5434_s8] sm:$0xf] %v2732_v62 }
 0x3a4   :  { %v5223_v51 = vpop.f32.mrb[96].mxu0  ;;  %v5225_v32 = vpop.f32.mrb[96].mxu1 }
 0x3a5   :  { %v3013_v52 = vsel %vm3012_vm3, %v5223_v51, 0.0  ;;  %v3510_v8 = vrot.slane %v5223_v51, 2  ;;  %v3027_v53 = vsel %vm3012_vm3, %v5225_v32, 0.0  ;;  %v3512_v54 = vrot.slane %v5225_v32, 2  ;;  %v5233_v55 = vpop.f32.mrb[97].mxu0  ;;  %v5235_v56 = vpop.f32.mrb[97].mxu1 }
 0x3a6   :  { %v3014_v57 = vrot.slane %v3013_v52, 4  ;;  %v3028_v59 = vrot.slane %v3027_v53, 4  ;;  %v3020_v60 = vsel %vm3012_vm3, %v5233_v55, 0.0  ;;  %v3511_v13 = vrot.slane %v5233_v55, 2  ;;  %v2965_v41 = vpop.f32.mrb[98].mxu0  ;;  %v3006_v61 = vpop.f32.mrb[98].mxu1 }
 0x3a7   :  { %v3518_v63 = vsel %vm3012_vm3, %v3510_v8, 0.0  ;;  %v3532_v0 = vsel %vm3012_vm3, %v3512_v54, 0.0  ;;  %v3021_v1 = vrot.slane %v3020_v60, 4  ;;  %v3034_v2 = vsel %vm3012_vm3, %v5235_v56, 0.0  ;;  %v2966_v4 = vpop.f32.mrb[99].mxu0  ;;  %v3007_v50 = vpop.f32.mrb[99].mxu1 }
 0x3a8   :  { %v3015_v6 = vadd.f32 %v3014_v57, %v3013_v52  ;;  %v3519_v7 = vrot.slane %v3518_v63, 4  ;;  %v3029_v9 = vadd.f32 %v3028_v59, %v3027_v53  ;;  %v3533_v10 = vrot.slane %v3532_v0, 4 }
 0x3a9   :  { %v3022_v11 = vadd.f32 %v3021_v1, %v3020_v60  ;;  %v3525_v12 = vsel %vm3012_vm3, %v3511_v13, 0.0  ;;  %v3035_v15 = vrot.slane %v3034_v2, 4  ;;  %v3513_v16 = vrot.slane %v5235_v56, 2 }
 0x3aa   :  { %v3016_v17 = vrot.slane %v3015_v6, 2  ;;  %v3520_v19 = vadd.f32 %v3519_v7, %v3518_v63  ;;  %v3030_v20 = vrot.slane %v3029_v9, 2  ;;  %v3534_v22 = vadd.f32 %v3533_v10, %v3532_v0 }
 0x3ab   :  { %v3023_v23 = vrot.slane %v3022_v11, 2  ;;  %v3526_v24 = vrot.slane %v3525_v12, 4  ;;  %v3036_v25 = vadd.f32 %v3035_v15, %v3034_v2  ;;  %v3539_v27 = vsel %vm3012_vm3, %v3513_v16, 0.0 }
 0x3ac   :  { %v3017_v28 = vadd.f32 %v3016_v17, %v3015_v6  ;;  %v3521_v29 = vrot.slane %v3520_v19, 2  ;;  %v3031_v3 = vadd.f32 %v3030_v20, %v3029_v9  ;;  %v3535_v30 = vrot.slane %v3534_v22, 2 }
 0x3ad   :  { %v3024_v31 = vadd.f32 %v3023_v23, %v3022_v11  ;;  %v3527_v33 = vadd.f32 %v3526_v24, %v3525_v12  ;;  %v3037_v58 = vrot.slane %v3036_v25, 2  ;;  %v3540_v34 = vrot.slane %v3539_v27, 4 }
 0x3ae   :  { %v3018_v35 = vrot.slane %v3017_v28, 1  ;;  %v3522_v36 = vadd.f32 %v3521_v29, %v3520_v19  ;;  %v3032_v14 = vrot.slane %v3031_v3, 1  ;;  %v3536_v38 = vadd.f32 %v3535_v30, %v3534_v22 }
 0x3af   :  { %v3025_v39 = vrot.slane %v3024_v31, 1  ;;  %v3528_v40 = vrot.slane %v3527_v33, 2  ;;  %v3038_v42 = vadd.f32 %v3037_v58, %v3036_v25  ;;  %v3541_v43 = vadd.f32 %v3540_v34, %v3539_v27 }
 0x3b0   :  { %v3019_v48 = vadd.f32 %v3018_v35, %v3017_v28  ;;  %v3523_v5 = vrot.slane %v3522_v36, 1  ;;  %v3033_v18 = vadd.f32 %v3032_v14, %v3031_v3  ;;  %v3537_v26 = vrot.slane %v3536_v38, 1 }
 0x3b1   :  { %v3026_v37 = vadd.f32 %v3025_v39, %v3024_v31  ;;  %v3529_v21 = vadd.f32 %v3528_v40, %v3527_v33  ;;  %v3039_v44 = vrot.slane %v3038_v42, 1  ;;  %v3542_v45 = vrot.slane %v3541_v43, 2 }
 0x3b2   :  { %v3042_v46 = vmul.f32 0.5, %v3019_v48  ;;  %v3524_v47 = vadd.f32 %v3523_v5, %v3522_v36  ;;  %v3044_v49 = vmul.f32 0.5, %v3033_v18  ;;  %v3538_v62 = vadd.f32 %v3537_v26, %v3536_v38 }
 0x3b3   :  { %v3043_v52 = vmul.f32 0.5, %v3026_v37  ;;  %v3530_v8 = vrot.slane %v3529_v21, 1  ;;  %v3040_v53 = vadd.f32 %v3039_v44, %v3038_v42  ;;  %v3543_v54 = vadd.f32 %v3542_v45, %v3541_v43 }
 0x3b4   :  { %v5248_v57 = vsub.f32 %v5223_v51, %v3042_v46  ;;  %v3546_v59 = vmul.f32 0.5, %v3524_v47  ;;  %v5251_v60 = vsub.f32 %v5225_v32, %v3044_v49  ;;  %v3548_v13 = vmul.f32 0.5, %v3538_v62 }
 0x3b5   :  { %v5254_v41 = vsub.f32 %v5233_v55, %v3043_v52  ;;  %v3531_v61 = vadd.f32 %v3530_v8, %v3529_v21  ;;  %v3045_v63 = vmul.f32 0.5, %v3040_v53  ;;  %v3544_v0 = vrot.slane %v3543_v54, 1 }
 0x3b6   :  { %v3050_v1 = vmul.f32 %v5248_v57, %v5248_v57  ;;  %v5259_v2 = vsub.f32 %v5223_v51, %v3546_v59  ;;  %v3052_v4 = vmul.f32 %v5251_v60, %v5251_v60  ;;  %v5264_v50 = vsub.f32 %v5225_v32, %v3548_v13 }
 0x3b7   :  { %v3051_v6 = vmul.f32 %v5254_v41, %v5254_v41  ;;  %v3547_v7 = vmul.f32 0.5, %v3531_v61  ;;  %v5269_v9 = vsub.f32 %v5235_v56, %v3045_v63  ;;  %v3545_v10 = vadd.f32 %v3544_v0, %v3543_v54 }
 0x3b8   :  { %v3054_v11 = vsel %vm3012_vm3, %v3050_v1, 0.0  ;;  %v3554_v51 = vmul.f32 %v5259_v2, %v5259_v2  ;;  %v3068_v12 = vsel %vm3012_vm3, %v3052_v4, 0.0  ;;  %v3556_v15 = vmul.f32 %v5264_v50, %v5264_v50 }
 0x3b9   :  { %v3055_v32 = vrot.slane %v3054_v11, 4  ;;  %v3069_v16 = vrot.slane %v3068_v12, 4  ;;  %v3061_v17 = vsel %vm3012_vm3, %v3051_v6, 0.0  ;;  %v5279_v19 = vsub.f32 %v5233_v55, %v3547_v7 }
 0x3ba   :  { %v3562_v20 = vrot.slane %v3554_v51, 2  ;;  %v3564_v22 = vrot.slane %v3556_v15, 2  ;;  %v3062_v23 = vrot.slane %v3061_v17, 4  ;;  %v3053_v24 = vmul.f32 %v5269_v9, %v5269_v9 }
 0x3bb   :  { %v3056_v25 = vadd.f32 %v3055_v32, %v3054_v11  ;;  %v3070_v27 = vadd.f32 %v3069_v16, %v3068_v12  ;;  %v3555_v28 = vmul.f32 %v5279_v19, %v5279_v19  ;;  %v3549_v29 = vmul.f32 0.5, %v3545_v10 }
 0x3bc   :  { %v3570_v3 = vsel %vm3012_vm3, %v3562_v20, 0.0  ;;  %v3063_v30 = vadd.f32 %v3062_v23, %v3061_v17  ;;  %v3075_v31 = vsel %vm3012_vm3, %v3053_v24, 0.0  ;;  %v3584_v34 = vsel %vm3012_vm3, %v3564_v22, 0.0 }
 0x3bd   :  { %v3057_v33 = vrot.slane %v3056_v25, 2  ;;  %v3571_v55 = vrot.slane %v3570_v3, 4  ;;  %v3071_v58 = vrot.slane %v3070_v27, 2  ;;  %v3563_v36 = vrot.slane %v3555_v28, 2 }
 0x3be   :  { %v3064_v35 = vrot.slane %v3063_v30, 2  ;;  %v3076_v14 = vrot.slane %v3075_v31, 4  ;;  %v5289_v38 = vsub.f32 %v5235_v56, %v3549_v29  ;;  %v3585_v21 = vrot.slane %v3584_v34, 4 }
 0x3bf   :  { %v3058_v39 = vadd.f32 %v3057_v33, %v3056_v25  ;;  %v3072_v40 = vadd.f32 %v3071_v58, %v3070_v27  ;;  %v3577_v43 = vsel %vm3012_vm3, %v3563_v36, 0.0  ;;  %v3572_v26 = vadd.f32 %v3571_v55, %v3570_v3  ;;  %v3009_v33 = vld [vmem:[%s5430_s4] sm:$0xf] }
 0x3c0   :  { %v3065_v42 = vadd.f32 %v3064_v35, %v3063_v30  ;;  %v3077_v48 = vadd.f32 %v3076_v14, %v3075_v31  ;;  %v3557_v5 = vmul.f32 %v5289_v38, %v5289_v38  ;;  %v3578_v45 = vrot.slane %v3577_v43, 4  ;;  %v3010_v14 = vld [vmem:[%s5431_s5] sm:$0xf] }
 0x3c1   :  { %v3059_v18 = vrot.slane %v3058_v39, 1  ;;  %v3073_v37 = vrot.slane %v3072_v40, 1  ;;  %v3099_v56 = vlaneseq  ;;  %v3573_v13 = vrot.slane %v3572_v26, 2 }
 0x3c2   :  { %v3066_v44 = vrot.slane %v3065_v42, 1  ;;  %v3078_v46 = vrot.slane %v3077_v48, 2  ;;  %v3565_v47 = vrot.slane %v3557_v5, 2  ;;  %v3579_v8 = vadd.f32 %v3578_v45, %v3577_v43 }
 0x3c3   :  { %v3060_v49 = vadd.f32 %v3059_v18, %v3058_v39  ;;  %v3074_v62 = vadd.f32 %v3073_v37, %v3072_v40  ;;  %v3586_v63 = vadd.f32 %v3585_v21, %v3584_v34  ;;  %v3100_v32 = vshrl.u32 %v3099_v56, 7 }
 0x3c4   :  { %v3067_v52 = vadd.f32 %v3066_v44, %v3065_v42  ;;  %v3079_v53 = vadd.f32 %v3078_v46, %v3077_v48  ;;  %v3591_v54 = vsel %vm3012_vm3, %v3565_v47, 0.0  ;;  %v3580_v1 = vrot.slane %v3579_v8, 2 }
 0x3c5   :  { %v3082_v59 = vmul.f32 0.5, %v3060_v49  ;;  %v3084_v61 = vmul.f32 0.5, %v3074_v62  ;;  %v3592_v6 = vrot.slane %v3591_v54, 4  ;;  %v3574_v16 = vadd.f32 %v3573_v13, %v3572_v26 }
 0x3c6   :  { %v3083_v0 = vmul.f32 0.5, %v3067_v52  ;;  %v3080_v4 = vrot.slane %v3079_v53, 1  ;;  %v3581_v51 = vadd.f32 %v3580_v1, %v3579_v8  ;;  %v3587_v17 = vrot.slane %v3586_v63, 2 }
 0x3c7   :  { %v3086_v7 = vadd.f32 1e-05, %v3082_v59  ;;  %v3088_v10 = vadd.f32 1e-05, %v3084_v61  ;;  %v3593_v15 = vadd.f32 %v3592_v6, %v3591_v54  ;;  %v3101_v29 = vsub.s32 0, %v3100_v32 }
 0x3c8   :  { %v3087_v11 = vadd.f32 1e-05, %v3083_v0  ;;  %v3081_v12 = vadd.f32 %v3080_v4, %v3079_v53  ;;  %v3582_v20 = vrot.slane %v3581_v51, 1  ;;  %v3588_v28 = vadd.f32 %v3587_v17, %v3586_v63 }
 0x3c9   :  { %4626 = vrsqrt.f32 %v3086_v7  ;;  %v3594_v23 = vrot.slane %v3593_v15, 2  ;;  %v3575_v3 = vrot.slane %v3574_v16, 1  ;;  %v3109_v55 = vsub.s32 2, %v3100_v32 }
 0x3ca   :  { %4628 = vrsqrt.f32 %v3088_v10  ;;  %v3085_v22 = vmul.f32 0.5, %v3081_v12  ;;  %v3583_v24 = vadd.f32 %v3582_v20, %v3581_v51  ;;  %v3105_v35 = vsub.s32 1, %v3100_v32 }
 0x3cb   :  { %4630 = vrsqrt.f32 %v3087_v11  ;;  %v3595_v27 = vadd.f32 %v3594_v23, %v3593_v15  ;;  %v3589_v36 = vrot.slane %v3588_v28, 1  ;;  %v5301_v39 = vrot.slane %v3009_v33, %v3101_v29 }
 0x3cc   :  { %v3089_v25 = vadd.f32 1e-05, %v3085_v22  ;;  %v3599_v30 = vmul.f32 0.5, %v3583_v24  ;;  %v3576_v40 = vadd.f32 %v3575_v3, %v3574_v16  ;;  %v5303_v48 = vrot.slane %v3009_v33, %v3109_v55  ;;  %v4597_v3 = vld [vmem:[%s5432_s6 + $0xc8] sm:$0xff]  }
 0x3cd   :  { %v3596_v31 = vrot.slane %v3595_v27, 1  ;;  %v3113_v5 = vsub.s32 3, %v3100_v32  ;;  %v3106_v21 = vrot.slane %v3009_v33, %v3105_v35  ;;  %v5306_v44 = vrot.slane %v3010_v14, %v3101_v29  ;;  %v4594_v32 = vld [vmem:[%s5432_s6] sm:$0xff]  }
 0x3ce   :  { %4632 = vrsqrt.f32 %v3089_v25  ;;  %v3603_v58 = vadd.f32 1e-05, %v3599_v30  ;;  %v3590_v47 = vadd.f32 %v3589_v36, %v3588_v28  ;;  %v3131_v49 = vrot.slane %v3010_v14, %v3105_v35  ;;  %v4598_v28 = vld [vmem:[%s5432_s6 + $0x8] sm:$0xff]  }
 0x3cf   :  { %v3597_v34 = vadd.f32 %v3596_v31, %v3595_v27  ;;  %v3598_v62 = vmul.f32 0.5, %v3576_v40  ;;  %v5312_v53 = vrot.slane %v3010_v14, %v3109_v55  ;;  %v3114_v54 = vrot.slane %v3009_v33, %v3113_v5  ;;  %v4595_v27 = vld [vmem:[%s5432_s6 + $0x80] sm:$0xff]   ;;  %v4600_v31 = vld [vmem:[%s5432_s6 + $0x50] sm:$0xff]   ;;  %v4604_v40 = vld [vmem:[%s5432_s6 + $0x58] sm:$0xff]  }
 0x3d0   :  { %4634 = vrsqrt.f32 %v3603_v58  ;;  %v3139_v61 = vrot.slane %v3010_v14, %v3113_v5  ;;  %v4599_v58 = vld [vmem:[%s5432_s6 + $0x88] sm:$0xff]   ;;  %v4601_v14 = vld [vmem:[%s5432_s6 + $0xd0] sm:$0xff]  }
 0x3d1   :  { %v3601_v42 = vmul.f32 0.5, %v3597_v34  ;;  %v3602_v63 = vadd.f32 1e-05, %v3598_v62  ;;  %v4602_v34 = vld [vmem:[%s5432_s6 + $0x10] sm:$0xff]   ;;  %v4609_v62 = vld [vmem:[%s5432_s6 + $0xe0] sm:$0xff]  }
 0x3d2   :  { %v4603_v5 = vld [vmem:[%s5432_s6 + $0x90] sm:$0xff]  }
 0x3d3   :  { %v4627_v43 = vpop.eup %4626  ;;  %v3605_v37 = vadd.f32 1e-05, %v3601_v42 }
 0x3d4   :  { %v4629_v18 = vpop.eup %4628  ;;  %v3094_v26 = vmul.f32 %v4627_v43, %v5248_v57 }
 0x3d5   :  { %v4631_v45 = vpop.eup %4630  ;;  %v3096_v46 = vmul.f32 %v4629_v18, %v5251_v60  ;;  %4636 = vrsqrt.f32 %v3605_v37  ;;  %v3600_v60 = vmul.f32 0.5, %v3590_v47  ;;  %v4606_v18 = vld [vmem:[%s5432_s6 + $0x18] sm:$0xff]  }
 0x3d6   :  { %v3119_v56 = vmul.f32 %v5301_v39, %v3094_v26  ;;  %v3095_v52 = vmul.f32 %v4631_v45, %v5254_v41  ;;  %4638 = vrsqrt.f32 %v3602_v63  ;;  %v4608_v45 = vld [vmem:[%s5432_s6 + $0x60] sm:$0xff]   ;;  %v4607_v47 = vld [vmem:[%s5432_s6 + $0x98] sm:$0xff]  }
 0x3d7   :  { %v3121_v8 = vmul.f32 %v5303_v48, %v3096_v46  ;;  %v3604_v51 = vadd.f32 1e-05, %v3600_v60 }
 0x3d8   :  { %v3120_v57 = vmul.f32 %v3106_v21, %v3095_v52  ;;  %v3144_v59 = vadd.f32 %v5306_v44, %v3119_v56  ;;  %v4633_v13 = vpop.eup %4632  ;;  %v4612_v52 = vld [vmem:[%s5432_s6 + $0x68] sm:$0xff]  }
 0x3d9   :  { %v3097_v0 = vmul.f32 %v4633_v13, %v5269_v9  ;;  %v3146_v6 = vadd.f32 %v5312_v53, %v3121_v8  ;;  %v4596_v9 = vld [vmem:[%s5432_s6 + $0x48] sm:$0xff]   ;;  %4640 = vrsqrt.f32 %v3604_v51  ;;  %v4611_v8 = vld [vmem:[%s5432_s6 + $0xa0] sm:$0xff]  }
 0x3da   :  { %v3145_v1 = vadd.f32 %v3131_v49, %v3120_v57  ;;  %v3148_v4 = vmax.f32 %v3144_v59, 0.0  ;;  %v4635_v41 = vpop.eup %4634  ;;  %v4613_v57 = vld [vmem:[%s5432_s6 + $0xe8] sm:$0xff]  }
 0x3db   :  { %v3122_v10 = vmul.f32 %v3114_v54, %v3097_v0  ;;  %v3611_v11 = vmul.f32 %v4635_v41, %v5279_v19  ;;  %v3150_v17 = vmax.f32 %v3146_v6, 0.0  ;;  %v4615_v13 = vld [vmem:[%s5432_s6 + $0xa8] sm:$0xff]   ;;  %v4619_v0 = vld [vmem:[%s5432_s6 + $0xb0] sm:$0xff]  }
 0x3dc   :  { %v3149_v7 = vmax.f32 %v3145_v1, 0.0  ;;  %v3216_v16 = vpack.c.bf16 %v3148_v4, %v3148_v4  ;;  %v4622_v1 = vld [vmem:[%s5432_s6 + $0x38] sm:$0xff]  }
 0x3dd   :  { %v3147_v15 = vadd.f32 %v3139_v61, %v3122_v10  ;;  %v3615_v20 = vmul.f32 %v3611_v11, %v3106_v21  ;;  %v3218_v29 = vpack.c.bf16 %v3150_v17, %v3150_v17  ;;  %v4605_v21 = vld [vmem:[%s5432_s6 + $0xd8] sm:$0xff]  }
 0x3de   :  { %v3217_v12 = vpack.c.bf16 %v3149_v7, %v3149_v7  ;;  %v4621_v4 = vld [vmem:[%s5432_s6 + $0xf8] sm:$0xff]  }
 0x3df   :  { %v4637_v22 = vpop.eup %4636  ;;  %v3151_v23 = vmax.f32 %v3147_v15, 0.0  ;;  %v3619_v24 = vadd.f32 %v3615_v20, %v3131_v49 }
 0x3e0   :  { %3450 = vmatprep.mubr.bf16.mxu0 %v3217_v12  ;;  %v3613_v19 = vmul.f32 %v4637_v22, %v5289_v38  ;;  %v4639_v42 = vpop.eup %4638  ;;  %v4325_v12 = vld [vmem:[%s5433_s7] ss:$0 sm:$0xff] }
 0x3e1   :  { %3451 = vmatmul.mubr.bf16.vlgmr.msra.gmra.mrb[100].mxu0 %v3216_v16  ;;  %v3219_v25 = vpack.c.bf16 %v3151_v23, %v3151_v23  ;;  %v3623_v38 = vmax.f32 %v3619_v24, 0.0  ;;  %v3610_v26 = vmul.f32 %v4639_v42, %v5259_v2  ;;  %v4610_v2 = vld [vmem:[%s5432_s6 + $0x20] sm:$0xff]  }
 0x3e2   :  { %4435 = vmatpush3.bf16.msra.mxu0 %v4594_v32  ;;  %v3617_v30 = vmul.f32 %v3613_v19, %v3114_v54  ;;  %v4616_v54 = vld [vmem:[%s5432_s6 + $0x70] sm:$0xff]  }
 0x3e3   :  { %4436 = vmatprep.subr.bf16.mxu0 %v4596_v9  ;;  %3490 = vmatprep.mubr.bf16.mxu1 %v3219_v25  ;;  %v3691_v33 = vpack.c.bf16 %v3623_v38, %v3623_v38  ;;  %v4641_v46 = vpop.eup %4640  ;;  %v3614_v49 = vmul.f32 %v3610_v26, %v5301_v39 }
 0x3e4   :  { %3491 = vmatmul.mubr.bf16.vlgmr.msra.gmra.mrb[100].mxu1 %v3218_v29  ;;  %v3621_v55 = vadd.f32 %v3617_v30, %v3139_v61  ;;  %v3612_v56 = vmul.f32 %v4641_v46, %v5264_v50  ;;  %v4614_v50 = vld [vmem:[%s5432_s6 + $0x28] sm:$0xff]   ;;  %v4617_v61 = vld [vmem:[%s5432_s6 + $0xf0] sm:$0xff]  }
 0x3e5   :  { %4457 = vmatpush3.bf16.msra.mxu1 %v4595_v27  ;;  %v3699_v35 = vrot.slane %v3691_v33, 1  ;;  %v3618_v59 = vadd.f32 %v3614_v49, %v5306_v44  ;;  %v4620_v44 = vld [vmem:[%s5432_s6 + $0x78] sm:$0xff]  }
 0x3e6   :  { %4437 = vmatpush3.bf16.msra.mxu0 %v4598_v28  ;;  %4458 = vmatprep.subr.bf16.mxu1 %v4597_v3  ;;  %v3625_v36 = vmax.f32 %v3621_v55, 0.0  ;;  %v3616_v39 = vmul.f32 %v3612_v56, %v5303_v48  ;;  %v4618_v48 = vld [vmem:[%s5432_s6 + $0x30] sm:$0xff]  }
 0x3e7   :  { %4438 = vmatprep.subr.bf16.mxu0 %v4600_v31  ;;  %3930 = vmatprep.mubr.bf16.mxu0 %v3699_v35  ;;  %v3622_v63 = vmax.f32 %v3618_v59, 0.0 }
 0x3e8   :  { %v3693_v43 = vpack.c.bf16 %v3625_v36, %v3625_v36  ;;  %v3620_v60 = vadd.f32 %v3616_v39, %v5312_v53  ;;  %v4623_v53 = vld [vmem:[%s5432_s6 + $0xb8] sm:$0xff]  }
 0x3e9   :  { %4459 = vmatpush3.bf16.msra.mxu1 %v4599_v58  ;;  %v3690_v6 = vpack.c.bf16 %v3622_v63, %v3622_v63 }
 0x3ea   :  { %4439 = vmatpush3.bf16.msra.mxu0 %v4602_v34  ;;  %v3701_v37 = vrot.slane %v3693_v43, 1  ;;  %4460 = vmatprep.subr.bf16.mxu1 %v4601_v14  ;;  %v3624_v41 = vmax.f32 %v3620_v60, 0.0 }
 0x3eb   :  { %4440 = vmatprep.subr.bf16.mxu0 %v4604_v40  ;;  %v3698_v7 = vrot.slane %v3690_v6, 1 }
 0x3ec   :  { %3970 = vmatprep.mubr.bf16.mxu1 %v3701_v37  ;;  %v3692_v10 = vpack.c.bf16 %v3624_v41, %v3624_v41 }
 0x3ed   :  { %4461 = vmatpush3.bf16.msra.mxu1 %v4603_v5 }
 0x3ee   :  { %4441 = vmatpush3.bf16.msra.mxu0 %v4606_v18  ;;  %4462 = vmatprep.subr.bf16.mxu1 %v4605_v21  ;;  %v3700_v11 = vrot.slane %v3692_v10, 1 }
 0x3ef   :  { %4442 = vmatprep.subr.bf16.mxu0 %v4608_v45 }
 0x3f1   :  { %4463 = vmatpush3.bf16.msra.mxu1 %v4607_v47 }
 0x3f2   :  { %4443 = vmatpush3.bf16.msra.mxu0 %v4610_v2  ;;  %4464 = vmatprep.subr.bf16.mxu1 %v4609_v62 }
 0x3f3   :  { %4444 = vmatprep.subr.bf16.mxu0 %v4612_v52 }
 0x3f5   :  { %4465 = vmatpush3.bf16.msra.mxu1 %v4611_v8 }
 0x3f6   :  { %4445 = vmatpush3.bf16.msra.mxu0 %v4614_v50  ;;  %4466 = vmatprep.subr.bf16.mxu1 %v4613_v57 }
 0x3f7   :  { %4446 = vmatprep.subr.bf16.mxu0 %v4616_v54 }
 0x3f9   :  { %4467 = vmatpush3.bf16.msra.mxu1 %v4615_v13 }
 0x3fa   :  { %4447 = vmatpush3.bf16.msra.mxu0 %v4618_v48  ;;  %4468 = vmatprep.subr.bf16.mxu1 %v4617_v61 }
 0x3fb   :  { %4448 = vmatprep.subr.bf16.mxu0 %v4620_v44 }
 0x3fd   :  { %4469 = vmatpush3.bf16.msra.mxu1 %v4619_v0 }
 0x3fe   :  { %4449 = vmatpush3.bf16.msra.mxu0 %v4622_v1  ;;  %4470 = vmatprep.subr.bf16.mxu1 %v4621_v4 }
 0x401   :  { %3931 = vmatmul.mubr.bf16.vlgmr.msra.gmra.mrb[104].mxu0 %v3698_v7  ;;  %4471 = vmatpush3.bf16.msra.mxu1 %v4623_v53 }
 0x404   :  { %3971 = vmatmul.mubr.bf16.vlgmr.msra.gmra.mrb[104].mxu1 %v3700_v11 }
 0x4b4   :  { %v4406_v51 = vpop.f32.mrb[100].mxu0 }
 0x4b5   :  { %v4407_v15 = vpop.f32.mrb[101].mxu0 }
 0x4b6   :  { %v4408_v32 = vadd.f32 %v4407_v15, %v4406_v51  ;;  %v4409_v16 = vpop.f32.mrb[102].mxu0 }
 0x4b7   :  { %v4410_v17 = vpop.f32.mrb[103].mxu0  ;;  %v4428_v9 = vpop.f32.mrb[100].mxu1 }
 0x4b8   :  { %v3453_v20 = vadd.f32 %v4408_v32, %v4325_v12  ;;  %v4429_v22 = vpop.f32.mrb[101].mxu1 }
 0x4b9   :  { %v4430_v23 = vadd.f32 %v4429_v22, %v4428_v9  ;;  %v4431_v19 = vpop.f32.mrb[102].mxu1 }
 0x4ba   :  { %v4432_v24 = vpop.f32.mrb[103].mxu1 }
 0x4bb   :  { %v3493_v25 = vadd.f32 %v4430_v23, %v3453_v20 }
 0x4bd   :  { %v3498_v27 = vmul.f32 %v3493_v25, %v3493_v25 }
 0x4bf   :  { %v3499_v28 = vsel %vm3012_vm3, %v3498_v27, 0.0 }
 0x4c0   :  { %3500 = vadd.xlane.f32.xlu0 %v3499_v28 }
 0x4d4   :  { %v4450_v29 = vpop.f32.mrb[104].mxu0 }
 0x4d5   :  { %v4451_v3 = vpop.f32.mrb[105].mxu0 }
 0x4d6   :  { %v4452_v38 = vadd.f32 %v4451_v3, %v4450_v29  ;;  %v4453_v30 = vpop.f32.mrb[106].mxu0 }
 0x4d7   :  { %v4454_v31 = vpop.f32.mrb[107].mxu0  ;;  %v4472_v33 = vpop.f32.mrb[104].mxu1 }
 0x4d8   :  { %v3933_v55 = vadd.f32 %v4452_v38, %v4325_v12  ;;  %v4473_v58 = vpop.f32.mrb[105].mxu1 }
 0x4d9   :  { %v4474_v34 = vadd.f32 %v4473_v58, %v4472_v33  ;;  %v4475_v35 = vpop.f32.mrb[106].mxu1 }
 0x4da   :  { %v4476_v36 = vpop.f32.mrb[107].mxu1 }
 0x4db   :  { %v3973_v14 = vadd.f32 %v4474_v34, %v3933_v55 }
 0x4dd   :  { %v3978_v40 = vmul.f32 %v3973_v14, %v3973_v14 }
 0x4df   :  { %v3979_v42 = vsel %vm3012_vm3, %v3978_v40, 0.0 }
 0x4e0   :  { %3980 = vadd.xlane.f32.xlu1 %v3979_v42 }
 0x54d   :  { %v3501_v43 = vpop.xlane.xlu0 %3500 }
 0x54e   :  { %v3502_v5 = vmax.f32 %v3501_v43, 1e-24 }
 0x550   :  { %4642 = vrsqrt.f32 %v3502_v5 }
 0x55a   :  { %v4643_v18 = vpop.eup %4642 }
 0x55b   :  { %v3504_v26 = vmul.f32 %v4643_v18, %v3493_v25 }
 0x55d   :  { %3505 = vst [vmem:[%s5435_s9] sm:$0x3] %v3504_v26 }
 0x56d   :  { %v3981_v37 = vpop.xlane.xlu1 %3980 }
 0x56e   :  { %v3982_v21 = vmax.f32 %v3981_v37, 1e-24 }
 0x570   :  { %4644 = vrsqrt.f32 %v3982_v21 }
 0x57a   :  { %v4645_v45 = vpop.eup %4644 }
 0x57b   :  { %v3984_v46 = vmul.f32 %v4645_v45, %v3973_v14 }
 0x57d   :  { %3985 = vst [vmem:[%s5435_s9 + $0x2] sm:$0x3] %v3984_v46 }
 0x57e   :  { %3994 = vsyncpa [#allocation3], 1 }

</bundles_post_ra>
